<compile_context>
chip_gen: v5e
topology: v5e:2x2
jax: 0.10.0
libtpu: 0.0.40
codegen_flags: <defaults>
</compile_context>

<pallas_src>
import math
from functools import partial

import jax
import jax.numpy as jnp
from jax.experimental import pallas as pl
from jax.experimental.pallas import tpu as pltpu

_TILE = 512                       # dims <= _TILE use a single full-extent block
_VMEM_LIMIT = 32 * 1024 * 1024    # safe on v5e/v6e/v7x; working set here is tiny


def _ceil_to(x, m):
    return ((x + m - 1) // m) * m


# --------------------------- Pallas matmul kernel ---------------------------

def _matmul_kernel(*refs, n_k, has_bias, activation):
    if has_bias:
        a_ref, b_ref, bias_ref, o_ref, acc_ref = refs
    else:
        a_ref, b_ref, o_ref, acc_ref = refs

    @pl.when(pl.program_id(2) == 0)
    def _():
        acc_ref[...] = jnp.zeros_like(acc_ref)

    acc_ref[...] += jnp.dot(a_ref[...], b_ref[...],
                            preferred_element_type=jnp.float32)

    @pl.when(pl.program_id(2) == n_k - 1)
    def _():
        r = acc_ref[...]
        if has_bias:
            r = r + bias_ref[...]
        if activation == "relu":
            r = jnp.maximum(r, 0.0)
        o_ref[...] = r.astype(o_ref.dtype)


def _fit(d, cap=_TILE):
    """Return (padded_dim, tile). Small dims: one full block, no padding."""
    if d <= cap:
        return d, d
    return _ceil_to(d, cap), cap


def pallas_linear(a, pack, activation=None, out_dtype=jnp.float32):
    """a: (M, K).  pack["w"]: (K, N) bf16 pre-transposed weight,
    pack["b"]: (1, N) f32 bias or None.  Bias / ReLU fused in the epilogue."""
    w = pack["w"]
    bias = pack.get("b", None)
    M, K = a.shape
    Kw, N = w.shape
    assert K == Kw, (K, Kw)

    Mp, tm = _fit(M)
    Np, tn = _fit(N)
    Kp, tk = _fit(K)

    a = a.astype(jnp.bfloat16)
    if (Mp, Kp) != (M, K):          # only when a dim exceeds the tile cap
        a = jnp.zeros((Mp, Kp), jnp.bfloat16).at[:M, :K].set(a)
    if (Kp, Np) != (K, N):
        w = jnp.zeros((Kp, Np), jnp.bfloat16).at[:K, :N].set(w)
        if bias is not None:
            bias = jnp.zeros((1, Np), jnp.float32).at[:, :N].set(bias)

    grid = (Mp // tm, Np // tn, Kp // tk)
    has_bias = bias is not None

    in_specs = [pl.BlockSpec((tm, tk), lambda i, j, k: (i, k)),
                pl.BlockSpec((tk, tn), lambda i, j, k: (k, j))]
    args = [a, w]
    if has_bias:
        in_specs.append(pl.BlockSpec((1, tn), lambda i, j, k: (0, j)))
        args.append(bias)

    out = pl.pallas_call(
        partial(_matmul_kernel, n_k=grid[2], has_bias=has_bias,
                activation=activation),
        out_shape=jax.ShapeDtypeStruct((Mp, Np), out_dtype),
        grid_spec=pltpu.PrefetchScalarGridSpec(
            num_scalar_prefetch=0,
            grid=grid,
            in_specs=in_specs,
            out_specs=pl.BlockSpec((tm, tn), lambda i, j, k: (i, j)),
            scratch_shapes=[pltpu.VMEM((tm, tn), jnp.float32)]),
        compiler_params=pltpu.CompilerParams(
            dimension_semantics=("parallel", "parallel", "arbitrary"),
            vmem_limit_bytes=_VMEM_LIMIT),
    )(*args)

    if (Mp, Np) != (M, N):
        out = out[:M, :N]
    return out


# -------------------------- Pallas attention kernel -------------------------

def _attention_kernel(q_ref, k_ref, v_ref, o_ref, *, scale):
    q = q_ref[0]
    k = k_ref[0]
    v = v_ref[0]
    # scores in f32 (bf16 operands, f32 accumulation); scale = 1/sqrt(k)
    s = jax.lax.dot_general(q, k, (((1,), (1,)), ((), ())),
                            preferred_element_type=jnp.float32) * scale
    m = jnp.max(s, axis=-1, keepdims=True)
    p = jnp.exp(s - m)
    denom = jnp.sum(p, axis=-1, keepdims=True)
    p = p * pl.reciprocal(denom, approx=True)          # EUP slot, ~free
    o_ref[0] = jax.lax.dot_general(p.astype(v.dtype), v,
                                   (((1,), (0,)), ((), ())),
                                   preferred_element_type=jnp.float32)


def pallas_attention(q, k, v, scale):
    """q, k, v: (G, T, Kh).  softmax(q k^T * scale) v per head -> (G, T, Kh)."""
    G, T, Kh = q.shape
    q = q.astype(jnp.bfloat16)
    k = k.astype(jnp.bfloat16)
    v = v.astype(jnp.bfloat16)
    # TODO(synk): switch to a key-tiled flash-style online softmax for long T;
    # the full (T, T) score tile is fine for the short windows this model uses.
    spec = pl.BlockSpec((1, T, Kh), lambda g: (g, 0, 0))
    return pl.pallas_call(
        partial(_attention_kernel, scale=scale),
        out_shape=jax.ShapeDtypeStruct((G, T, Kh), jnp.float32),
        grid=(G,),
        in_specs=[spec, spec, spec],
        out_specs=spec,
        compiler_params=pltpu.CompilerParams(
            dimension_semantics=("parallel",),   # B*heads shard across TCs
            vmem_limit_bytes=_VMEM_LIMIT),
    )(q, k, v)


# ------------------------------- small glue ---------------------------------

def batch_norm_cl(x, gamma, beta, eps=1e-5):
    """Training-mode batch norm with the channel on the LAST axis
    (statistics over every other axis) == nn.BatchNorm1d/2d batch stats."""
    axes = tuple(range(x.ndim - 1))
    mean = jnp.mean(x, axis=axes, keepdims=True)
    var = jnp.mean((x - mean) ** 2, axis=axes, keepdims=True)
    return (x - mean) * jax.lax.rsqrt(var + eps) * gamma + beta


def prelu(x, a):
    return jnp.where(x >= 0, x, a * x)


def make_pe(d_model, max_len):
    position = jnp.arange(max_len, dtype=jnp.float32)[:, None]
    div_term = jnp.exp(jnp.arange(0, d_model, 2, dtype=jnp.float32)
                       * -(math.log(10000.0) / d_model))
    pe = jnp.zeros((max_len, d_model), jnp.float32)
    pe = pe.at[:, 0::2].set(jnp.sin(position * div_term))
    pe = pe.at[:, 1::2].set(jnp.cos(position * div_term))
    return pe                       # (max_len, d_model)


def pack_gemm(w_kn, b=None):
    """Pre-transpose/pre-cast a weight once at init.  w_kn: (K_in, N_out)."""
    pack = {"w": jnp.asarray(w_kn, jnp.bfloat16)}
    pack["b"] = None if b is None else jnp.asarray(b, jnp.float32).reshape(1, -1)
    return pack


def _n_lags(cfg):
    # unified causal tap count for all TCN convs, rounded up to a sublane
    # multiple (the extra taps carry zero weights -> no runtime padding)
    return _ceil_to((cfg["kernel_size_grav"] - 1) * cfg["scale_num"] + 1, 8)


# ---------------------------- model forward pass ----------------------------

def imu_fusion_block(x, p, cfg):
    B, Cin, Hn, T = x.shape          # Hn == 9: grav | gyro | acc rows
    FC, S = cfg["fc"], cfg["scale_num"]
    L = _n_lags(cfg)

    # unified causal im2col over time lags 0..L-1, shared by every TCN conv
    xp = jnp.pad(x, ((0, 0), (0, 0), (0, 0), (L - 1, 0)))
    cols = jnp.stack([xp[..., L - 1 - lag: L - 1 - lag + T]
                      for lag in range(L)], axis=2)             # (B,Cin,L,Hn,T)
    A = cols.transpose(0, 3, 4, 1, 2).reshape(B * Hn * T, Cin * L)

    # one GEMM for all 3*scale_num TCN convs, bias + ReLU fused in-kernel
    out_all = pallas_linear(A, p["tcn_pack"], activation="relu")
    out_all = out_all.reshape(B, Hn, T, 3 * S * FC)

    grav_l, gyro_l, acc_l = [], [], []
    for i in range(S):
        base = i * 3 * FC
        grav_l.append(out_all[:, 0:3, :, base: base + FC])          # (B,3,T,FC)
        gyro_l.append(out_all[:, 3:6, :, base + FC: base + 2 * FC])
        acc_l.append(out_all[:, 6:9, :, base + 2 * FC: base + 3 * FC])

    S2 = 2 * S
    att = []
    for i in range(S):
        att.append(grav_l[i])
        att.append(gyro_l[i])
    oa = jnp.stack(att, axis=1)                  # (B, 2S, 3, T, FC)
    oa = oa.transpose(0, 3, 1, 2, 4)             # (B, T, 2S, 3, FC)
    oa = oa.reshape(B, T, S2, 3 * FC)

    attn = pallas_linear(oa.reshape(B * T * S2, 3 * FC), p["attn_pack"])
    attn = prelu(attn, p["prelu_a"]).reshape(B, T, S2)
    sensor_attn = jax.nn.softmax(attn, axis=2)[..., None]       # (B,T,2S,1)

    oa = sensor_attn * oa
    norm_num = jnp.mean(sensor_attn[..., 0], axis=1)            # (B, 2S)
    norm_num = jnp.sqrt(jnp.sum(norm_num ** 2, axis=1))         # (B,)
    norm_num = (S ** 0.5) / norm_num
    oa = oa * norm_num[:, None, None, None]

    oa3 = oa.reshape(B, T, S2 * 3, FC)
    per = []
    for j in range(S):
        chunk = oa3[:, :, 6 * j: 6 * j + 6, :]
        s_att = chunk[:, :, 0:3, :] + chunk[:, :, 3:6, :]       # (B,T,3,FC)
        per.append(s_att.transpose(0, 2, 1, 3))                 # (B,3,T,FC)
    out_attitude = jnp.concatenate(per, axis=1)                 # (B,3S,T,FC)
    out_dynamic = jnp.concatenate(acc_l, axis=1)                # (B,3S,T,FC)
    out = jnp.concatenate([out_attitude, out_dynamic], axis=1)  # (B,6S,T,FC)
    return out, sensor_attn


def same_conv_cl(x, pack, K):
    """Conv2d((1,K), pad=(0,K//2)), channel-last.  x: (B,H,T,C); weight rows
    of `pack` are ordered (tap, cin) to match the im2col columns below."""
    B, H, T, C = x.shape
    P = K // 2
    xp = jnp.pad(x, ((0, 0), (0, 0), (P, P), (0, 0)))
    cols = jnp.concatenate([xp[:, :, j: j + T, :] for j in range(K)], axis=-1)
    out = pallas_linear(cols.reshape(B * H * T, K * C), pack)   # bias fused
    return out.reshape(B, H, T, -1)


def transformer_block(x, p, heads):
    B, T, k = x.shape
    h = heads
    hk = h * k

    # fused QKV projection: one lane-dense GEMM with N = 3*h*k
    qkv = pallas_linear(x.reshape(B * T, k), p["wqkv"])         # (B*T, 3hk)

    def split_heads(y):
        return y.reshape(B, T, h, k).transpose(0, 2, 1, 3).reshape(B * h, T, k)

    q = split_heads(qkv[:, 0 * hk:1 * hk])
    ky = split_heads(qkv[:, 1 * hk:2 * hk])
    v = split_heads(qkv[:, 2 * hk:3 * hk])

    att = pallas_attention(q, ky, v, scale=1.0 / math.sqrt(k))  # (B*h,T,k)
    att = att.reshape(B, h, T, k).transpose(0, 2, 1, 3).reshape(B * T, hk)
    att = pallas_linear(att, p["wu"]).reshape(B, T, k) + x      # unify + resid

    xn = batch_norm_cl(att, p["g1"], p["b1"])

    ff = pallas_linear(xn.reshape(B * T, k), p["w1"], activation="relu",
                       out_dtype=jnp.bfloat16)                  # ReLU fused
    ff = pallas_linear(ff, p["w2"]).reshape(B, T, k) + xn
    return batch_norm_cl(ff, p["g2"], p["b2"])


def forward(x, params, cfg):
    B, _, _, T = x.shape

    x_cl, out_attn = imu_fusion_block(x, params["imu"], cfg)    # (B,6S,T,FC)

    # conv2/3/4: im2col GEMM (bias fused) + batch-stat BN + ReLU
    for name in ("conv2", "conv3", "conv4"):
        p = params[name]
        y = same_conv_cl(x_cl, p["pack"], cfg["kernel_size"])
        x_cl = jax.nn.relu(batch_norm_cl(y, p["gamma"], p["beta"]))

    # transition 1x1 conv == GEMM over the flattened (FC-major, H-minor) chans
    _, Hc, _, Cc = x_cl.shape
    xt = x_cl.transpose(0, 2, 3, 1).reshape(B * T, Cc * Hc)
    p = params["transition"]
    xt = pallas_linear(xt, p["pack"]).reshape(B, T, -1)
    xt = jax.nn.relu(batch_norm_cl(xt, p["gamma"], p["beta"]))

    xt = xt + params["pe"][None, :T, :]          # positional encoding
    # TODO(synk): dropout layers use drop_rate=0 -> identity (eval semantics).

    xt = transformer_block(xt, params["tb1"], cfg["heads"])
    xt = transformer_block(xt, params["tb2"], cfg["heads"])

    pooled = jnp.mean(xt, axis=1)                # global average pool -> (B,FCO)
    out = pallas_linear(pooled, params["linear_pack"])
    return out, out_attn


# ------------------------------ parameter init ------------------------------

def init_params(key, cfg):
    FC, S, FCO, h = cfg["fc"], cfg["scale_num"], cfg["fco"], cfg["heads"]
    Cin, ks, ksg = cfg["c2d"], cfg["kernel_size"], cfg["kernel_size_grav"]
    T, nc = cfg["T"], cfg["num_class"]
    L = _n_lags(cfg)
    keys = iter(jax.random.split(key, 64))

    def nrm(shape, scale=0.1):
        return scale * jax.random.normal(next(keys), shape, jnp.float32)

    # ---- IMU fusion TCN convs, folded into ONE GEMM weight over unified lags
    # (weight_norm at init is an identity reparameterisation -> folded here).
    n_tcn = 3 * S * FC
    W_tcn = jnp.zeros((Cin * L, n_tcn), jnp.float32)
    b_tcn = jnp.zeros((n_tcn,), jnp.float32)

    def add_conv(W, bvec, w, b, dilation, col0):
        Cout, Ci, Kc = w.shape
        for j in range(Kc):
            lag = (Kc - 1 - j) * dilation        # causal: out[t] += w[j]*x[t-lag]
            for ci in range(Ci):
                W = W.at[ci * L + lag, col0:col0 + Cout].set(w[:, ci, j])
        return W, bvec.at[col0:col0 + Cout].set(b)

    for i in range(S):
        k_gyro = max((ksg - 1) * (i + 1), 1)
        k_acc = (ksg - 1) * (i + 1) + 1
        base = i * 3 * FC
        W_tcn, b_tcn = add_conv(W_tcn, b_tcn, nrm((FC, Cin, ksg)), nrm((FC,)),
                                i + 1, base)                    # grav, dilated
        W_tcn, b_tcn = add_conv(W_tcn, b_tcn, nrm((FC, Cin, k_gyro)), nrm((FC,)),
                                1, base + FC)                   # gyro
        W_tcn, b_tcn = add_conv(W_tcn, b_tcn, nrm((FC, Cin, k_acc)), nrm((FC,)),
                                1, base + 2 * FC)               # acc

    params = {"imu": {
        "tcn_pack": pack_gemm(W_tcn, b_tcn),
        "attn_pack": pack_gemm(nrm((1, 3 * FC)).T, nrm((1,))),
        "prelu_a": jnp.asarray(0.25, jnp.float32),
    }}

    for name in ("conv2", "conv3", "conv4"):
        w, b = nrm((FC, FC, ks)), nrm((FC,))
        params[name] = {
            "pack": pack_gemm(w.transpose(2, 1, 0).reshape(ks * FC, FC), b),
            "gamma": jnp.ones((FC,), jnp.float32),
            "beta": jnp.zeros((FC,), jnp.float32)}

    Ct = FC * (cfg["input_channel"] - 3) * S     # reduced_channel = 3 (9-ch IMU)
    params["transition"] = {"pack": pack_gemm(nrm((FCO, Ct)).T, nrm((FCO,))),
                            "gamma": jnp.ones((FCO,), jnp.float32),
                            "beta": jnp.zeros((FCO,), jnp.float32)}
    params["pe"] = make_pe(FCO, T)

    def tb():
        wq, wk, wv = nrm((FCO * h, FCO)), nrm((FCO * h, FCO)), nrm((FCO * h, FCO))
        return {
            "wqkv": pack_gemm(jnp.concatenate([wq, wk, wv], axis=0).T),
            "wu": pack_gemm(nrm((FCO, FCO * h)).T, nrm((FCO,))),
            "g1": jnp.ones((FCO,), jnp.float32),
            "b1": jnp.zeros((FCO,), jnp.float32),
            "w1": pack_gemm(nrm((4 * FCO, FCO)).T, nrm((4 * FCO,))),
            "w2": pack_gemm(nrm((FCO, 4 * FCO)).T, nrm((FCO,))),
            "g2": jnp.ones((FCO,), jnp.float32),
            "b2": jnp.zeros((FCO,), jnp.float32),
        }

    params["tb1"] = tb()
    params["tb2"] = tb()
    params["linear_pack"] = pack_gemm(nrm((nc, FCO)).T, nrm((nc,)))
    return params


# ---------------------------------- main ------------------------------------

if __name__ == "__main__":
    cfg = dict(c2d=1, input_channel=9, fc=8, kernel_size=3, kernel_size_grav=3,
               scale_num=2, fco=32, heads=2, T=16, num_class=5, B=2)

    key = jax.random.PRNGKey(0)
    kp, kx = jax.random.split(key)
    params = init_params(kp, cfg)
    x = jax.random.normal(kx, (cfg["B"], cfg["c2d"], cfg["input_channel"],
                               cfg["T"]), jnp.float32)

    fwd = jax.jit(partial(forward, cfg=cfg))
    out, out_attn = fwd(x, params)
    jax.block_until_ready((out, out_attn))

    assert out.shape == (cfg["B"], cfg["num_class"])
    assert out_attn.shape == (cfg["B"], cfg["T"], 2 * cfg["scale_num"], 1)
    assert bool(jnp.all(jnp.isfinite(out)))
    print("KERNEL_OK")
</pallas_src>

<mosaic_0001>
module attributes {stable_mosaic.version = 11 : i64} {
  func.func @_matmul_kernel(%arg0: i32, %arg1: i32, %arg2: i32, %arg3: memref<288x8xbf16, #tpu.memory_space<vmem>>, %arg4: memref<8x48xbf16, #tpu.memory_space<vmem>>, %arg5: memref<1x48xf32, #tpu.memory_space<vmem>>, %arg6: memref<288x48xf32, #tpu.memory_space<vmem>>, %arg7: memref<288x48xf32, #tpu.memory_space<vmem>>) attributes {dimension_semantics = [#tpu.dimension_semantics<parallel>, #tpu.dimension_semantics<parallel>, #tpu.dimension_semantics<arbitrary>], iteration_bounds = array<i64: 1, 1, 1>, scalar_prefetch = 0 : i64, scratch_operands = 1 : i64, tpu.core_type = #tpu.core_type<tc>, window_params = [{transform_indices = @transform_0, window_bounds = array<i64: 288, 8>}, {transform_indices = @transform_1, window_bounds = array<i64: 8, 48>}, {transform_indices = @transform_2, window_bounds = array<i64: 1, 48>}, {transform_indices = @transform_3, window_bounds = array<i64: 288, 48>}]} {
    %c0_i32 = arith.constant 0 : i32
    %0 = arith.cmpi eq, %arg2, %c0_i32 : i32
    %1 = arith.extui %0 : i1 to i32
    %c0_i32_0 = arith.constant 0 : i32
    %2 = arith.cmpi ne, %1, %c0_i32_0 : i32
    scf.if %2 {
      %cst_10 = arith.constant 0.000000e+00 : f32
      %12 = vector.broadcast %cst_10 : f32 to vector<288x48xf32>
      %c0_11 = arith.constant 0 : index
      %c0_12 = arith.constant 0 : index
      %13 = vector.load %arg7[%c0_11, %c0_12] : memref<288x48xf32, #tpu.memory_space<vmem>>, vector<288x48xf32>
      tpu.vector_store %arg7[%c0_11, %c0_12], %12 {strides = array<i32>} : memref<288x48xf32, #tpu.memory_space<vmem>>, vector<288x48xf32>,
    } else {
    }
    %c0 = arith.constant 0 : index
    %c0_1 = arith.constant 0 : index
    %3 = vector.load %arg7[%c0, %c0_1] : memref<288x48xf32, #tpu.memory_space<vmem>>, vector<288x48xf32>
    %c0_2 = arith.constant 0 : index
    %c0_3 = arith.constant 0 : index
    %4 = vector.load %arg3[%c0_2, %c0_3] : memref<288x8xbf16, #tpu.memory_space<vmem>>, vector<288x8xbf16>
    %c0_4 = arith.constant 0 : index
    %c0_5 = arith.constant 0 : index
    %5 = vector.load %arg4[%c0_4, %c0_5] : memref<8x48xbf16, #tpu.memory_space<vmem>>, vector<8x48xbf16>
    %cst = arith.constant dense<0.000000e+00> : vector<288x48xf32>
    %6 = tpu.matmul %4, %5, %cst {dimension_numbers = #tpu.dot_dimension_numbers<[1], [0], [0], [1], [0, 0, 1, 1], [], []>} : vector<288x8xbf16>, vector<8x48xbf16>, vector<288x48xf32> -> vector<288x48xf32>
    %7 = arith.addf %3, %6 : vector<288x48xf32>
    %c0_6 = arith.constant 0 : index
    %c0_7 = arith.constant 0 : index
    %8 = vector.load %arg7[%c0_6, %c0_7] : memref<288x48xf32, #tpu.memory_space<vmem>>, vector<288x48xf32>
    tpu.vector_store %arg7[%c0_6, %c0_7], %7 {strides = array<i32>} : memref<288x48xf32, #tpu.memory_space<vmem>>, vector<288x48xf32>,
    %c0_i32_8 = arith.constant 0 : i32
    %9 = arith.cmpi eq, %arg2, %c0_i32_8 : i32
    %10 = arith.extui %9 : i1 to i32
    %c0_i32_9 = arith.constant 0 : i32
    %11 = arith.cmpi ne, %10, %c0_i32_9 : i32
    scf.if %11 {
      %c0_10 = arith.constant 0 : index
      %c0_11 = arith.constant 0 : index
      %12 = vector.load %arg7[%c0_10, %c0_11] : memref<288x48xf32, #tpu.memory_space<vmem>>, vector<288x48xf32>
      %c0_12 = arith.constant 0 : index
      %c0_13 = arith.constant 0 : index
      %13 = vector.load %arg5[%c0_12, %c0_13] : memref<1x48xf32, #tpu.memory_space<vmem>>, vector<1x48xf32>
      %14 = vector.broadcast %13 : vector<1x48xf32> to vector<288x48xf32>
      %15 = arith.addf %12, %14 : vector<288x48xf32>
      %cst_14 = arith.constant 0.000000e+00 : f32
      %16 = vector.broadcast %cst_14 : f32 to vector<288x48xf32>
      %17 = arith.maximumf %15, %16 : vector<288x48xf32>
      %c0_15 = arith.constant 0 : index
      %c0_16 = arith.constant 0 : index
      %18 = vector.load %arg6[%c0_15, %c0_16] : memref<288x48xf32, #tpu.memory_space<vmem>>, vector<288x48xf32>
      tpu.vector_store %arg6[%c0_15, %c0_16], %17 {strides = array<i32>} : memref<288x48xf32, #tpu.memory_space<vmem>>, vector<288x48xf32>,
    } else {
    }
    return
  }
  func.func @transform_0(%arg0: i32, %arg1: i32, %arg2: i32) -> (i32, i32) {
    %c0_i32 = arith.constant 0 : i32
    return %arg0, %arg2 : i32, i32
  }
  func.func @transform_1(%arg0: i32, %arg1: i32, %arg2: i32) -> (i32, i32) {
    %c0_i32 = arith.constant 0 : i32
    return %arg2, %arg1 : i32, i32
  }
  func.func @transform_2(%arg0: i32, %arg1: i32, %arg2: i32) -> (i32, i32) {
    %c0_i32 = arith.constant 0 : i32
    %c0_i32_0 = arith.constant 0 : i32
    return %c0_i32, %arg1 : i32, i32
  }
  func.func @transform_3(%arg0: i32, %arg1: i32, %arg2: i32) -> (i32, i32) {
    %c0_i32 = arith.constant 0 : i32
    return %arg0, %arg1 : i32, i32
  }
}

module attributes {stable_mosaic.version = 11 : i64} {
  func.func @_matmul_kernel(%arg0: i32, %arg1: i32, %arg2: i32, %arg3: memref<128x24xbf16, #tpu.memory_space<vmem>>, %arg4: memref<24x1xbf16, #tpu.memory_space<vmem>>, %arg5: memref<1x1xf32, #tpu.memory_space<vmem>>, %arg6: memref<128x1xf32, #tpu.memory_space<vmem>>, %arg7: memref<128x1xf32, #tpu.memory_space<vmem>>) attributes {dimension_semantics = [#tpu.dimension_semantics<parallel>, #tpu.dimension_semantics<parallel>, #tpu.dimension_semantics<arbitrary>], iteration_bounds = array<i64: 1, 1, 1>, scalar_prefetch = 0 : i64, scratch_operands = 1 : i64, tpu.core_type = #tpu.core_type<tc>, window_params = [{transform_indices = @transform_0, window_bounds = array<i64: 128, 24>}, {transform_indices = @transform_1, window_bounds = array<i64: 24, 1>}, {transform_indices = @transform_2, window_bounds = array<i64: 1, 1>}, {transform_indices = @transform_3, window_bounds = array<i64: 128, 1>}]} {
    %c0_i32 = arith.constant 0 : i32
    %0 = arith.cmpi eq, %arg2, %c0_i32 : i32
    %1 = arith.extui %0 : i1 to i32
    %c0_i32_0 = arith.constant 0 : i32
    %2 = arith.cmpi ne, %1, %c0_i32_0 : i32
    scf.if %2 {
      %cst_10 = arith.constant 0.000000e+00 : f32
      %12 = vector.broadcast %cst_10 : f32 to vector<128x1xf32>
      %c0_11 = arith.constant 0 : index
      %c0_12 = arith.constant 0 : index
      %13 = vector.load %arg7[%c0_11, %c0_12] : memref<128x1xf32, #tpu.memory_space<vmem>>, vector<128x1xf32>
      tpu.vector_store %arg7[%c0_11, %c0_12], %12 {strides = array<i32>} : memref<128x1xf32, #tpu.memory_space<vmem>>, vector<128x1xf32>,
    } else {
    }
    %c0 = arith.constant 0 : index
    %c0_1 = arith.constant 0 : index
    %3 = vector.load %arg7[%c0, %c0_1] : memref<128x1xf32, #tpu.memory_space<vmem>>, vector<128x1xf32>
    %c0_2 = arith.constant 0 : index
    %c0_3 = arith.constant 0 : index
    %4 = vector.load %arg3[%c0_2, %c0_3] : memref<128x24xbf16, #tpu.memory_space<vmem>>, vector<128x24xbf16>
    %c0_4 = arith.constant 0 : index
    %c0_5 = arith.constant 0 : index
    %5 = vector.load %arg4[%c0_4, %c0_5] : memref<24x1xbf16, #tpu.memory_space<vmem>>, vector<24x1xbf16>
    %cst = arith.constant dense<0.000000e+00> : vector<128x1xf32>
    %6 = tpu.matmul %4, %5, %cst {dimension_numbers = #tpu.dot_dimension_numbers<[1], [0], [0], [1], [0, 0, 1, 1], [], []>} : vector<128x24xbf16>, vector<24x1xbf16>, vector<128x1xf32> -> vector<128x1xf32>
    %7 = arith.addf %3, %6 : vector<128x1xf32>
    %c0_6 = arith.constant 0 : index
    %c0_7 = arith.constant 0 : index
    %8 = vector.load %arg7[%c0_6, %c0_7] : memref<128x1xf32, #tpu.memory_space<vmem>>, vector<128x1xf32>
    tpu.vector_store %arg7[%c0_6, %c0_7], %7 {strides = array<i32>} : memref<128x1xf32, #tpu.memory_space<vmem>>, vector<128x1xf32>,
    %c0_i32_8 = arith.constant 0 : i32
    %9 = arith.cmpi eq, %arg2, %c0_i32_8 : i32
    %10 = arith.extui %9 : i1 to i32
    %c0_i32_9 = arith.constant 0 : i32
    %11 = arith.cmpi ne, %10, %c0_i32_9 : i32
    scf.if %11 {
      %c0_10 = arith.constant 0 : index
      %c0_11 = arith.constant 0 : index
      %12 = vector.load %arg7[%c0_10, %c0_11] : memref<128x1xf32, #tpu.memory_space<vmem>>, vector<128x1xf32>
      %c0_12 = arith.constant 0 : index
      %c0_13 = arith.constant 0 : index
      %13 = vector.load %arg5[%c0_12, %c0_13] : memref<1x1xf32, #tpu.memory_space<vmem>>, vector<1x1xf32>
      %14 = vector.broadcast %13 : vector<1x1xf32> to vector<128x1xf32>
      %15 = arith.addf %12, %14 : vector<128x1xf32>
      %c0_14 = arith.constant 0 : index
      %c0_15 = arith.constant 0 : index
      %16 = vector.load %arg6[%c0_14, %c0_15] : memref<128x1xf32, #tpu.memory_space<vmem>>, vector<128x1xf32>
      tpu.vector_store %arg6[%c0_14, %c0_15], %15 {strides = array<i32>} : memref<128x1xf32, #tpu.memory_space<vmem>>, vector<128x1xf32>,
    } else {
    }
    return
  }
  func.func @transform_0(%arg0: i32, %arg1: i32, %arg2: i32) -> (i32, i32) {
    %c0_i32 = arith.constant 0 : i32
    return %arg0, %arg2 : i32, i32
  }
  func.func @transform_1(%arg0: i32, %arg1: i32, %arg2: i32) -> (i32, i32) {
    %c0_i32 = arith.constant 0 : i32
    return %arg2, %arg1 : i32, i32
  }
  func.func @transform_2(%arg0: i32, %arg1: i32, %arg2: i32) -> (i32, i32) {
    %c0_i32 = arith.constant 0 : i32
    %c0_i32_0 = arith.constant 0 : i32
    return %c0_i32, %arg1 : i32, i32
  }
  func.func @transform_3(%arg0: i32, %arg1: i32, %arg2: i32) -> (i32, i32) {
    %c0_i32 = arith.constant 0 : i32
    return %arg0, %arg1 : i32, i32
  }
}

module attributes {stable_mosaic.version = 11 : i64} {
  func.func @_matmul_kernel(%arg0: i32, %arg1: i32, %arg2: i32, %arg3: memref<384x24xbf16, #tpu.memory_space<vmem>>, %arg4: memref<24x8xbf16, #tpu.memory_space<vmem>>, %arg5: memref<1x8xf32, #tpu.memory_space<vmem>>, %arg6: memref<384x8xf32, #tpu.memory_space<vmem>>, %arg7: memref<384x8xf32, #tpu.memory_space<vmem>>) attributes {dimension_semantics = [#tpu.dimension_semantics<parallel>, #tpu.dimension_semantics<parallel>, #tpu.dimension_semantics<arbitrary>], iteration_bounds = array<i64: 1, 1, 1>, scalar_prefetch = 0 : i64, scratch_operands = 1 : i64, tpu.core_type = #tpu.core_type<tc>, window_params = [{transform_indices = @transform_0, window_bounds = array<i64: 384, 24>}, {transform_indices = @transform_1, window_bounds = array<i64: 24, 8>}, {transform_indices = @transform_2, window_bounds = array<i64: 1, 8>}, {transform_indices = @transform_3, window_bounds = array<i64: 384, 8>}]} {
    %c0_i32 = arith.constant 0 : i32
    %0 = arith.cmpi eq, %arg2, %c0_i32 : i32
    %1 = arith.extui %0 : i1 to i32
    %c0_i32_0 = arith.constant 0 : i32
    %2 = arith.cmpi ne, %1, %c0_i32_0 : i32
    scf.if %2 {
      %cst_10 = arith.constant 0.000000e+00 : f32
      %12 = vector.broadcast %cst_10 : f32 to vector<384x8xf32>
      %c0_11 = arith.constant 0 : index
      %c0_12 = arith.constant 0 : index
      %13 = vector.load %arg7[%c0_11, %c0_12] : memref<384x8xf32, #tpu.memory_space<vmem>>, vector<384x8xf32>
      tpu.vector_store %arg7[%c0_11, %c0_12], %12 {strides = array<i32>} : memref<384x8xf32, #tpu.memory_space<vmem>>, vector<384x8xf32>,
    } else {
    }
    %c0 = arith.constant 0 : index
    %c0_1 = arith.constant 0 : index
    %3 = vector.load %arg7[%c0, %c0_1] : memref<384x8xf32, #tpu.memory_space<vmem>>, vector<384x8xf32>
    %c0_2 = arith.constant 0 : index
    %c0_3 = arith.constant 0 : index
    %4 = vector.load %arg3[%c0_2, %c0_3] : memref<384x24xbf16, #tpu.memory_space<vmem>>, vector<384x24xbf16>
    %c0_4 = arith.constant 0 : index
    %c0_5 = arith.constant 0 : index
    %5 = vector.load %arg4[%c0_4, %c0_5] : memref<24x8xbf16, #tpu.memory_space<vmem>>, vector<24x8xbf16>
    %cst = arith.constant dense<0.000000e+00> : vector<384x8xf32>
    %6 = tpu.matmul %4, %5, %cst {dimension_numbers = #tpu.dot_dimension_numbers<[1], [0], [0], [1], [0, 0, 1, 1], [], []>} : vector<384x24xbf16>, vector<24x8xbf16>, vector<384x8xf32> -> vector<384x8xf32>
    %7 = arith.addf %3, %6 : vector<384x8xf32>
    %c0_6 = arith.constant 0 : index
    %c0_7 = arith.constant 0 : index
    %8 = vector.load %arg7[%c0_6, %c0_7] : memref<384x8xf32, #tpu.memory_space<vmem>>, vector<384x8xf32>
    tpu.vector_store %arg7[%c0_6, %c0_7], %7 {strides = array<i32>} : memref<384x8xf32, #tpu.memory_space<vmem>>, vector<384x8xf32>,
    %c0_i32_8 = arith.constant 0 : i32
    %9 = arith.cmpi eq, %arg2, %c0_i32_8 : i32
    %10 = arith.extui %9 : i1 to i32
    %c0_i32_9 = arith.constant 0 : i32
    %11 = arith.cmpi ne, %10, %c0_i32_9 : i32
    scf.if %11 {
      %c0_10 = arith.constant 0 : index
      %c0_11 = arith.constant 0 : index
      %12 = vector.load %arg7[%c0_10, %c0_11] : memref<384x8xf32, #tpu.memory_space<vmem>>, vector<384x8xf32>
      %c0_12 = arith.constant 0 : index
      %c0_13 = arith.constant 0 : index
      %13 = vector.load %arg5[%c0_12, %c0_13] : memref<1x8xf32, #tpu.memory_space<vmem>>, vector<1x8xf32>
      %14 = vector.broadcast %13 : vector<1x8xf32> to vector<384x8xf32>
      %15 = arith.addf %12, %14 : vector<384x8xf32>
      %c0_14 = arith.constant 0 : index
      %c0_15 = arith.constant 0 : index
      %16 = vector.load %arg6[%c0_14, %c0_15] : memref<384x8xf32, #tpu.memory_space<vmem>>, vector<384x8xf32>
      tpu.vector_store %arg6[%c0_14, %c0_15], %15 {strides = array<i32>} : memref<384x8xf32, #tpu.memory_space<vmem>>, vector<384x8xf32>,
    } else {
    }
    return
  }
  func.func @transform_0(%arg0: i32, %arg1: i32, %arg2: i32) -> (i32, i32) {
    %c0_i32 = arith.constant 0 : i32
    return %arg0, %arg2 : i32, i32
  }
  func.func @transform_1(%arg0: i32, %arg1: i32, %arg2: i32) -> (i32, i32) {
    %c0_i32 = arith.constant 0 : i32
    return %arg2, %arg1 : i32, i32
  }
  func.func @transform_2(%arg0: i32, %arg1: i32, %arg2: i32) -> (i32, i32) {
    %c0_i32 = arith.constant 0 : i32
    %c0_i32_0 = arith.constant 0 : i32
    return %c0_i32, %arg1 : i32, i32
  }
  func.func @transform_3(%arg0: i32, %arg1: i32, %arg2: i32) -> (i32, i32) {
    %c0_i32 = arith.constant 0 : i32
    return %arg0, %arg1 : i32, i32
  }
}

module attributes {stable_mosaic.version = 11 : i64} {
  func.func @_matmul_kernel(%arg0: i32, %arg1: i32, %arg2: i32, %arg3: memref<32x96xbf16, #tpu.memory_space<vmem>>, %arg4: memref<96x32xbf16, #tpu.memory_space<vmem>>, %arg5: memref<1x32xf32, #tpu.memory_space<vmem>>, %arg6: memref<32x32xf32, #tpu.memory_space<vmem>>, %arg7: memref<32x32xf32, #tpu.memory_space<vmem>>) attributes {dimension_semantics = [#tpu.dimension_semantics<parallel>, #tpu.dimension_semantics<parallel>, #tpu.dimension_semantics<arbitrary>], iteration_bounds = array<i64: 1, 1, 1>, scalar_prefetch = 0 : i64, scratch_operands = 1 : i64, tpu.core_type = #tpu.core_type<tc>, window_params = [{transform_indices = @transform_0, window_bounds = array<i64: 32, 96>}, {transform_indices = @transform_1, window_bounds = array<i64: 96, 32>}, {transform_indices = @transform_2, window_bounds = array<i64: 1, 32>}, {transform_indices = @transform_3, window_bounds = array<i64: 32, 32>}]} {
    %c0_i32 = arith.constant 0 : i32
    %0 = arith.cmpi eq, %arg2, %c0_i32 : i32
    %1 = arith.extui %0 : i1 to i32
    %c0_i32_0 = arith.constant 0 : i32
    %2 = arith.cmpi ne, %1, %c0_i32_0 : i32
    scf.if %2 {
      %cst_10 = arith.constant 0.000000e+00 : f32
      %12 = vector.broadcast %cst_10 : f32 to vector<32x32xf32>
      %c0_11 = arith.constant 0 : index
      %c0_12 = arith.constant 0 : index
      %13 = vector.load %arg7[%c0_11, %c0_12] : memref<32x32xf32, #tpu.memory_space<vmem>>, vector<32x32xf32>
      tpu.vector_store %arg7[%c0_11, %c0_12], %12 {strides = array<i32>} : memref<32x32xf32, #tpu.memory_space<vmem>>, vector<32x32xf32>,
    } else {
    }
    %c0 = arith.constant 0 : index
    %c0_1 = arith.constant 0 : index
    %3 = vector.load %arg7[%c0, %c0_1] : memref<32x32xf32, #tpu.memory_space<vmem>>, vector<32x32xf32>
    %c0_2 = arith.constant 0 : index
    %c0_3 = arith.constant 0 : index
    %4 = vector.load %arg3[%c0_2, %c0_3] : memref<32x96xbf16, #tpu.memory_space<vmem>>, vector<32x96xbf16>
    %c0_4 = arith.constant 0 : index
    %c0_5 = arith.constant 0 : index
    %5 = vector.load %arg4[%c0_4, %c0_5] : memref<96x32xbf16, #tpu.memory_space<vmem>>, vector<96x32xbf16>
    %cst = arith.constant dense<0.000000e+00> : vector<32x32xf32>
    %6 = tpu.matmul %4, %5, %cst {dimension_numbers = #tpu.dot_dimension_numbers<[1], [0], [0], [1], [0, 0, 1, 1], [], []>} : vector<32x96xbf16>, vector<96x32xbf16>, vector<32x32xf32> -> vector<32x32xf32>
    %7 = arith.addf %3, %6 : vector<32x32xf32>
    %c0_6 = arith.constant 0 : index
    %c0_7 = arith.constant 0 : index
    %8 = vector.load %arg7[%c0_6, %c0_7] : memref<32x32xf32, #tpu.memory_space<vmem>>, vector<32x32xf32>
    tpu.vector_store %arg7[%c0_6, %c0_7], %7 {strides = array<i32>} : memref<32x32xf32, #tpu.memory_space<vmem>>, vector<32x32xf32>,
    %c0_i32_8 = arith.constant 0 : i32
    %9 = arith.cmpi eq, %arg2, %c0_i32_8 : i32
    %10 = arith.extui %9 : i1 to i32
    %c0_i32_9 = arith.constant 0 : i32
    %11 = arith.cmpi ne, %10, %c0_i32_9 : i32
    scf.if %11 {
      %c0_10 = arith.constant 0 : index
      %c0_11 = arith.constant 0 : index
      %12 = vector.load %arg7[%c0_10, %c0_11] : memref<32x32xf32, #tpu.memory_space<vmem>>, vector<32x32xf32>
      %c0_12 = arith.constant 0 : index
      %c0_13 = arith.constant 0 : index
      %13 = vector.load %arg5[%c0_12, %c0_13] : memref<1x32xf32, #tpu.memory_space<vmem>>, vector<1x32xf32>
      %14 = vector.broadcast %13 : vector<1x32xf32> to vector<32x32xf32>
      %15 = arith.addf %12, %14 : vector<32x32xf32>
      %c0_14 = arith.constant 0 : index
      %c0_15 = arith.constant 0 : index
      %16 = vector.load %arg6[%c0_14, %c0_15] : memref<32x32xf32, #tpu.memory_space<vmem>>, vector<32x32xf32>
      tpu.vector_store %arg6[%c0_14, %c0_15], %15 {strides = array<i32>} : memref<32x32xf32, #tpu.memory_space<vmem>>, vector<32x32xf32>,
    } else {
    }
    return
  }
  func.func @transform_0(%arg0: i32, %arg1: i32, %arg2: i32) -> (i32, i32) {
    %c0_i32 = arith.constant 0 : i32
    return %arg0, %arg2 : i32, i32
  }
  func.func @transform_1(%arg0: i32, %arg1: i32, %arg2: i32) -> (i32, i32) {
    %c0_i32 = arith.constant 0 : i32
    return %arg2, %arg1 : i32, i32
  }
  func.func @transform_2(%arg0: i32, %arg1: i32, %arg2: i32) -> (i32, i32) {
    %c0_i32 = arith.constant 0 : i32
    %c0_i32_0 = arith.constant 0 : i32
    return %c0_i32, %arg1 : i32, i32
  }
  func.func @transform_3(%arg0: i32, %arg1: i32, %arg2: i32) -> (i32, i32) {
    %c0_i32 = arith.constant 0 : i32
    return %arg0, %arg1 : i32, i32
  }
}

module attributes {stable_mosaic.version = 11 : i64} {
  func.func @_matmul_kernel(%arg0: i32, %arg1: i32, %arg2: i32, %arg3: memref<32x32xbf16, #tpu.memory_space<vmem>>, %arg4: memref<32x192xbf16, #tpu.memory_space<vmem>>, %arg5: memref<32x192xf32, #tpu.memory_space<vmem>>, %arg6: memref<32x192xf32, #tpu.memory_space<vmem>>) attributes {dimension_semantics = [#tpu.dimension_semantics<parallel>, #tpu.dimension_semantics<parallel>, #tpu.dimension_semantics<arbitrary>], iteration_bounds = array<i64: 1, 1, 1>, scalar_prefetch = 0 : i64, scratch_operands = 1 : i64, tpu.core_type = #tpu.core_type<tc>, window_params = [{transform_indices = @transform_0, window_bounds = array<i64: 32, 32>}, {transform_indices = @transform_1, window_bounds = array<i64: 32, 192>}, {transform_indices = @transform_2, window_bounds = array<i64: 32, 192>}]} {
    %c0_i32 = arith.constant 0 : i32
    %0 = arith.cmpi eq, %arg2, %c0_i32 : i32
    %1 = arith.extui %0 : i1 to i32
    %c0_i32_0 = arith.constant 0 : i32
    %2 = arith.cmpi ne, %1, %c0_i32_0 : i32
    scf.if %2 {
      %cst_10 = arith.constant 0.000000e+00 : f32
      %12 = vector.broadcast %cst_10 : f32 to vector<32x192xf32>
      %c0_11 = arith.constant 0 : index
      %c0_12 = arith.constant 0 : index
      %13 = vector.load %arg6[%c0_11, %c0_12] : memref<32x192xf32, #tpu.memory_space<vmem>>, vector<32x192xf32>
      tpu.vector_store %arg6[%c0_11, %c0_12], %12 {strides = array<i32>} : memref<32x192xf32, #tpu.memory_space<vmem>>, vector<32x192xf32>,
    } else {
    }
    %c0 = arith.constant 0 : index
    %c0_1 = arith.constant 0 : index
    %3 = vector.load %arg6[%c0, %c0_1] : memref<32x192xf32, #tpu.memory_space<vmem>>, vector<32x192xf32>
    %c0_2 = arith.constant 0 : index
    %c0_3 = arith.constant 0 : index
    %4 = vector.load %arg3[%c0_2, %c0_3] : memref<32x32xbf16, #tpu.memory_space<vmem>>, vector<32x32xbf16>
    %c0_4 = arith.constant 0 : index
    %c0_5 = arith.constant 0 : index
    %5 = vector.load %arg4[%c0_4, %c0_5] : memref<32x192xbf16, #tpu.memory_space<vmem>>, vector<32x192xbf16>
    %cst = arith.constant dense<0.000000e+00> : vector<32x192xf32>
    %6 = tpu.matmul %4, %5, %cst {dimension_numbers = #tpu.dot_dimension_numbers<[1], [0], [0], [1], [0, 0, 1, 1], [], []>} : vector<32x32xbf16>, vector<32x192xbf16>, vector<32x192xf32> -> vector<32x192xf32>
    %7 = arith.addf %3, %6 : vector<32x192xf32>
    %c0_6 = arith.constant 0 : index
    %c0_7 = arith.constant 0 : index
    %8 = vector.load %arg6[%c0_6, %c0_7] : memref<32x192xf32, #tpu.memory_space<vmem>>, vector<32x192xf32>
    tpu.vector_store %arg6[%c0_6, %c0_7], %7 {strides = array<i32>} : memref<32x192xf32, #tpu.memory_space<vmem>>, vector<32x192xf32>,
    %c0_i32_8 = arith.constant 0 : i32
    %9 = arith.cmpi eq, %arg2, %c0_i32_8 : i32
    %10 = arith.extui %9 : i1 to i32
    %c0_i32_9 = arith.constant 0 : i32
    %11 = arith.cmpi ne, %10, %c0_i32_9 : i32
    scf.if %11 {
      %c0_10 = arith.constant 0 : index
      %c0_11 = arith.constant 0 : index
      %12 = vector.load %arg6[%c0_10, %c0_11] : memref<32x192xf32, #tpu.memory_space<vmem>>, vector<32x192xf32>
      %c0_12 = arith.constant 0 : index
      %c0_13 = arith.constant 0 : index
      %13 = vector.load %arg5[%c0_12, %c0_13] : memref<32x192xf32, #tpu.memory_space<vmem>>, vector<32x192xf32>
      tpu.vector_store %arg5[%c0_12, %c0_13], %12 {strides = array<i32>} : memref<32x192xf32, #tpu.memory_space<vmem>>, vector<32x192xf32>,
    } else {
    }
    return
  }
  func.func @transform_0(%arg0: i32, %arg1: i32, %arg2: i32) -> (i32, i32) {
    %c0_i32 = arith.constant 0 : i32
    return %arg0, %arg2 : i32, i32
  }
  func.func @transform_1(%arg0: i32, %arg1: i32, %arg2: i32) -> (i32, i32) {
    %c0_i32 = arith.constant 0 : i32
    return %arg2, %arg1 : i32, i32
  }
  func.func @transform_2(%arg0: i32, %arg1: i32, %arg2: i32) -> (i32, i32) {
    %c0_i32 = arith.constant 0 : i32
    return %arg0, %arg1 : i32, i32
  }
}

module attributes {stable_mosaic.version = 11 : i64} {
  func.func @_attention_kernel(%arg0: i32, %arg1: memref<1x16x32xbf16, #tpu.memory_space<vmem>>, %arg2: memref<1x16x32xbf16, #tpu.memory_space<vmem>>, %arg3: memref<1x16x32xbf16, #tpu.memory_space<vmem>>, %arg4: memref<1x16x32xf32, #tpu.memory_space<vmem>>) attributes {dimension_semantics = [#tpu.dimension_semantics<parallel>], iteration_bounds = array<i64: 4>, scalar_prefetch = 0 : i64, scratch_operands = 0 : i64, tpu.core_type = #tpu.core_type<tc>, window_params = [{transform_indices = @transform_0, window_bounds = array<i64: 1, 16, 32>}, {transform_indices = @transform_1, window_bounds = array<i64: 1, 16, 32>}, {transform_indices = @transform_2, window_bounds = array<i64: 1, 16, 32>}, {transform_indices = @transform_3, window_bounds = array<i64: 1, 16, 32>}]} {
    %c0 = arith.constant 0 : index
    %c0_0 = arith.constant 0 : index
    %c0_1 = arith.constant 0 : index
    %0 = vector.load %arg1[%c0, %c0_0, %c0_1] : memref<1x16x32xbf16, #tpu.memory_space<vmem>>, vector<1x16x32xbf16>
    %1 = vector.shape_cast %0 : vector<1x16x32xbf16> to vector<16x32xbf16>
    %c0_2 = arith.constant 0 : index
    %c0_3 = arith.constant 0 : index
    %c0_4 = arith.constant 0 : index
    %2 = vector.load %arg2[%c0_2, %c0_3, %c0_4] : memref<1x16x32xbf16, #tpu.memory_space<vmem>>, vector<1x16x32xbf16>
    %3 = vector.shape_cast %2 : vector<1x16x32xbf16> to vector<16x32xbf16>
    %c0_5 = arith.constant 0 : index
    %c0_6 = arith.constant 0 : index
    %c0_7 = arith.constant 0 : index
    %4 = vector.load %arg3[%c0_5, %c0_6, %c0_7] : memref<1x16x32xbf16, #tpu.memory_space<vmem>>, vector<1x16x32xbf16>
    %5 = vector.shape_cast %4 : vector<1x16x32xbf16> to vector<16x32xbf16>
    %cst = arith.constant dense<0.000000e+00> : vector<16x16xf32>
    %6 = tpu.matmul %1, %3, %cst {dimension_numbers = #tpu.dot_dimension_numbers<[1], [1], [0], [0], [0, 0, 1, 0], [], []>} : vector<16x32xbf16>, vector<16x32xbf16>, vector<16x16xf32> -> vector<16x16xf32>
    %cst_8 = arith.constant 0.176776692 : f32
    %7 = vector.broadcast %cst_8 : f32 to vector<16x16xf32>
    %8 = arith.mulf %6, %7 : vector<16x16xf32>
    %cst_9 = arith.constant dense<0xFF800000> : vector<16xf32>
    %9 = vector.multi_reduction <maximumf>, %8, %cst_9 [1] : vector<16x16xf32> to vector<16xf32>
    %10 = vector.shape_cast %9 : vector<16xf32> to vector<16x1xf32>
    %11 = vector.broadcast %10 : vector<16x1xf32> to vector<16x16xf32>
    %12 = arith.subf %8, %11 : vector<16x16xf32>
    %13 = math.exp %12 : vector<16x16xf32>
    %cst_10 = arith.constant dense<0.000000e+00> : vector<16xf32>
    %14 = vector.multi_reduction <add>, %13, %cst_10 [1] : vector<16x16xf32> to vector<16xf32>
    %15 = vector.shape_cast %14 : vector<16xf32> to vector<16x1xf32>
    %16 = tpu.reciprocal %15 {approx = true} : vector<16x1xf32> -> vector<16x1xf32>
    %17 = vector.broadcast %16 : vector<16x1xf32> to vector<16x16xf32>
    %18 = arith.mulf %13, %17 : vector<16x16xf32>
    %19 = arith.truncf %18 : vector<16x16xf32> to vector<16x16xbf16>
    %cst_11 = arith.constant dense<0.000000e+00> : vector<16x32xf32>
    %20 = tpu.matmul %19, %5, %cst_11 {dimension_numbers = #tpu.dot_dimension_numbers<[1], [0], [0], [1], [0, 0, 1, 1], [], []>} : vector<16x16xbf16>, vector<16x32xbf16>, vector<16x32xf32> -> vector<16x32xf32>
    %c0_12 = arith.constant 0 : index
    %c0_13 = arith.constant 0 : index
    %c0_14 = arith.constant 0 : index
    %21 = vector.load %arg4[%c0_12, %c0_13, %c0_14] : memref<1x16x32xf32, #tpu.memory_space<vmem>>, vector<1x16x32xf32>
    %22 = vector.shape_cast %21 : vector<1x16x32xf32> to vector<16x32xf32>
    %23 = vector.shape_cast %20 : vector<16x32xf32> to vector<1x16x32xf32>
    tpu.vector_store %arg4[%c0_12, %c0_13, %c0_14], %23 {strides = array<i32>} : memref<1x16x32xf32, #tpu.memory_space<vmem>>, vector<1x16x32xf32>,
    return
  }
  func.func @transform_0(%arg0: i32) -> (i32, i32, i32) {
    %c0_i32 = arith.constant 0 : i32
    %c0_i32_0 = arith.constant 0 : i32
    %c0_i32_1 = arith.constant 0 : i32
    return %arg0, %c0_i32, %c0_i32_0 : i32, i32, i32
  }
  func.func @transform_1(%arg0: i32) -> (i32, i32, i32) {
    %c0_i32 = arith.constant 0 : i32
    %c0_i32_0 = arith.constant 0 : i32
    %c0_i32_1 = arith.constant 0 : i32
    return %arg0, %c0_i32, %c0_i32_0 : i32, i32, i32
  }
  func.func @transform_2(%arg0: i32) -> (i32, i32, i32) {
    %c0_i32 = arith.constant 0 : i32
    %c0_i32_0 = arith.constant 0 : i32
    %c0_i32_1 = arith.constant 0 : i32
    return %arg0, %c0_i32, %c0_i32_0 : i32, i32, i32
  }
  func.func @transform_3(%arg0: i32) -> (i32, i32, i32) {
    %c0_i32 = arith.constant 0 : i32
    %c0_i32_0 = arith.constant 0 : i32
    %c0_i32_1 = arith.constant 0 : i32
    return %arg0, %c0_i32, %c0_i32_0 : i32, i32, i32
  }
}

module attributes {stable_mosaic.version = 11 : i64} {
  func.func @_matmul_kernel(%arg0: i32, %arg1: i32, %arg2: i32, %arg3: memref<32x32xbf16, #tpu.memory_space<vmem>>, %arg4: memref<32x128xbf16, #tpu.memory_space<vmem>>, %arg5: memref<1x128xf32, #tpu.memory_space<vmem>>, %arg6: memref<32x128xbf16, #tpu.memory_space<vmem>>, %arg7: memref<32x128xf32, #tpu.memory_space<vmem>>) attributes {dimension_semantics = [#tpu.dimension_semantics<parallel>, #tpu.dimension_semantics<parallel>, #tpu.dimension_semantics<arbitrary>], iteration_bounds = array<i64: 1, 1, 1>, scalar_prefetch = 0 : i64, scratch_operands = 1 : i64, tpu.core_type = #tpu.core_type<tc>, window_params = [{transform_indices = @transform_0, window_bounds = array<i64: 32, 32>}, {transform_indices = @transform_1, window_bounds = array<i64: 32, 128>}, {transform_indices = @transform_2, window_bounds = array<i64: 1, 128>}, {transform_indices = @transform_3, window_bounds = array<i64: 32, 128>}]} {
    %c0_i32 = arith.constant 0 : i32
    %0 = arith.cmpi eq, %arg2, %c0_i32 : i32
    %1 = arith.extui %0 : i1 to i32
    %c0_i32_0 = arith.constant 0 : i32
    %2 = arith.cmpi ne, %1, %c0_i32_0 : i32
    scf.if %2 {
      %cst_10 = arith.constant 0.000000e+00 : f32
      %12 = vector.broadcast %cst_10 : f32 to vector<32x128xf32>
      %c0_11 = arith.constant 0 : index
      %c0_12 = arith.constant 0 : index
      %13 = vector.load %arg7[%c0_11, %c0_12] : memref<32x128xf32, #tpu.memory_space<vmem>>, vector<32x128xf32>
      tpu.vector_store %arg7[%c0_11, %c0_12], %12 {strides = array<i32>} : memref<32x128xf32, #tpu.memory_space<vmem>>, vector<32x128xf32>,
    } else {
    }
    %c0 = arith.constant 0 : index
    %c0_1 = arith.constant 0 : index
    %3 = vector.load %arg7[%c0, %c0_1] : memref<32x128xf32, #tpu.memory_space<vmem>>, vector<32x128xf32>
    %c0_2 = arith.constant 0 : index
    %c0_3 = arith.constant 0 : index
    %4 = vector.load %arg3[%c0_2, %c0_3] : memref<32x32xbf16, #tpu.memory_space<vmem>>, vector<32x32xbf16>
    %c0_4 = arith.constant 0 : index
    %c0_5 = arith.constant 0 : index
    %5 = vector.load %arg4[%c0_4, %c0_5] : memref<32x128xbf16, #tpu.memory_space<vmem>>, vector<32x128xbf16>
    %cst = arith.constant dense<0.000000e+00> : vector<32x128xf32>
    %6 = tpu.matmul %4, %5, %cst {dimension_numbers = #tpu.dot_dimension_numbers<[1], [0], [0], [1], [0, 0, 1, 1], [], []>} : vector<32x32xbf16>, vector<32x128xbf16>, vector<32x128xf32> -> vector<32x128xf32>
    %7 = arith.addf %3, %6 : vector<32x128xf32>
    %c0_6 = arith.constant 0 : index
    %c0_7 = arith.constant 0 : index
    %8 = vector.load %arg7[%c0_6, %c0_7] : memref<32x128xf32, #tpu.memory_space<vmem>>, vector<32x128xf32>
    tpu.vector_store %arg7[%c0_6, %c0_7], %7 {strides = array<i32>} : memref<32x128xf32, #tpu.memory_space<vmem>>, vector<32x128xf32>,
    %c0_i32_8 = arith.constant 0 : i32
    %9 = arith.cmpi eq, %arg2, %c0_i32_8 : i32
    %10 = arith.extui %9 : i1 to i32
    %c0_i32_9 = arith.constant 0 : i32
    %11 = arith.cmpi ne, %10, %c0_i32_9 : i32
    scf.if %11 {
      %c0_10 = arith.constant 0 : index
      %c0_11 = arith.constant 0 : index
      %12 = vector.load %arg7[%c0_10, %c0_11] : memref<32x128xf32, #tpu.memory_space<vmem>>, vector<32x128xf32>
      %c0_12 = arith.constant 0 : index
      %c0_13 = arith.constant 0 : index
      %13 = vector.load %arg5[%c0_12, %c0_13] : memref<1x128xf32, #tpu.memory_space<vmem>>, vector<1x128xf32>
      %14 = vector.broadcast %13 : vector<1x128xf32> to vector<32x128xf32>
      %15 = arith.addf %12, %14 : vector<32x128xf32>
      %cst_14 = arith.constant 0.000000e+00 : f32
      %16 = vector.broadcast %cst_14 : f32 to vector<32x128xf32>
      %17 = arith.maximumf %15, %16 : vector<32x128xf32>
      %18 = arith.truncf %17 : vector<32x128xf32> to vector<32x128xbf16>
      %c0_15 = arith.constant 0 : index
      %c0_16 = arith.constant 0 : index
      %19 = vector.load %arg6[%c0_15, %c0_16] : memref<32x128xbf16, #tpu.memory_space<vmem>>, vector<32x128xbf16>
      tpu.vector_store %arg6[%c0_15, %c0_16], %18 {strides = array<i32>} : memref<32x128xbf16, #tpu.memory_space<vmem>>, vector<32x128xbf16>,
    } else {
    }
    return
  }
  func.func @transform_0(%arg0: i32, %arg1: i32, %arg2: i32) -> (i32, i32) {
    %c0_i32 = arith.constant 0 : i32
    return %arg0, %arg2 : i32, i32
  }
  func.func @transform_1(%arg0: i32, %arg1: i32, %arg2: i32) -> (i32, i32) {
    %c0_i32 = arith.constant 0 : i32
    return %arg2, %arg1 : i32, i32
  }
  func.func @transform_2(%arg0: i32, %arg1: i32, %arg2: i32) -> (i32, i32) {
    %c0_i32 = arith.constant 0 : i32
    %c0_i32_0 = arith.constant 0 : i32
    return %c0_i32, %arg1 : i32, i32
  }
  func.func @transform_3(%arg0: i32, %arg1: i32, %arg2: i32) -> (i32, i32) {
    %c0_i32 = arith.constant 0 : i32
    return %arg0, %arg1 : i32, i32
  }
}

module attributes {stable_mosaic.version = 11 : i64} {
  func.func @_matmul_kernel(%arg0: i32, %arg1: i32, %arg2: i32, %arg3: memref<32x64xbf16, #tpu.memory_space<vmem>>, %arg4: memref<64x32xbf16, #tpu.memory_space<vmem>>, %arg5: memref<1x32xf32, #tpu.memory_space<vmem>>, %arg6: memref<32x32xf32, #tpu.memory_space<vmem>>, %arg7: memref<32x32xf32, #tpu.memory_space<vmem>>) attributes {dimension_semantics = [#tpu.dimension_semantics<parallel>, #tpu.dimension_semantics<parallel>, #tpu.dimension_semantics<arbitrary>], iteration_bounds = array<i64: 1, 1, 1>, scalar_prefetch = 0 : i64, scratch_operands = 1 : i64, tpu.core_type = #tpu.core_type<tc>, window_params = [{transform_indices = @transform_0, window_bounds = array<i64: 32, 64>}, {transform_indices = @transform_1, window_bounds = array<i64: 64, 32>}, {transform_indices = @transform_2, window_bounds = array<i64: 1, 32>}, {transform_indices = @transform_3, window_bounds = array<i64: 32, 32>}]} {
    %c0_i32 = arith.constant 0 : i32
    %0 = arith.cmpi eq, %arg2, %c0_i32 : i32
    %1 = arith.extui %0 : i1 to i32
    %c0_i32_0 = arith.constant 0 : i32
    %2 = arith.cmpi ne, %1, %c0_i32_0 : i32
    scf.if %2 {
      %cst_10 = arith.constant 0.000000e+00 : f32
      %12 = vector.broadcast %cst_10 : f32 to vector<32x32xf32>
      %c0_11 = arith.constant 0 : index
      %c0_12 = arith.constant 0 : index
      %13 = vector.load %arg7[%c0_11, %c0_12] : memref<32x32xf32, #tpu.memory_space<vmem>>, vector<32x32xf32>
      tpu.vector_store %arg7[%c0_11, %c0_12], %12 {strides = array<i32>} : memref<32x32xf32, #tpu.memory_space<vmem>>, vector<32x32xf32>,
    } else {
    }
    %c0 = arith.constant 0 : index
    %c0_1 = arith.constant 0 : index
    %3 = vector.load %arg7[%c0, %c0_1] : memref<32x32xf32, #tpu.memory_space<vmem>>, vector<32x32xf32>
    %c0_2 = arith.constant 0 : index
    %c0_3 = arith.constant 0 : index
    %4 = vector.load %arg3[%c0_2, %c0_3] : memref<32x64xbf16, #tpu.memory_space<vmem>>, vector<32x64xbf16>
    %c0_4 = arith.constant 0 : index
    %c0_5 = arith.constant 0 : index
    %5 = vector.load %arg4[%c0_4, %c0_5] : memref<64x32xbf16, #tpu.memory_space<vmem>>, vector<64x32xbf16>
    %cst = arith.constant dense<0.000000e+00> : vector<32x32xf32>
    %6 = tpu.matmul %4, %5, %cst {dimension_numbers = #tpu.dot_dimension_numbers<[1], [0], [0], [1], [0, 0, 1, 1], [], []>} : vector<32x64xbf16>, vector<64x32xbf16>, vector<32x32xf32> -> vector<32x32xf32>
    %7 = arith.addf %3, %6 : vector<32x32xf32>
    %c0_6 = arith.constant 0 : index
    %c0_7 = arith.constant 0 : index
    %8 = vector.load %arg7[%c0_6, %c0_7] : memref<32x32xf32, #tpu.memory_space<vmem>>, vector<32x32xf32>
    tpu.vector_store %arg7[%c0_6, %c0_7], %7 {strides = array<i32>} : memref<32x32xf32, #tpu.memory_space<vmem>>, vector<32x32xf32>,
    %c0_i32_8 = arith.constant 0 : i32
    %9 = arith.cmpi eq, %arg2, %c0_i32_8 : i32
    %10 = arith.extui %9 : i1 to i32
    %c0_i32_9 = arith.constant 0 : i32
    %11 = arith.cmpi ne, %10, %c0_i32_9 : i32
    scf.if %11 {
      %c0_10 = arith.constant 0 : index
      %c0_11 = arith.constant 0 : index
      %12 = vector.load %arg7[%c0_10, %c0_11] : memref<32x32xf32, #tpu.memory_space<vmem>>, vector<32x32xf32>
      %c0_12 = arith.constant 0 : index
      %c0_13 = arith.constant 0 : index
      %13 = vector.load %arg5[%c0_12, %c0_13] : memref<1x32xf32, #tpu.memory_space<vmem>>, vector<1x32xf32>
      %14 = vector.broadcast %13 : vector<1x32xf32> to vector<32x32xf32>
      %15 = arith.addf %12, %14 : vector<32x32xf32>
      %c0_14 = arith.constant 0 : index
      %c0_15 = arith.constant 0 : index
      %16 = vector.load %arg6[%c0_14, %c0_15] : memref<32x32xf32, #tpu.memory_space<vmem>>, vector<32x32xf32>
      tpu.vector_store %arg6[%c0_14, %c0_15], %15 {strides = array<i32>} : memref<32x32xf32, #tpu.memory_space<vmem>>, vector<32x32xf32>,
    } else {
    }
    return
  }
  func.func @transform_0(%arg0: i32, %arg1: i32, %arg2: i32) -> (i32, i32) {
    %c0_i32 = arith.constant 0 : i32
    return %arg0, %arg2 : i32, i32
  }
  func.func @transform_1(%arg0: i32, %arg1: i32, %arg2: i32) -> (i32, i32) {
    %c0_i32 = arith.constant 0 : i32
    return %arg2, %arg1 : i32, i32
  }
  func.func @transform_2(%arg0: i32, %arg1: i32, %arg2: i32) -> (i32, i32) {
    %c0_i32 = arith.constant 0 : i32
    %c0_i32_0 = arith.constant 0 : i32
    return %c0_i32, %arg1 : i32, i32
  }
  func.func @transform_3(%arg0: i32, %arg1: i32, %arg2: i32) -> (i32, i32) {
    %c0_i32 = arith.constant 0 : i32
    return %arg0, %arg1 : i32, i32
  }
}

module attributes {stable_mosaic.version = 11 : i64} {
  func.func @_matmul_kernel(%arg0: i32, %arg1: i32, %arg2: i32, %arg3: memref<32x128xbf16, #tpu.memory_space<vmem>>, %arg4: memref<128x32xbf16, #tpu.memory_space<vmem>>, %arg5: memref<1x32xf32, #tpu.memory_space<vmem>>, %arg6: memref<32x32xf32, #tpu.memory_space<vmem>>, %arg7: memref<32x32xf32, #tpu.memory_space<vmem>>) attributes {dimension_semantics = [#tpu.dimension_semantics<parallel>, #tpu.dimension_semantics<parallel>, #tpu.dimension_semantics<arbitrary>], iteration_bounds = array<i64: 1, 1, 1>, scalar_prefetch = 0 : i64, scratch_operands = 1 : i64, tpu.core_type = #tpu.core_type<tc>, window_params = [{transform_indices = @transform_0, window_bounds = array<i64: 32, 128>}, {transform_indices = @transform_1, window_bounds = array<i64: 128, 32>}, {transform_indices = @transform_2, window_bounds = array<i64: 1, 32>}, {transform_indices = @transform_3, window_bounds = array<i64: 32, 32>}]} {
    %c0_i32 = arith.constant 0 : i32
    %0 = arith.cmpi eq, %arg2, %c0_i32 : i32
    %1 = arith.extui %0 : i1 to i32
    %c0_i32_0 = arith.constant 0 : i32
    %2 = arith.cmpi ne, %1, %c0_i32_0 : i32
    scf.if %2 {
      %cst_10 = arith.constant 0.000000e+00 : f32
      %12 = vector.broadcast %cst_10 : f32 to vector<32x32xf32>
      %c0_11 = arith.constant 0 : index
      %c0_12 = arith.constant 0 : index
      %13 = vector.load %arg7[%c0_11, %c0_12] : memref<32x32xf32, #tpu.memory_space<vmem>>, vector<32x32xf32>
      tpu.vector_store %arg7[%c0_11, %c0_12], %12 {strides = array<i32>} : memref<32x32xf32, #tpu.memory_space<vmem>>, vector<32x32xf32>,
    } else {
    }
    %c0 = arith.constant 0 : index
    %c0_1 = arith.constant 0 : index
    %3 = vector.load %arg7[%c0, %c0_1] : memref<32x32xf32, #tpu.memory_space<vmem>>, vector<32x32xf32>
    %c0_2 = arith.constant 0 : index
    %c0_3 = arith.constant 0 : index
    %4 = vector.load %arg3[%c0_2, %c0_3] : memref<32x128xbf16, #tpu.memory_space<vmem>>, vector<32x128xbf16>
    %c0_4 = arith.constant 0 : index
    %c0_5 = arith.constant 0 : index
    %5 = vector.load %arg4[%c0_4, %c0_5] : memref<128x32xbf16, #tpu.memory_space<vmem>>, vector<128x32xbf16>
    %cst = arith.constant dense<0.000000e+00> : vector<32x32xf32>
    %6 = tpu.matmul %4, %5, %cst {dimension_numbers = #tpu.dot_dimension_numbers<[1], [0], [0], [1], [0, 0, 1, 1], [], []>} : vector<32x128xbf16>, vector<128x32xbf16>, vector<32x32xf32> -> vector<32x32xf32>
    %7 = arith.addf %3, %6 : vector<32x32xf32>
    %c0_6 = arith.constant 0 : index
    %c0_7 = arith.constant 0 : index
    %8 = vector.load %arg7[%c0_6, %c0_7] : memref<32x32xf32, #tpu.memory_space<vmem>>, vector<32x32xf32>
    tpu.vector_store %arg7[%c0_6, %c0_7], %7 {strides = array<i32>} : memref<32x32xf32, #tpu.memory_space<vmem>>, vector<32x32xf32>,
    %c0_i32_8 = arith.constant 0 : i32
    %9 = arith.cmpi eq, %arg2, %c0_i32_8 : i32
    %10 = arith.extui %9 : i1 to i32
    %c0_i32_9 = arith.constant 0 : i32
    %11 = arith.cmpi ne, %10, %c0_i32_9 : i32
    scf.if %11 {
      %c0_10 = arith.constant 0 : index
      %c0_11 = arith.constant 0 : index
      %12 = vector.load %arg7[%c0_10, %c0_11] : memref<32x32xf32, #tpu.memory_space<vmem>>, vector<32x32xf32>
      %c0_12 = arith.constant 0 : index
      %c0_13 = arith.constant 0 : index
      %13 = vector.load %arg5[%c0_12, %c0_13] : memref<1x32xf32, #tpu.memory_space<vmem>>, vector<1x32xf32>
      %14 = vector.broadcast %13 : vector<1x32xf32> to vector<32x32xf32>
      %15 = arith.addf %12, %14 : vector<32x32xf32>
      %c0_14 = arith.constant 0 : index
      %c0_15 = arith.constant 0 : index
      %16 = vector.load %arg6[%c0_14, %c0_15] : memref<32x32xf32, #tpu.memory_space<vmem>>, vector<32x32xf32>
      tpu.vector_store %arg6[%c0_14, %c0_15], %15 {strides = array<i32>} : memref<32x32xf32, #tpu.memory_space<vmem>>, vector<32x32xf32>,
    } else {
    }
    return
  }
  func.func @transform_0(%arg0: i32, %arg1: i32, %arg2: i32) -> (i32, i32) {
    %c0_i32 = arith.constant 0 : i32
    return %arg0, %arg2 : i32, i32
  }
  func.func @transform_1(%arg0: i32, %arg1: i32, %arg2: i32) -> (i32, i32) {
    %c0_i32 = arith.constant 0 : i32
    return %arg2, %arg1 : i32, i32
  }
  func.func @transform_2(%arg0: i32, %arg1: i32, %arg2: i32) -> (i32, i32) {
    %c0_i32 = arith.constant 0 : i32
    %c0_i32_0 = arith.constant 0 : i32
    return %c0_i32, %arg1 : i32, i32
  }
  func.func @transform_3(%arg0: i32, %arg1: i32, %arg2: i32) -> (i32, i32) {
    %c0_i32 = arith.constant 0 : i32
    return %arg0, %arg1 : i32, i32
  }
}

module attributes {stable_mosaic.version = 11 : i64} {
  func.func @_matmul_kernel(%arg0: i32, %arg1: i32, %arg2: i32, %arg3: memref<2x32xbf16, #tpu.memory_space<vmem>>, %arg4: memref<32x5xbf16, #tpu.memory_space<vmem>>, %arg5: memref<1x5xf32, #tpu.memory_space<vmem>>, %arg6: memref<2x5xf32, #tpu.memory_space<vmem>>, %arg7: memref<2x5xf32, #tpu.memory_space<vmem>>) attributes {dimension_semantics = [#tpu.dimension_semantics<parallel>, #tpu.dimension_semantics<parallel>, #tpu.dimension_semantics<arbitrary>], iteration_bounds = array<i64: 1, 1, 1>, scalar_prefetch = 0 : i64, scratch_operands = 1 : i64, tpu.core_type = #tpu.core_type<tc>, window_params = [{transform_indices = @transform_0, window_bounds = array<i64: 2, 32>}, {transform_indices = @transform_1, window_bounds = array<i64: 32, 5>}, {transform_indices = @transform_2, window_bounds = array<i64: 1, 5>}, {transform_indices = @transform_3, window_bounds = array<i64: 2, 5>}]} {
    %c0_i32 = arith.constant 0 : i32
    %0 = arith.cmpi eq, %arg2, %c0_i32 : i32
    %1 = arith.extui %0 : i1 to i32
    %c0_i32_0 = arith.constant 0 : i32
    %2 = arith.cmpi ne, %1, %c0_i32_0 : i32
    scf.if %2 {
      %cst_10 = arith.constant 0.000000e+00 : f32
      %12 = vector.broadcast %cst_10 : f32 to vector<2x5xf32>
      %c0_11 = arith.constant 0 : index
      %c0_12 = arith.constant 0 : index
      %13 = vector.load %arg7[%c0_11, %c0_12] : memref<2x5xf32, #tpu.memory_space<vmem>>, vector<2x5xf32>
      tpu.vector_store %arg7[%c0_11, %c0_12], %12 {strides = array<i32>} : memref<2x5xf32, #tpu.memory_space<vmem>>, vector<2x5xf32>,
    } else {
    }
    %c0 = arith.constant 0 : index
    %c0_1 = arith.constant 0 : index
    %3 = vector.load %arg7[%c0, %c0_1] : memref<2x5xf32, #tpu.memory_space<vmem>>, vector<2x5xf32>
    %c0_2 = arith.constant 0 : index
    %c0_3 = arith.constant 0 : index
    %4 = vector.load %arg3[%c0_2, %c0_3] : memref<2x32xbf16, #tpu.memory_space<vmem>>, vector<2x32xbf16>
    %c0_4 = arith.constant 0 : index
    %c0_5 = arith.constant 0 : index
    %5 = vector.load %arg4[%c0_4, %c0_5] : memref<32x5xbf16, #tpu.memory_space<vmem>>, vector<32x5xbf16>
    %cst = arith.constant dense<0.000000e+00> : vector<2x5xf32>
    %6 = tpu.matmul %4, %5, %cst {dimension_numbers = #tpu.dot_dimension_numbers<[1], [0], [0], [1], [0, 0, 1, 1], [], []>} : vector<2x32xbf16>, vector<32x5xbf16>, vector<2x5xf32> -> vector<2x5xf32>
    %7 = arith.addf %3, %6 : vector<2x5xf32>
    %c0_6 = arith.constant 0 : index
    %c0_7 = arith.constant 0 : index
    %8 = vector.load %arg7[%c0_6, %c0_7] : memref<2x5xf32, #tpu.memory_space<vmem>>, vector<2x5xf32>
    tpu.vector_store %arg7[%c0_6, %c0_7], %7 {strides = array<i32>} : memref<2x5xf32, #tpu.memory_space<vmem>>, vector<2x5xf32>,
    %c0_i32_8 = arith.constant 0 : i32
    %9 = arith.cmpi eq, %arg2, %c0_i32_8 : i32
    %10 = arith.extui %9 : i1 to i32
    %c0_i32_9 = arith.constant 0 : i32
    %11 = arith.cmpi ne, %10, %c0_i32_9 : i32
    scf.if %11 {
      %c0_10 = arith.constant 0 : index
      %c0_11 = arith.constant 0 : index
      %12 = vector.load %arg7[%c0_10, %c0_11] : memref<2x5xf32, #tpu.memory_space<vmem>>, vector<2x5xf32>
      %c0_12 = arith.constant 0 : index
      %c0_13 = arith.constant 0 : index
      %13 = vector.load %arg5[%c0_12, %c0_13] : memref<1x5xf32, #tpu.memory_space<vmem>>, vector<1x5xf32>
      %14 = vector.broadcast %13 : vector<1x5xf32> to vector<2x5xf32>
      %15 = arith.addf %12, %14 : vector<2x5xf32>
      %c0_14 = arith.constant 0 : index
      %c0_15 = arith.constant 0 : index
      %16 = vector.load %arg6[%c0_14, %c0_15] : memref<2x5xf32, #tpu.memory_space<vmem>>, vector<2x5xf32>
      tpu.vector_store %arg6[%c0_14, %c0_15], %15 {strides = array<i32>} : memref<2x5xf32, #tpu.memory_space<vmem>>, vector<2x5xf32>,
    } else {
    }
    return
  }
  func.func @transform_0(%arg0: i32, %arg1: i32, %arg2: i32) -> (i32, i32) {
    %c0_i32 = arith.constant 0 : i32
    return %arg0, %arg2 : i32, i32
  }
  func.func @transform_1(%arg0: i32, %arg1: i32, %arg2: i32) -> (i32, i32) {
    %c0_i32 = arith.constant 0 : i32
    return %arg2, %arg1 : i32, i32
  }
  func.func @transform_2(%arg0: i32, %arg1: i32, %arg2: i32) -> (i32, i32) {
    %c0_i32 = arith.constant 0 : i32
    %c0_i32_0 = arith.constant 0 : i32
    return %c0_i32, %arg1 : i32, i32
  }
  func.func @transform_3(%arg0: i32, %arg1: i32, %arg2: i32) -> (i32, i32) {
    %c0_i32 = arith.constant 0 : i32
    return %arg0, %arg1 : i32, i32
  }
}

</mosaic_0001>

<bundles_post_ra>
// kernel: forward.17
= control target key start
LH: loop header
LB: loop body
LE: loop exit
PB: predicated region body
PF: predicated region fallthrough
CT: control target
= control target key end

     0   :  { %vm274_vm0 = vcmask 1043456   ;;  %vm219_vm1 = vcmask 64512   ;;  %vm19_vm2 = vcmask 392192   ;;  %v718_v14 = vmov 0.0   ;;  %s1071_s1 = inlined_call_operand.vmem [shape: bf16[8,48], index: 1, kind: input, shape index: {}]   ;;  %s1072_s0 = inlined_call_operand.vmem [shape: bf16[288,8], index: 0, kind: input, shape index: {}]   ;;  %s1073_s2 = inlined_call_operand.vmem [shape: f32[1,48], index: 2, kind: input, shape index: {}]   ;;  %s1074_s3 = inlined_call_operand.vmem [shape: f32[288,48], index: 3, kind: output, shape index: {}]  }
   0x1   :  { %v128_v0 = vld [vmem:[%s1071_s1] sm:$0xf]  ;;  %v700_v3 = vld [vmem:[%s1072_s0 + $0x28] sm:$0xff]  ;;  %v705_v4 = vld [vmem:[%s1072_s0 + $0x50] sm:$0xff]  ;;  %20 = vst.msk [vmem:[#allocation2] sm:$0xff] %vm19_vm2, %v718_v14 }
   0x2   :  { %v276_v1 = vsel %vm274_vm0, %v128_v0, 0  ;;  %v695_v2 = vld [vmem:[%s1072_s0] sm:$0xff]  ;;  %v710_v5 = vld [vmem:[%s1072_s0 + $0x78] sm:$0xff]  ;;  %v696_v6 = vld [vmem:[%s1072_s0 + $0x8] sm:$0xff]  ;;  %21 = vst.msk [vmem:[#allocation2 + $0x8] sm:$0xff] %vm19_vm2, %v718_v14 }
   0x3   :  { %285 = vmatpush.bf16.msra.mxu0 %v276_v1  ;;  %713 = vmatpush.bf16.msra.mxu1 %v276_v1  ;;  %v701_v7 = vld [vmem:[%s1072_s0 + $0x30] sm:$0xff]  ;;  %v706_v8 = vld [vmem:[%s1072_s0 + $0x58] sm:$0xff]  ;;  %v711_v9 = vld [vmem:[%s1072_s0 + $0x80] sm:$0xff]  ;;  %22 = vst.msk [vmem:[#allocation2 + $0x10] sm:$0xff] %vm19_vm2, %v718_v14 }
   0x4   :  { %714 = vmatpush.bf16.msra.mxu2 %v276_v1  ;;  %715 = vmatpush.bf16.msra.mxu3 %v276_v1  ;;  %v697_v10 = vld [vmem:[%s1072_s0 + $0x10] sm:$0xff]  ;;  %v702_v11 = vld [vmem:[%s1072_s0 + $0x38] sm:$0xff]  ;;  %v707_v12 = vld [vmem:[%s1072_s0 + $0x60] sm:$0xff]  ;;  %23 = vst.msk [vmem:[#allocation2 + $0x18] sm:$0xff] %vm19_vm2, %v718_v14 }
   0x5   :  { %v712_v13 = vld [vmem:[%s1072_s0 + $0x88] sm:$0xff]  ;;  %24 = vst.msk [vmem:[#allocation2 + $0x20] sm:$0xff] %vm19_vm2, %v718_v14  ;;  %v698_v15 = vld [vmem:[%s1072_s0 + $0x18] sm:$0xff]  ;;  %v703_v16 = vld [vmem:[%s1072_s0 + $0x40] sm:$0xff] }
   0x6   :  { %677 = vmatmul.msk.bf16.vlgmr.msra.gmra.mxu0 %vm219_vm1, %v695_v2  ;;  %682 = vmatmul.msk.bf16.vlgmr.msra.gmra.mxu1 %vm219_vm1, %v700_v3  ;;  %25 = vst.msk [vmem:[#allocation2 + $0x28] sm:$0xff] %vm19_vm2, %v718_v14  ;;  %v708_v17 = vld [vmem:[%s1072_s0 + $0x68] sm:$0xff]  ;;  %v699_v18 = vld [vmem:[%s1072_s0 + $0x20] sm:$0xff]  ;;  %v709_v20 = vld [vmem:[%s1072_s0 + $0x70] sm:$0xff] }
   0x7   :  { %687 = vmatmul.msk.bf16.vlgmr.msra.gmra.mxu2 %vm219_vm1, %v705_v4  ;;  %692 = vmatmul.msk.bf16.vlgmr.msra.gmra.mxu3 %vm219_vm1, %v710_v5  ;;  %26 = vst.msk [vmem:[#allocation2 + $0x30] sm:$0xff] %vm19_vm2, %v718_v14  ;;  %v704_v19 = vld [vmem:[%s1072_s0 + $0x48] sm:$0xff]  ;;  %v855_v30 = vld [vmem:[%s1073_s2] ss:$0 sm:$0xff] }
   0x8   :  { %27 = vst.msk [vmem:[#allocation2 + $0x38] sm:$0xff] %vm19_vm2, %v718_v14  ;;  %v56_v21 = vld [vmem:[#allocation2] sm:$0xff] }
   0x9   :  { %28 = vst.msk [vmem:[#allocation2 + $0x40] sm:$0xff] %vm19_vm2, %v718_v14  ;;  %v57_v28 = vld [vmem:[#allocation2 + $0x8] sm:$0xff] }
   0xa   :  { %29 = vst.msk [vmem:[#allocation2 + $0x48] sm:$0xff] %vm19_vm2, %v718_v14  ;;  %v58_v47 = vld [vmem:[#allocation2 + $0x10] sm:$0xff] }
   0xb   :  { %30 = vst.msk [vmem:[#allocation2 + $0x50] sm:$0xff] %vm19_vm2, %v718_v14 }
   0xc   :  { %31 = vst.msk [vmem:[#allocation2 + $0x58] sm:$0xff] %vm19_vm2, %v718_v14 }
   0xd   :  { %32 = vst.msk [vmem:[#allocation2 + $0x60] sm:$0xff] %vm19_vm2, %v718_v14 }
   0xe   :  { %33 = vst.msk [vmem:[#allocation2 + $0x68] sm:$0xff] %vm19_vm2, %v718_v14 }
   0xf   :  { %34 = vst.msk [vmem:[#allocation2 + $0x70] sm:$0xff] %vm19_vm2, %v718_v14 }
  0x10   :  { %35 = vst.msk [vmem:[#allocation2 + $0x78] sm:$0xff] %vm19_vm2, %v718_v14 }
  0x11   :  { %36 = vst.msk [vmem:[#allocation2 + $0x80] sm:$0xff] %vm19_vm2, %v718_v14 }
  0x12   :  { %37 = vst.msk [vmem:[#allocation2 + $0x88] sm:$0xff] %vm19_vm2, %v718_v14  ;;  %v66_v22 = vld [vmem:[#allocation2 + $0x50] sm:$0xff] }
  0x13   :  { %38 = vst.msk [vmem:[#allocation2 + $0x90] sm:$0xff] %vm19_vm2, %v718_v14  ;;  %v67_v29 = vld [vmem:[#allocation2 + $0x58] sm:$0xff] }
  0x14   :  { %39 = vst.msk [vmem:[#allocation2 + $0x98] sm:$0xff] %vm19_vm2, %v718_v14  ;;  %v68_v48 = vld [vmem:[#allocation2 + $0x60] sm:$0xff] }
  0x15   :  { %40 = vst.msk [vmem:[#allocation2 + $0xa0] sm:$0xff] %vm19_vm2, %v718_v14 }
  0x16   :  { %678 = vmatmul.msk.bf16.gmra.mxu0 %vm219_vm1, %v696_v6  ;;  %683 = vmatmul.msk.bf16.gmra.mxu1 %vm219_vm1, %v701_v7  ;;  %41 = vst.msk [vmem:[#allocation2 + $0xa8] sm:$0xff] %vm19_vm2, %v718_v14  ;;  %v59_v6 = vld [vmem:[#allocation2 + $0x18] sm:$0xff]  ;;  %v69_v7 = vld [vmem:[#allocation2 + $0x68] sm:$0xff] }
  0x17   :  { %688 = vmatmul.msk.bf16.gmra.mxu2 %vm219_vm1, %v706_v8  ;;  %693 = vmatmul.msk.bf16.gmra.mxu3 %vm219_vm1, %v711_v9  ;;  %42 = vst.msk [vmem:[#allocation2 + $0xb0] sm:$0xff] %vm19_vm2, %v718_v14 }
  0x18   :  { %43 = vst.msk [vmem:[#allocation2 + $0xb8] sm:$0xff] %vm19_vm2, %v718_v14 }
  0x19   :  { %44 = vst.msk [vmem:[#allocation2 + $0xc0] sm:$0xff] %vm19_vm2, %v718_v14 }
  0x1a   :  { %45 = vst.msk [vmem:[#allocation2 + $0xc8] sm:$0xff] %vm19_vm2, %v718_v14 }
  0x1b   :  { %46 = vst.msk [vmem:[#allocation2 + $0xd0] sm:$0xff] %vm19_vm2, %v718_v14 }
  0x1c   :  { %47 = vst.msk [vmem:[#allocation2 + $0xd8] sm:$0xff] %vm19_vm2, %v718_v14  ;;  %v76_v27 = vld [vmem:[#allocation2 + $0xa0] sm:$0xff] }
  0x1d   :  { %48 = vst.msk [vmem:[#allocation2 + $0xe0] sm:$0xff] %vm19_vm2, %v718_v14  ;;  %v77_v45 = vld [vmem:[#allocation2 + $0xa8] sm:$0xff] }
  0x1e   :  { %49 = vst.msk [vmem:[#allocation2 + $0xe8] sm:$0xff] %vm19_vm2, %v718_v14  ;;  %v78_v3 = vld [vmem:[#allocation2 + $0xb0] sm:$0xff] }
  0x1f   :  { %50 = vst.msk [vmem:[#allocation2 + $0xf0] sm:$0xff] %vm19_vm2, %v718_v14 }
  0x20   :  { %51 = vst.msk [vmem:[#allocation2 + $0xf8] sm:$0xff] %vm19_vm2, %v718_v14 }
  0x21   :  { %52 = vst.msk [vmem:[#allocation2 + $0x100] sm:$0xff] %vm19_vm2, %v718_v14 }
  0x22   :  { %53 = vst.msk [vmem:[#allocation2 + $0x108] sm:$0xff] %vm19_vm2, %v718_v14 }
  0x23   :  { %54 = vst.msk [vmem:[#allocation2 + $0x110] sm:$0xff] %vm19_vm2, %v718_v14 }
  0x24   :  { %55 = vst.msk [vmem:[#allocation2 + $0x118] sm:$0xff] %vm19_vm2, %v718_v14 }
  0x26   :  { %679 = vmatmul.msk.bf16.gmra.mxu0 %vm219_vm1, %v697_v10  ;;  %684 = vmatmul.msk.bf16.gmra.mxu1 %vm219_vm1, %v702_v11  ;;  %v86_v32 = vld [vmem:[#allocation2 + $0xf0] sm:$0xff] }
  0x27   :  { %689 = vmatmul.msk.bf16.gmra.mxu2 %vm219_vm1, %v707_v12  ;;  %694 = vmatmul.msk.bf16.gmra.mxu3 %vm219_vm1, %v712_v13  ;;  %v87_v49 = vld [vmem:[#allocation2 + $0xf8] sm:$0xff] }
  0x28   :  { %v88_v10 = vld [vmem:[#allocation2 + $0x100] sm:$0xff] }
  0x36   :  { %680 = vmatmul.msk.bf16.gmra.mxu0 %vm219_vm1, %v698_v15  ;;  %685 = vmatmul.msk.bf16.gmra.mxu1 %vm219_vm1, %v703_v16 }
  0x37   :  { %690 = vmatmul.msk.bf16.gmra.mxu2 %vm219_vm1, %v708_v17 }
  0x46   :  { %681 = vmatmul.msk.bf16.gmra.mxu0 %vm219_vm1, %v699_v18  ;;  %686 = vmatmul.msk.bf16.gmra.mxu1 %vm219_vm1, %v704_v19 }
  0x47   :  { %691 = vmatmul.msk.bf16.gmra.mxu2 %vm219_vm1, %v709_v20 }
  0x83   :  { %v287_v23 = vpop.f32.mrf.mxu0  ;;  %v312_v24 = vpop.f32.mrf.mxu1 }
  0x84   :  { %v377_v25 = vadd.f32 %v287_v23, %v56_v21  ;;  %v387_v26 = vadd.f32 %v312_v24, %v66_v22 }
  0x86   :  { %414 = vst.msk [vmem:[#allocation2] sm:$0xff] %vm19_vm2, %v377_v25 }
  0x87   :  { %424 = vst.msk [vmem:[#allocation2 + $0x50] sm:$0xff] %vm19_vm2, %v387_v26 }
  0x8a   :  { %v337_v31 = vpop.f32.mrf.mxu2  ;;  %v362_v33 = vpop.f32.mrf.mxu3 }
  0x8b   :  { %v397_v34 = vadd.f32 %v337_v31, %v76_v27  ;;  %v289_v35 = vpop.f32.mrf.mxu0  ;;  %v314_v36 = vpop.f32.mrf.mxu1  ;;  %v407_v39 = vadd.f32 %v362_v33, %v86_v32  ;;  %v79_v27 = vld [vmem:[#allocation2 + $0xb8] sm:$0xff]  ;;  %v60_v31 = vld [vmem:[#allocation2 + $0x20] sm:$0xff]  ;;  %v70_v32 = vld [vmem:[#allocation2 + $0x70] sm:$0xff] }
  0x8c   :  { %v378_v37 = vadd.f32 %v289_v35, %v57_v28  ;;  %v388_v38 = vadd.f32 %v314_v36, %v67_v29  ;;  %v89_v33 = vld [vmem:[#allocation2 + $0x108] sm:$0xff] }
  0x8d   :  { %v453_v40 = vld [vmem:[#allocation2] sm:$0xff]  ;;  %434 = vst.msk [vmem:[#allocation2 + $0xa0] sm:$0xff] %vm19_vm2, %v397_v34 }
  0x8e   :  { %v493_v41 = vadd.f32 %v855_v30, %v453_v40  ;;  %v463_v42 = vld [vmem:[#allocation2 + $0x50] sm:$0xff]  ;;  %415 = vst.msk [vmem:[#allocation2 + $0x8] sm:$0xff] %vm19_vm2, %v378_v37 }
  0x8f   :  { %v503_v43 = vadd.f32 %v855_v30, %v463_v42  ;;  %425 = vst.msk [vmem:[#allocation2 + $0x58] sm:$0xff] %vm19_vm2, %v388_v38 }
  0x90   :  { %v529_v44 = vmax.f32 %v493_v41, 0.0  ;;  %444 = vst.msk [vmem:[#allocation2 + $0xf0] sm:$0xff] %vm19_vm2, %v407_v39 }
  0x91   :  { %v539_v46 = vmax.f32 %v503_v43, 0.0 }
  0x92   :  { %565 = vst.msk [vmem:[%s1074_s3] sm:$0xff] %vm19_vm2, %v529_v44  ;;  %v339_v50 = vpop.f32.mrf.mxu2  ;;  %v364_v51 = vpop.f32.mrf.mxu3 }
  0x93   :  { %575 = vst.msk [vmem:[%s1074_s3 + $0x50] sm:$0xff] %vm19_vm2, %v539_v46  ;;  %v398_v52 = vadd.f32 %v339_v50, %v77_v45  ;;  %v292_v53 = vpop.f32.mrf.mxu0  ;;  %v317_v54 = vpop.f32.mrf.mxu1  ;;  %v408_v58 = vadd.f32 %v364_v51, %v87_v49 }
  0x94   :  { %v473_v55 = vld [vmem:[#allocation2 + $0xa0] sm:$0xff]  ;;  %v379_v56 = vadd.f32 %v292_v53, %v58_v47  ;;  %v389_v57 = vadd.f32 %v317_v54, %v68_v48 }
  0x95   :  { %v513_v59 = vadd.f32 %v855_v30, %v473_v55  ;;  %v454_v60 = vld [vmem:[#allocation2 + $0x8] sm:$0xff]  ;;  %435 = vst.msk [vmem:[#allocation2 + $0xa8] sm:$0xff] %vm19_vm2, %v398_v52  ;;  %v80_v52 = vld [vmem:[#allocation2 + $0xc0] sm:$0xff] }
  0x96   :  { %v494_v61 = vadd.f32 %v855_v30, %v454_v60  ;;  %v464_v62 = vld [vmem:[#allocation2 + $0x58] sm:$0xff]  ;;  %416 = vst.msk [vmem:[#allocation2 + $0x10] sm:$0xff] %vm19_vm2, %v379_v56  ;;  %v61_v55 = vld [vmem:[#allocation2 + $0x28] sm:$0xff] }
  0x97   :  { %v549_v63 = vmax.f32 %v513_v59, 0.0  ;;  %v504_v0 = vadd.f32 %v855_v30, %v464_v62  ;;  %426 = vst.msk [vmem:[#allocation2 + $0x60] sm:$0xff] %vm19_vm2, %v389_v57  ;;  %v483_v1 = vld [vmem:[#allocation2 + $0xf0] sm:$0xff]  ;;  %v71_v56 = vld [vmem:[#allocation2 + $0x78] sm:$0xff] }
  0x98   :  { %v530_v2 = vmax.f32 %v494_v61, 0.0  ;;  %v523_v4 = vadd.f32 %v855_v30, %v483_v1  ;;  %445 = vst.msk [vmem:[#allocation2 + $0xf8] sm:$0xff] %vm19_vm2, %v408_v58  ;;  %v90_v59 = vld [vmem:[#allocation2 + $0x110] sm:$0xff] }
  0x99   :  { %585 = vst.msk [vmem:[%s1074_s3 + $0xa0] sm:$0xff] %vm19_vm2, %v549_v63  ;;  %v540_v5 = vmax.f32 %v504_v0, 0.0 }
  0x9a   :  { %566 = vst.msk [vmem:[%s1074_s3 + $0x8] sm:$0xff] %vm19_vm2, %v530_v2  ;;  %v342_v8 = vpop.f32.mrf.mxu2  ;;  %v559_v9 = vmax.f32 %v523_v4, 0.0  ;;  %v367_v11 = vpop.f32.mrf.mxu3 }
  0x9b   :  { %576 = vst.msk [vmem:[%s1074_s3 + $0x58] sm:$0xff] %vm19_vm2, %v540_v5  ;;  %v399_v12 = vadd.f32 %v342_v8, %v78_v3  ;;  %v294_v13 = vpop.f32.mrf.mxu0  ;;  %v319_v14 = vpop.f32.mrf.mxu1  ;;  %v409_v18 = vadd.f32 %v367_v11, %v88_v10 }
  0x9c   :  { %v474_v15 = vld [vmem:[#allocation2 + $0xa8] sm:$0xff]  ;;  %v380_v16 = vadd.f32 %v294_v13, %v59_v6  ;;  %v390_v17 = vadd.f32 %v319_v14, %v69_v7  ;;  %595 = vst.msk [vmem:[%s1074_s3 + $0xf0] sm:$0xff] %vm19_vm2, %v559_v9 }
  0x9d   :  { %v514_v19 = vadd.f32 %v855_v30, %v474_v15  ;;  %v455_v20 = vld [vmem:[#allocation2 + $0x10] sm:$0xff]  ;;  %436 = vst.msk [vmem:[#allocation2 + $0xb0] sm:$0xff] %vm19_vm2, %v399_v12  ;;  %v81_v12 = vld [vmem:[#allocation2 + $0xc8] sm:$0xff] }
  0x9e   :  { %v495_v21 = vadd.f32 %v855_v30, %v455_v20  ;;  %v465_v22 = vld [vmem:[#allocation2 + $0x60] sm:$0xff]  ;;  %417 = vst.msk [vmem:[#allocation2 + $0x18] sm:$0xff] %vm19_vm2, %v380_v16  ;;  %v62_v15 = vld [vmem:[#allocation2 + $0x30] sm:$0xff] }
  0x9f   :  { %v550_v23 = vmax.f32 %v514_v19, 0.0  ;;  %v505_v24 = vadd.f32 %v855_v30, %v465_v22  ;;  %427 = vst.msk [vmem:[#allocation2 + $0x68] sm:$0xff] %vm19_vm2, %v390_v17  ;;  %v484_v25 = vld [vmem:[#allocation2 + $0xf8] sm:$0xff]  ;;  %v72_v16 = vld [vmem:[#allocation2 + $0x80] sm:$0xff] }
  0xa0   :  { %v531_v26 = vmax.f32 %v495_v21, 0.0  ;;  %v524_v28 = vadd.f32 %v855_v30, %v484_v25  ;;  %446 = vst.msk [vmem:[#allocation2 + $0x100] sm:$0xff] %vm19_vm2, %v409_v18  ;;  %v91_v17 = vld [vmem:[#allocation2 + $0x118] sm:$0xff] }
  0xa1   :  { %586 = vst.msk [vmem:[%s1074_s3 + $0xa8] sm:$0xff] %vm19_vm2, %v550_v23  ;;  %v541_v29 = vmax.f32 %v505_v24, 0.0 }
  0xa2   :  { %567 = vst.msk [vmem:[%s1074_s3 + $0x10] sm:$0xff] %vm19_vm2, %v531_v26  ;;  %v344_v34 = vpop.f32.mrf.mxu2  ;;  %v560_v35 = vmax.f32 %v524_v28, 0.0  ;;  %v369_v36 = vpop.f32.mrf.mxu3 }
  0xa3   :  { %577 = vst.msk [vmem:[%s1074_s3 + $0x60] sm:$0xff] %vm19_vm2, %v541_v29  ;;  %v400_v37 = vadd.f32 %v344_v34, %v79_v27  ;;  %v297_v38 = vpop.f32.mrf.mxu0  ;;  %v322_v39 = vpop.f32.mrf.mxu1  ;;  %v410_v43 = vadd.f32 %v369_v36, %v89_v33 }
  0xa4   :  { %v475_v40 = vld [vmem:[#allocation2 + $0xb0] sm:$0xff]  ;;  %v381_v41 = vadd.f32 %v297_v38, %v60_v31  ;;  %v391_v42 = vadd.f32 %v322_v39, %v70_v32  ;;  %596 = vst.msk [vmem:[%s1074_s3 + $0xf8] sm:$0xff] %vm19_vm2, %v560_v35 }
  0xa5   :  { %v515_v44 = vadd.f32 %v855_v30, %v475_v40  ;;  %v456_v45 = vld [vmem:[#allocation2 + $0x18] sm:$0xff]  ;;  %437 = vst.msk [vmem:[#allocation2 + $0xb8] sm:$0xff] %vm19_vm2, %v400_v37  ;;  %v82_v37 = vld [vmem:[#allocation2 + $0xd0] sm:$0xff] }
  0xa6   :  { %v496_v46 = vadd.f32 %v855_v30, %v456_v45  ;;  %v466_v47 = vld [vmem:[#allocation2 + $0x68] sm:$0xff]  ;;  %418 = vst.msk [vmem:[#allocation2 + $0x20] sm:$0xff] %vm19_vm2, %v381_v41  ;;  %v63_v40 = vld [vmem:[#allocation2 + $0x38] sm:$0xff] }
  0xa7   :  { %v551_v48 = vmax.f32 %v515_v44, 0.0  ;;  %v506_v49 = vadd.f32 %v855_v30, %v466_v47  ;;  %428 = vst.msk [vmem:[#allocation2 + $0x70] sm:$0xff] %vm19_vm2, %v391_v42  ;;  %v485_v50 = vld [vmem:[#allocation2 + $0x100] sm:$0xff]  ;;  %v73_v41 = vld [vmem:[#allocation2 + $0x88] sm:$0xff] }
  0xa8   :  { %v532_v51 = vmax.f32 %v496_v46, 0.0  ;;  %v525_v53 = vadd.f32 %v855_v30, %v485_v50  ;;  %447 = vst.msk [vmem:[#allocation2 + $0x108] sm:$0xff] %vm19_vm2, %v410_v43 }
  0xa9   :  { %587 = vst.msk [vmem:[%s1074_s3 + $0xb0] sm:$0xff] %vm19_vm2, %v551_v48  ;;  %v542_v54 = vmax.f32 %v506_v49, 0.0 }
  0xaa   :  { %568 = vst.msk [vmem:[%s1074_s3 + $0x18] sm:$0xff] %vm19_vm2, %v532_v51  ;;  %v347_v57 = vpop.f32.mrf.mxu2  ;;  %v561_v58 = vmax.f32 %v525_v53, 0.0  ;;  %v372_v60 = vpop.f32.mrf.mxu3 }
  0xab   :  { %578 = vst.msk [vmem:[%s1074_s3 + $0x68] sm:$0xff] %vm19_vm2, %v542_v54  ;;  %v401_v61 = vadd.f32 %v347_v57, %v80_v52  ;;  %v299_v62 = vpop.f32.mrf.mxu0  ;;  %v324_v63 = vpop.f32.mrf.mxu1  ;;  %v411_v3 = vadd.f32 %v372_v60, %v90_v59 }
  0xac   :  { %v476_v0 = vld [vmem:[#allocation2 + $0xb8] sm:$0xff]  ;;  %v382_v1 = vadd.f32 %v299_v62, %v61_v55  ;;  %v392_v2 = vadd.f32 %v324_v63, %v71_v56  ;;  %597 = vst.msk [vmem:[%s1074_s3 + $0x100] sm:$0xff] %vm19_vm2, %v561_v58  ;;  %v74_v62 = vld [vmem:[#allocation2 + $0x90] sm:$0xff] }
  0xad   :  { %v516_v4 = vadd.f32 %v855_v30, %v476_v0  ;;  %v457_v5 = vld [vmem:[#allocation2 + $0x20] sm:$0xff]  ;;  %438 = vst.msk [vmem:[#allocation2 + $0xc0] sm:$0xff] %vm19_vm2, %v401_v61  ;;  %v83_v58 = vld [vmem:[#allocation2 + $0xd8] sm:$0xff] }
  0xae   :  { %v497_v6 = vadd.f32 %v855_v30, %v457_v5  ;;  %v467_v7 = vld [vmem:[#allocation2 + $0x70] sm:$0xff]  ;;  %419 = vst.msk [vmem:[#allocation2 + $0x28] sm:$0xff] %vm19_vm2, %v382_v1  ;;  %v64_v61 = vld [vmem:[#allocation2 + $0x40] sm:$0xff] }
  0xaf   :  { %v552_v8 = vmax.f32 %v516_v4, 0.0  ;;  %v507_v9 = vadd.f32 %v855_v30, %v467_v7  ;;  %429 = vst.msk [vmem:[#allocation2 + $0x78] sm:$0xff] %vm19_vm2, %v392_v2  ;;  %v486_v10 = vld [vmem:[#allocation2 + $0x108] sm:$0xff] }
  0xb0   :  { %v533_v11 = vmax.f32 %v497_v6, 0.0  ;;  %v526_v13 = vadd.f32 %v855_v30, %v486_v10  ;;  %448 = vst.msk [vmem:[#allocation2 + $0x110] sm:$0xff] %vm19_vm2, %v411_v3 }
  0xb1   :  { %588 = vst.msk [vmem:[%s1074_s3 + $0xb8] sm:$0xff] %vm19_vm2, %v552_v8  ;;  %v543_v14 = vmax.f32 %v507_v9, 0.0 }
  0xb2   :  { %569 = vst.msk [vmem:[%s1074_s3 + $0x20] sm:$0xff] %vm19_vm2, %v533_v11  ;;  %v349_v18 = vpop.f32.mrf.mxu2  ;;  %v562_v19 = vmax.f32 %v526_v13, 0.0  ;;  %v374_v20 = vpop.f32.mrf.mxu3 }
  0xb3   :  { %579 = vst.msk [vmem:[%s1074_s3 + $0x70] sm:$0xff] %vm19_vm2, %v543_v14  ;;  %v402_v21 = vadd.f32 %v349_v18, %v81_v12  ;;  %v302_v22 = vpop.f32.mrf.mxu0  ;;  %v327_v23 = vpop.f32.mrf.mxu1  ;;  %v412_v27 = vadd.f32 %v374_v20, %v91_v17  ;;  %v84_v14 = vld [vmem:[#allocation2 + $0xe0] sm:$0xff]  ;;  %v75_v17 = vld [vmem:[#allocation2 + $0x98] sm:$0xff] }
  0xb4   :  { %v477_v24 = vld [vmem:[#allocation2 + $0xc0] sm:$0xff]  ;;  %v383_v25 = vadd.f32 %v302_v22, %v62_v15  ;;  %v393_v26 = vadd.f32 %v327_v23, %v72_v16  ;;  %598 = vst.msk [vmem:[%s1074_s3 + $0x108] sm:$0xff] %vm19_vm2, %v562_v19  ;;  %v65_v16 = vld [vmem:[#allocation2 + $0x48] sm:$0xff] }
  0xb5   :  { %v517_v28 = vadd.f32 %v855_v30, %v477_v24  ;;  %v458_v29 = vld [vmem:[#allocation2 + $0x28] sm:$0xff]  ;;  %439 = vst.msk [vmem:[#allocation2 + $0xc8] sm:$0xff] %vm19_vm2, %v402_v21 }
  0xb6   :  { %v498_v31 = vadd.f32 %v855_v30, %v458_v29  ;;  %v468_v32 = vld [vmem:[#allocation2 + $0x78] sm:$0xff]  ;;  %420 = vst.msk [vmem:[#allocation2 + $0x30] sm:$0xff] %vm19_vm2, %v383_v25 }
  0xb7   :  { %v553_v33 = vmax.f32 %v517_v28, 0.0  ;;  %v508_v34 = vadd.f32 %v855_v30, %v468_v32  ;;  %430 = vst.msk [vmem:[#allocation2 + $0x80] sm:$0xff] %vm19_vm2, %v393_v26  ;;  %v487_v35 = vld [vmem:[#allocation2 + $0x110] sm:$0xff] }
  0xb8   :  { %v534_v36 = vmax.f32 %v498_v31, 0.0  ;;  %v527_v38 = vadd.f32 %v855_v30, %v487_v35  ;;  %449 = vst.msk [vmem:[#allocation2 + $0x118] sm:$0xff] %vm19_vm2, %v412_v27 }
  0xb9   :  { %589 = vst.msk [vmem:[%s1074_s3 + $0xc0] sm:$0xff] %vm19_vm2, %v553_v33  ;;  %v544_v39 = vmax.f32 %v508_v34, 0.0  ;;  %v85_v33 = vld [vmem:[#allocation2 + $0xe8] sm:$0xff] }
  0xba   :  { %570 = vst.msk [vmem:[%s1074_s3 + $0x28] sm:$0xff] %vm19_vm2, %v534_v36  ;;  %v352_v42 = vpop.f32.mrf.mxu2  ;;  %v563_v43 = vmax.f32 %v527_v38, 0.0 }
  0xbb   :  { %580 = vst.msk [vmem:[%s1074_s3 + $0x78] sm:$0xff] %vm19_vm2, %v544_v39  ;;  %v403_v44 = vadd.f32 %v352_v42, %v82_v37  ;;  %v304_v45 = vpop.f32.mrf.mxu0  ;;  %v329_v46 = vpop.f32.mrf.mxu1 }
  0xbc   :  { %v478_v47 = vld [vmem:[#allocation2 + $0xc8] sm:$0xff]  ;;  %v384_v48 = vadd.f32 %v304_v45, %v63_v40  ;;  %v394_v49 = vadd.f32 %v329_v46, %v73_v41  ;;  %599 = vst.msk [vmem:[%s1074_s3 + $0x110] sm:$0xff] %vm19_vm2, %v563_v43 }
  0xbd   :  { %v518_v50 = vadd.f32 %v855_v30, %v478_v47  ;;  %v459_v51 = vld [vmem:[#allocation2 + $0x30] sm:$0xff]  ;;  %440 = vst.msk [vmem:[#allocation2 + $0xd0] sm:$0xff] %vm19_vm2, %v403_v44 }
  0xbe   :  { %v499_v52 = vadd.f32 %v855_v30, %v459_v51  ;;  %v469_v53 = vld [vmem:[#allocation2 + $0x80] sm:$0xff]  ;;  %421 = vst.msk [vmem:[#allocation2 + $0x38] sm:$0xff] %vm19_vm2, %v384_v48 }
  0xbf   :  { %v554_v54 = vmax.f32 %v518_v50, 0.0  ;;  %v509_v55 = vadd.f32 %v855_v30, %v469_v53  ;;  %431 = vst.msk [vmem:[#allocation2 + $0x88] sm:$0xff] %vm19_vm2, %v394_v49  ;;  %v488_v56 = vld [vmem:[#allocation2 + $0x118] sm:$0xff] }
  0xc0   :  { %v535_v57 = vmax.f32 %v499_v52, 0.0  ;;  %v528_v59 = vadd.f32 %v855_v30, %v488_v56 }
  0xc1   :  { %590 = vst.msk [vmem:[%s1074_s3 + $0xc8] sm:$0xff] %vm19_vm2, %v554_v54  ;;  %v545_v60 = vmax.f32 %v509_v55, 0.0 }
  0xc2   :  { %571 = vst.msk [vmem:[%s1074_s3 + $0x30] sm:$0xff] %vm19_vm2, %v535_v57  ;;  %v354_v63 = vpop.f32.mrf.mxu2  ;;  %v564_v0 = vmax.f32 %v528_v59, 0.0 }
  0xc3   :  { %581 = vst.msk [vmem:[%s1074_s3 + $0x80] sm:$0xff] %vm19_vm2, %v545_v60  ;;  %v404_v1 = vadd.f32 %v354_v63, %v83_v58  ;;  %v307_v2 = vpop.f32.mrf.mxu0  ;;  %v332_v3 = vpop.f32.mrf.mxu1 }
  0xc4   :  { %v479_v4 = vld [vmem:[#allocation2 + $0xd0] sm:$0xff]  ;;  %v385_v5 = vadd.f32 %v307_v2, %v64_v61  ;;  %v395_v6 = vadd.f32 %v332_v3, %v74_v62  ;;  %600 = vst.msk [vmem:[%s1074_s3 + $0x118] sm:$0xff] %vm19_vm2, %v564_v0 }
  0xc5   :  { %v519_v7 = vadd.f32 %v855_v30, %v479_v4  ;;  %v460_v8 = vld [vmem:[#allocation2 + $0x38] sm:$0xff]  ;;  %441 = vst.msk [vmem:[#allocation2 + $0xd8] sm:$0xff] %vm19_vm2, %v404_v1 }
  0xc6   :  { %v500_v9 = vadd.f32 %v855_v30, %v460_v8  ;;  %v470_v10 = vld [vmem:[#allocation2 + $0x88] sm:$0xff]  ;;  %422 = vst.msk [vmem:[#allocation2 + $0x40] sm:$0xff] %vm19_vm2, %v385_v5 }
  0xc7   :  { %v555_v11 = vmax.f32 %v519_v7, 0.0  ;;  %v510_v12 = vadd.f32 %v855_v30, %v470_v10  ;;  %432 = vst.msk [vmem:[#allocation2 + $0x90] sm:$0xff] %vm19_vm2, %v395_v6 }
  0xc8   :  { %v536_v13 = vmax.f32 %v500_v9, 0.0 }
  0xc9   :  { %591 = vst.msk [vmem:[%s1074_s3 + $0xd0] sm:$0xff] %vm19_vm2, %v555_v11  ;;  %v546_v15 = vmax.f32 %v510_v12, 0.0 }
  0xca   :  { %572 = vst.msk [vmem:[%s1074_s3 + $0x38] sm:$0xff] %vm19_vm2, %v536_v13  ;;  %v357_v18 = vpop.f32.mrf.mxu2 }
  0xcb   :  { %582 = vst.msk [vmem:[%s1074_s3 + $0x88] sm:$0xff] %vm19_vm2, %v546_v15  ;;  %v405_v19 = vadd.f32 %v357_v18, %v84_v14  ;;  %v309_v20 = vpop.f32.mrf.mxu0  ;;  %v334_v21 = vpop.f32.mrf.mxu1 }
  0xcc   :  { %v480_v22 = vld [vmem:[#allocation2 + $0xd8] sm:$0xff]  ;;  %v386_v23 = vadd.f32 %v309_v20, %v65_v16  ;;  %v396_v24 = vadd.f32 %v334_v21, %v75_v17 }
  0xcd   :  { %v520_v25 = vadd.f32 %v855_v30, %v480_v22  ;;  %v461_v26 = vld [vmem:[#allocation2 + $0x40] sm:$0xff]  ;;  %442 = vst.msk [vmem:[#allocation2 + $0xe0] sm:$0xff] %vm19_vm2, %v405_v19 }
  0xce   :  { %v501_v27 = vadd.f32 %v855_v30, %v461_v26  ;;  %v471_v28 = vld [vmem:[#allocation2 + $0x90] sm:$0xff]  ;;  %423 = vst.msk [vmem:[#allocation2 + $0x48] sm:$0xff] %vm19_vm2, %v386_v23 }
  0xcf   :  { %v556_v29 = vmax.f32 %v520_v25, 0.0  ;;  %v511_v31 = vadd.f32 %v855_v30, %v471_v28  ;;  %433 = vst.msk [vmem:[#allocation2 + $0x98] sm:$0xff] %vm19_vm2, %v396_v24 }
  0xd0   :  { %v537_v32 = vmax.f32 %v501_v27, 0.0 }
  0xd1   :  { %592 = vst.msk [vmem:[%s1074_s3 + $0xd8] sm:$0xff] %vm19_vm2, %v556_v29  ;;  %v547_v34 = vmax.f32 %v511_v31, 0.0 }
  0xd2   :  { %573 = vst.msk [vmem:[%s1074_s3 + $0x40] sm:$0xff] %vm19_vm2, %v537_v32  ;;  %v359_v35 = vpop.f32.mrf.mxu2 }
  0xd3   :  { %583 = vst.msk [vmem:[%s1074_s3 + $0x90] sm:$0xff] %vm19_vm2, %v547_v34  ;;  %v406_v36 = vadd.f32 %v359_v35, %v85_v33 }
  0xd4   :  { %v481_v37 = vld [vmem:[#allocation2 + $0xe0] sm:$0xff] }
  0xd5   :  { %v521_v38 = vadd.f32 %v855_v30, %v481_v37  ;;  %v462_v39 = vld [vmem:[#allocation2 + $0x48] sm:$0xff]  ;;  %443 = vst.msk [vmem:[#allocation2 + $0xe8] sm:$0xff] %vm19_vm2, %v406_v36 }
  0xd6   :  { %v502_v40 = vadd.f32 %v855_v30, %v462_v39  ;;  %v472_v41 = vld [vmem:[#allocation2 + $0x98] sm:$0xff] }
  0xd7   :  { %v557_v42 = vmax.f32 %v521_v38, 0.0  ;;  %v512_v43 = vadd.f32 %v855_v30, %v472_v41 }
  0xd8   :  { %v538_v44 = vmax.f32 %v502_v40, 0.0 }
  0xd9   :  { %593 = vst.msk [vmem:[%s1074_s3 + $0xe0] sm:$0xff] %vm19_vm2, %v557_v42  ;;  %v548_v45 = vmax.f32 %v512_v43, 0.0 }
  0xda   :  { %574 = vst.msk [vmem:[%s1074_s3 + $0x48] sm:$0xff] %vm19_vm2, %v538_v44 }
  0xdb   :  { %584 = vst.msk [vmem:[%s1074_s3 + $0x98] sm:$0xff] %vm19_vm2, %v548_v45 }
  0xdc   :  { %v482_v46 = vld [vmem:[#allocation2 + $0xe8] sm:$0xff] }
  0xdd   :  { %v522_v47 = vadd.f32 %v855_v30, %v482_v46 }
  0xdf   :  { %v558_v48 = vmax.f32 %v522_v47, 0.0 }
  0xe1   :  { %594 = vst.msk [vmem:[%s1074_s3 + $0xe8] sm:$0xff] %vm19_vm2, %v558_v48 }

// kernel: forward.18
= control target key start
LH: loop header
LB: loop body
LE: loop exit
PB: predicated region body
PF: predicated region fallthrough
CT: control target
= control target key end

     0   :  { %vm21_vm0 = vcmask 7168   ;;  %v353_v2 = vmov 0.0   ;;  %vm147_vm1 = vcmask 1043456   ;;  %vm122_vm2 = vcmask 195584   ;;  %s529_s1 = inlined_call_operand.vmem [shape: bf16[24,1], index: 1, kind: input, shape index: {}]   ;;  %s530_s2 = inlined_call_operand.<no memory space> [shape: f32[1,1], index: 2, kind: input, shape index: {}]   ;;  %s531_s0 = inlined_call_operand.vmem [shape: bf16[128,24], index: 0, kind: input, shape index: {}]   ;;  %s532_s3 = inlined_call_operand.vmem [shape: f32[128,1], index: 3, kind: output, shape index: {}]  }
   0x1   :  { %v72_v0 = vld [vmem:[%s529_s1 + $0x8] sm:$0xf]  ;;  %v8_v1 = vstv %s530_s2  ;;  %22 = vst.msk [vmem:[#allocation2] sm:$0xff] %vm21_vm0, %v353_v2  ;;  %v344_v6 = vld [vmem:[%s529_s1] sm:$0xff]  ;;  %v338_v8 = vld [vmem:[%s531_s0 + $0x10] sm:$0xff] }
   0x2   :  { %v118_v3 = vunpack.c.l.b16 %v72_v0  ;;  %9 = vst [vmem:[#allocation3] sm:$0x1] %v8_v1  ;;  %v336_v7 = vld [vmem:[%s531_s0] sm:$0xff]  ;;  %v342_v10 = vld [vmem:[%s531_s0 + $0x30] sm:$0xff]  ;;  %v337_v11 = vld [vmem:[%s531_s0 + $0x8] sm:$0xff] }
   0x3   :  { %23 = vst.msk [vmem:[#allocation2 + $0x8] sm:$0xff] %vm21_vm0, %v353_v2  ;;  %v340_v9 = vld [vmem:[%s531_s0 + $0x20] sm:$0xff]  ;;  %v339_v12 = vld [vmem:[%s531_s0 + $0x18] sm:$0xff]  ;;  %v341_v13 = vld [vmem:[%s531_s0 + $0x28] sm:$0xff] }
   0x4   :  { %v120_v4 = vpack.c.b16 %v118_v3, %v118_v3  ;;  %24 = vst.msk [vmem:[#allocation2 + $0x10] sm:$0xff] %vm21_vm0, %v353_v2  ;;  %v343_v14 = vld [vmem:[%s531_s0 + $0x38] sm:$0xff] }
   0x5   :  { %25 = vst.msk [vmem:[#allocation2 + $0x18] sm:$0xff] %vm21_vm0, %v353_v2 }
   0x6   :  { %v149_v5 = vsel %vm147_vm1, %v120_v4, 0  ;;  %26 = vst.msk [vmem:[#allocation2 + $0x20] sm:$0xff] %vm21_vm0, %v353_v2 }
   0x7   :  { %157 = vmatpush.bf16.msra.mxu0 %v149_v5  ;;  %345 = vmatpush.bf16.msra.mxu1 %v149_v5  ;;  %27 = vst.msk [vmem:[#allocation2 + $0x28] sm:$0xff] %vm21_vm0, %v353_v2 }
   0x8   :  { %346 = vmatpush.bf16.msra.mxu2 %v149_v5  ;;  %347 = vmatpush.bf16.msra.mxu3 %v149_v5  ;;  %28 = vst.msk [vmem:[#allocation2 + $0x30] sm:$0xff] %vm21_vm0, %v353_v2  ;;  %v38_v15 = vld [vmem:[#allocation2] sm:$0xff] }
   0x9   :  { %29 = vst.msk [vmem:[#allocation2 + $0x38] sm:$0xff] %vm21_vm0, %v353_v2  ;;  %v433_v24 = vld [vmem:[#allocation3] ss:$0 sm:$0xff] }
   0xa   :  { %30 = vst.msk [vmem:[#allocation2 + $0x40] sm:$0xff] %vm21_vm0, %v353_v2  ;;  %v39_v23 = vld [vmem:[#allocation2 + $0x8] sm:$0xff] }
   0xb   :  { %158 = vmatpush.bf16.msra.mxu0 %v344_v6  ;;  %348 = vmatpush.bf16.msra.mxu1 %v344_v6  ;;  %31 = vst.msk [vmem:[#allocation2 + $0x48] sm:$0xff] %vm21_vm0, %v353_v2  ;;  %v40_v44 = vld [vmem:[#allocation2 + $0x10] sm:$0xff] }
   0xc   :  { %349 = vmatpush.bf16.msra.mxu2 %v344_v6  ;;  %350 = vmatpush.bf16.msra.mxu3 %v344_v6  ;;  %32 = vst.msk [vmem:[#allocation2 + $0x50] sm:$0xff] %vm21_vm0, %v353_v2  ;;  %v41_v62 = vld [vmem:[#allocation2 + $0x18] sm:$0xff] }
   0xd   :  { %33 = vst.msk [vmem:[#allocation2 + $0x58] sm:$0xff] %vm21_vm0, %v353_v2  ;;  %v42_v16 = vld [vmem:[#allocation2 + $0x20] sm:$0xff] }
   0xe   :  { %328 = vmatmul.msk.bf16.vlgmr.msra.gmra.mxu0 %vm122_vm2, %v336_v7  ;;  %330 = vmatmul.msk.bf16.vlgmr.msra.gmra.mxu1 %vm122_vm2, %v338_v8  ;;  %34 = vst.msk [vmem:[#allocation2 + $0x60] sm:$0xff] %vm21_vm0, %v353_v2  ;;  %v43_v30 = vld [vmem:[#allocation2 + $0x28] sm:$0xff] }
   0xf   :  { %332 = vmatmul.msk.bf16.vlgmr.msra.gmra.mxu2 %vm122_vm2, %v340_v9  ;;  %334 = vmatmul.msk.bf16.vlgmr.msra.gmra.mxu3 %vm122_vm2, %v342_v10  ;;  %35 = vst.msk [vmem:[#allocation2 + $0x68] sm:$0xff] %vm21_vm0, %v353_v2  ;;  %v44_v48 = vld [vmem:[#allocation2 + $0x30] sm:$0xff] }
  0x10   :  { %36 = vst.msk [vmem:[#allocation2 + $0x70] sm:$0xff] %vm21_vm0, %v353_v2 }
  0x11   :  { %37 = vst.msk [vmem:[#allocation2 + $0x78] sm:$0xff] %vm21_vm0, %v353_v2  ;;  %v46_v21 = vld [vmem:[#allocation2 + $0x40] sm:$0xff]  ;;  %v45_v2 = vld [vmem:[#allocation2 + $0x38] sm:$0xff] }
  0x12   :  { %v47_v38 = vld [vmem:[#allocation2 + $0x48] sm:$0xff] }
  0x13   :  { %v48_v56 = vld [vmem:[#allocation2 + $0x50] sm:$0xff] }
  0x14   :  { %v49_v10 = vld [vmem:[#allocation2 + $0x58] sm:$0xff] }
  0x15   :  { %v50_v22 = vld [vmem:[#allocation2 + $0x60] sm:$0xff] }
  0x16   :  { %v51_v39 = vld [vmem:[#allocation2 + $0x68] sm:$0xff] }
  0x17   :  { %v52_v57 = vld [vmem:[#allocation2 + $0x70] sm:$0xff] }
  0x1e   :  { %329 = vmatmul.msk.bf16.gmra.mxu0 %vm122_vm2, %v337_v11  ;;  %331 = vmatmul.msk.bf16.gmra.mxu1 %vm122_vm2, %v339_v12 }
  0x1f   :  { %333 = vmatmul.msk.bf16.gmra.mxu2 %vm122_vm2, %v341_v13  ;;  %335 = vmatmul.msk.bf16.gmra.mxu3 %vm122_vm2, %v343_v14 }
  0x8b   :  { %v160_v17 = vpop.f32.mrf.mxu0  ;;  %v170_v18 = vpop.f32.mrf.mxu1 }
  0x8c   :  { %v200_v19 = vadd.f32 %v160_v17, %v38_v15  ;;  %v204_v20 = vadd.f32 %v170_v18, %v42_v16  ;;  %v53_v15 = vld [vmem:[#allocation2 + $0x78] sm:$0xff] }
  0x8e   :  { %217 = vst.msk [vmem:[#allocation2] sm:$0xff] %vm21_vm0, %v200_v19 }
  0x8f   :  { %221 = vst.msk [vmem:[#allocation2 + $0x20] sm:$0xff] %vm21_vm0, %v204_v20 }
  0x92   :  { %v180_v25 = vpop.f32.mrf.mxu2  ;;  %v190_v26 = vpop.f32.mrf.mxu3 }
  0x93   :  { %v208_v27 = vadd.f32 %v180_v25, %v46_v21  ;;  %v212_v28 = vadd.f32 %v190_v26, %v50_v22  ;;  %v162_v29 = vpop.f32.mrf.mxu0  ;;  %v172_v31 = vpop.f32.mrf.mxu1 }
  0x94   :  { %v201_v32 = vadd.f32 %v162_v29, %v39_v23  ;;  %v205_v36 = vadd.f32 %v172_v31, %v43_v30 }
  0x95   :  { %v236_v33 = vld [vmem:[#allocation2] sm:$0xff]  ;;  %225 = vst.msk [vmem:[#allocation2 + $0x40] sm:$0xff] %vm21_vm0, %v208_v27 }
  0x96   :  { %v256_v34 = vadd.f32 %v433_v24, %v236_v33  ;;  %v240_v35 = vld [vmem:[#allocation2 + $0x20] sm:$0xff]  ;;  %229 = vst.msk [vmem:[#allocation2 + $0x60] sm:$0xff] %vm21_vm0, %v212_v28 }
  0x97   :  { %v260_v37 = vadd.f32 %v433_v24, %v240_v35  ;;  %218 = vst.msk [vmem:[#allocation2 + $0x8] sm:$0xff] %vm21_vm0, %v201_v32 }
  0x98   :  { %272 = vst.msk [vmem:[%s532_s3] sm:$0xff] %vm21_vm0, %v256_v34 }
  0x99   :  { %276 = vst.msk [vmem:[%s532_s3 + $0x20] sm:$0xff] %vm21_vm0, %v260_v37 }
  0x9a   :  { %222 = vst.msk [vmem:[#allocation2 + $0x28] sm:$0xff] %vm21_vm0, %v205_v36  ;;  %v182_v40 = vpop.f32.mrf.mxu2  ;;  %v192_v41 = vpop.f32.mrf.mxu3 }
  0x9b   :  { %v209_v42 = vadd.f32 %v182_v40, %v47_v38  ;;  %v213_v43 = vadd.f32 %v192_v41, %v51_v39  ;;  %v165_v45 = vpop.f32.mrf.mxu0  ;;  %v175_v46 = vpop.f32.mrf.mxu1 }
  0x9c   :  { %v244_v47 = vld [vmem:[#allocation2 + $0x40] sm:$0xff]  ;;  %v202_v53 = vadd.f32 %v165_v45, %v40_v44  ;;  %v206_v55 = vadd.f32 %v175_v46, %v44_v48 }
  0x9d   :  { %v264_v49 = vadd.f32 %v433_v24, %v244_v47  ;;  %v248_v50 = vld [vmem:[#allocation2 + $0x60] sm:$0xff]  ;;  %226 = vst.msk [vmem:[#allocation2 + $0x48] sm:$0xff] %vm21_vm0, %v209_v42 }
  0x9e   :  { %v268_v51 = vadd.f32 %v433_v24, %v248_v50  ;;  %v237_v52 = vld [vmem:[#allocation2 + $0x8] sm:$0xff]  ;;  %230 = vst.msk [vmem:[#allocation2 + $0x68] sm:$0xff] %vm21_vm0, %v213_v43 }
  0x9f   :  { %280 = vst.msk [vmem:[%s532_s3 + $0x40] sm:$0xff] %vm21_vm0, %v264_v49  ;;  %v257_v54 = vadd.f32 %v433_v24, %v237_v52 }
  0xa0   :  { %284 = vst.msk [vmem:[%s532_s3 + $0x60] sm:$0xff] %vm21_vm0, %v268_v51 }
  0xa1   :  { %273 = vst.msk [vmem:[%s532_s3 + $0x8] sm:$0xff] %vm21_vm0, %v257_v54  ;;  %v241_v58 = vld [vmem:[#allocation2 + $0x28] sm:$0xff] }
  0xa2   :  { %v261_v59 = vadd.f32 %v433_v24, %v241_v58  ;;  %219 = vst.msk [vmem:[#allocation2 + $0x10] sm:$0xff] %vm21_vm0, %v202_v53  ;;  %v185_v60 = vpop.f32.mrf.mxu2  ;;  %v195_v61 = vpop.f32.mrf.mxu3 }
  0xa3   :  { %223 = vst.msk [vmem:[#allocation2 + $0x30] sm:$0xff] %vm21_vm0, %v206_v55  ;;  %v210_v63 = vadd.f32 %v185_v60, %v48_v56  ;;  %v214_v0 = vadd.f32 %v195_v61, %v52_v57  ;;  %v167_v1 = vpop.f32.mrf.mxu0  ;;  %v177_v3 = vpop.f32.mrf.mxu1 }
  0xa4   :  { %277 = vst.msk [vmem:[%s532_s3 + $0x28] sm:$0xff] %vm21_vm0, %v261_v59  ;;  %v245_v4 = vld [vmem:[#allocation2 + $0x48] sm:$0xff]  ;;  %v203_v7 = vadd.f32 %v167_v1, %v41_v62  ;;  %v207_v9 = vadd.f32 %v177_v3, %v45_v2 }
  0xa5   :  { %v265_v5 = vadd.f32 %v433_v24, %v245_v4  ;;  %v249_v6 = vld [vmem:[#allocation2 + $0x68] sm:$0xff]  ;;  %227 = vst.msk [vmem:[#allocation2 + $0x50] sm:$0xff] %vm21_vm0, %v210_v63 }
  0xa6   :  { %v269_v8 = vadd.f32 %v433_v24, %v249_v6  ;;  %231 = vst.msk [vmem:[#allocation2 + $0x70] sm:$0xff] %vm21_vm0, %v214_v0 }
  0xa7   :  { %281 = vst.msk [vmem:[%s532_s3 + $0x48] sm:$0xff] %vm21_vm0, %v265_v5 }
  0xa8   :  { %285 = vst.msk [vmem:[%s532_s3 + $0x68] sm:$0xff] %vm21_vm0, %v269_v8 }
  0xa9   :  { %v238_v11 = vld [vmem:[#allocation2 + $0x10] sm:$0xff]  ;;  %220 = vst.msk [vmem:[#allocation2 + $0x18] sm:$0xff] %vm21_vm0, %v203_v7 }
  0xaa   :  { %v258_v12 = vadd.f32 %v433_v24, %v238_v11  ;;  %v242_v13 = vld [vmem:[#allocation2 + $0x30] sm:$0xff]  ;;  %224 = vst.msk [vmem:[#allocation2 + $0x38] sm:$0xff] %vm21_vm0, %v207_v9  ;;  %v187_v14 = vpop.f32.mrf.mxu2  ;;  %v197_v16 = vpop.f32.mrf.mxu3 }
  0xab   :  { %v262_v17 = vadd.f32 %v433_v24, %v242_v13  ;;  %v211_v18 = vadd.f32 %v187_v14, %v49_v10  ;;  %v215_v22 = vadd.f32 %v197_v16, %v53_v15 }
  0xac   :  { %274 = vst.msk [vmem:[%s532_s3 + $0x10] sm:$0xff] %vm21_vm0, %v258_v12  ;;  %v246_v19 = vld [vmem:[#allocation2 + $0x50] sm:$0xff] }
  0xad   :  { %278 = vst.msk [vmem:[%s532_s3 + $0x30] sm:$0xff] %vm21_vm0, %v262_v17  ;;  %v266_v20 = vadd.f32 %v433_v24, %v246_v19  ;;  %v250_v21 = vld [vmem:[#allocation2 + $0x70] sm:$0xff] }
  0xae   :  { %v270_v23 = vadd.f32 %v433_v24, %v250_v21  ;;  %228 = vst.msk [vmem:[#allocation2 + $0x58] sm:$0xff] %vm21_vm0, %v211_v18 }
  0xaf   :  { %282 = vst.msk [vmem:[%s532_s3 + $0x50] sm:$0xff] %vm21_vm0, %v266_v20 }
  0xb0   :  { %286 = vst.msk [vmem:[%s532_s3 + $0x70] sm:$0xff] %vm21_vm0, %v270_v23  ;;  %v239_v25 = vld [vmem:[#allocation2 + $0x18] sm:$0xff] }
  0xb1   :  { %v259_v26 = vadd.f32 %v433_v24, %v239_v25  ;;  %v243_v27 = vld [vmem:[#allocation2 + $0x38] sm:$0xff]  ;;  %232 = vst.msk [vmem:[#allocation2 + $0x78] sm:$0xff] %vm21_vm0, %v215_v22 }
  0xb2   :  { %v263_v28 = vadd.f32 %v433_v24, %v243_v27 }
  0xb3   :  { %275 = vst.msk [vmem:[%s532_s3 + $0x18] sm:$0xff] %vm21_vm0, %v259_v26 }
  0xb4   :  { %279 = vst.msk [vmem:[%s532_s3 + $0x38] sm:$0xff] %vm21_vm0, %v263_v28 }
  0xb5   :  { %v247_v29 = vld [vmem:[#allocation2 + $0x58] sm:$0xff] }
  0xb6   :  { %v267_v30 = vadd.f32 %v433_v24, %v247_v29 }
  0xb8   :  { %283 = vst.msk [vmem:[%s532_s3 + $0x58] sm:$0xff] %vm21_vm0, %v267_v30  ;;  %v251_v31 = vld [vmem:[#allocation2 + $0x78] sm:$0xff] }
  0xb9   :  { %v271_v32 = vadd.f32 %v433_v24, %v251_v31 }
  0xbb   :  { %287 = vst.msk [vmem:[%s532_s3 + $0x78] sm:$0xff] %vm21_vm0, %v271_v32 }

// kernel: forward.19
= control target key start
LH: loop header
LB: loop body
LE: loop exit
PB: predicated region body
PF: predicated region fallthrough
CT: control target
= control target key end

     0   :  { %vm369_vm0 = vcmask 1043456   ;;  %vm296_vm1 = vcmask 195584   ;;  %vm19_vm2 = vcmask 64512   ;;  %v911_v21 = vmov 0.0   ;;  %s1423_s1 = inlined_call_operand.vmem [shape: bf16[24,8], index: 1, kind: input, shape index: {}]   ;;  %s1424_s2 = inlined_call_operand.vmem [shape: f32[1,8], index: 2, kind: input, shape index: {}]   ;;  %s1425_s0 = inlined_call_operand.vmem [shape: bf16[384,24], index: 0, kind: input, shape index: {}]   ;;  %s1426_s3 = inlined_call_operand.vmem [shape: f32[384,8], index: 3, kind: output, shape index: {}]  }
   0x1   :  { %v166_v0 = vld [vmem:[%s1423_s1 + $0x8] sm:$0xf]  ;;  %v902_v4 = vld [vmem:[%s1423_s1] sm:$0xff]  ;;  %v884_v6 = vld [vmem:[%s1425_s0 + $0x30] sm:$0xff]  ;;  %20 = vst.msk [vmem:[#allocation2] sm:$0xff] %vm19_vm2, %v911_v21 }
   0x2   :  { %v292_v1 = vunpack.c.l.b16 %v166_v0  ;;  %v878_v5 = vld [vmem:[%s1425_s0] sm:$0xff]  ;;  %v896_v8 = vld [vmem:[%s1425_s0 + $0x90] sm:$0xff]  ;;  %v879_v9 = vld [vmem:[%s1425_s0 + $0x8] sm:$0xff]  ;;  %21 = vst.msk [vmem:[#allocation2 + $0x8] sm:$0xff] %vm19_vm2, %v911_v21 }
   0x3   :  { %v890_v7 = vld [vmem:[%s1425_s0 + $0x60] sm:$0xff]  ;;  %v885_v10 = vld [vmem:[%s1425_s0 + $0x38] sm:$0xff]  ;;  %v891_v11 = vld [vmem:[%s1425_s0 + $0x68] sm:$0xff]  ;;  %22 = vst.msk [vmem:[#allocation2 + $0x10] sm:$0xff] %vm19_vm2, %v911_v21 }
   0x4   :  { %v294_v2 = vpack.c.b16 %v292_v1, %v292_v1  ;;  %v897_v12 = vld [vmem:[%s1425_s0 + $0x98] sm:$0xff]  ;;  %v880_v13 = vld [vmem:[%s1425_s0 + $0x10] sm:$0xff]  ;;  %v886_v14 = vld [vmem:[%s1425_s0 + $0x40] sm:$0xff]  ;;  %23 = vst.msk [vmem:[#allocation2 + $0x18] sm:$0xff] %vm19_vm2, %v911_v21 }
   0x5   :  { %v892_v15 = vld [vmem:[%s1425_s0 + $0x70] sm:$0xff]  ;;  %v898_v16 = vld [vmem:[%s1425_s0 + $0xa0] sm:$0xff]  ;;  %v881_v17 = vld [vmem:[%s1425_s0 + $0x18] sm:$0xff]  ;;  %24 = vst.msk [vmem:[#allocation2 + $0x20] sm:$0xff] %vm19_vm2, %v911_v21 }
   0x6   :  { %v371_v3 = vsel %vm369_vm0, %v294_v2, 0  ;;  %v887_v18 = vld [vmem:[%s1425_s0 + $0x48] sm:$0xff]  ;;  %v893_v19 = vld [vmem:[%s1425_s0 + $0x78] sm:$0xff]  ;;  %25 = vst.msk [vmem:[#allocation2 + $0x28] sm:$0xff] %vm19_vm2, %v911_v21  ;;  %v882_v22 = vld [vmem:[%s1425_s0 + $0x20] sm:$0xff] }
   0x7   :  { %379 = vmatpush.bf16.msra.mxu0 %v371_v3  ;;  %903 = vmatpush.bf16.msra.mxu1 %v371_v3  ;;  %v899_v20 = vld [vmem:[%s1425_s0 + $0xa8] sm:$0xff]  ;;  %26 = vst.msk [vmem:[#allocation2 + $0x30] sm:$0xff] %vm19_vm2, %v911_v21  ;;  %v888_v23 = vld [vmem:[%s1425_s0 + $0x50] sm:$0xff]  ;;  %v894_v24 = vld [vmem:[%s1425_s0 + $0x80] sm:$0xff] }
   0x8   :  { %904 = vmatpush.bf16.msra.mxu2 %v371_v3  ;;  %905 = vmatpush.bf16.msra.mxu3 %v371_v3  ;;  %27 = vst.msk [vmem:[#allocation2 + $0x38] sm:$0xff] %vm19_vm2, %v911_v21  ;;  %v900_v25 = vld [vmem:[%s1425_s0 + $0xb0] sm:$0xff]  ;;  %v883_v26 = vld [vmem:[%s1425_s0 + $0x28] sm:$0xff]  ;;  %v889_v27 = vld [vmem:[%s1425_s0 + $0x58] sm:$0xff] }
   0x9   :  { %28 = vst.msk [vmem:[#allocation2 + $0x40] sm:$0xff] %vm19_vm2, %v911_v21  ;;  %v895_v28 = vld [vmem:[%s1425_s0 + $0x88] sm:$0xff]  ;;  %v901_v29 = vld [vmem:[%s1425_s0 + $0xb8] sm:$0xff]  ;;  %v68_v30 = vld [vmem:[#allocation2] sm:$0xff] }
   0xa   :  { %29 = vst.msk [vmem:[#allocation2 + $0x48] sm:$0xff] %vm19_vm2, %v911_v21  ;;  %v69_v38 = vld [vmem:[#allocation2 + $0x8] sm:$0xff]  ;;  %v1135_v39 = vld [vmem:[%s1424_s2] ss:$0 sm:$0xff]  ;;  %v70_v59 = vld [vmem:[#allocation2 + $0x10] sm:$0xff] }
   0xb   :  { %380 = vmatpush.bf16.msra.mxu0 %v902_v4  ;;  %906 = vmatpush.bf16.msra.mxu1 %v902_v4  ;;  %30 = vst.msk [vmem:[#allocation2 + $0x50] sm:$0xff] %vm19_vm2, %v911_v21 }
   0xc   :  { %907 = vmatpush.bf16.msra.mxu2 %v902_v4  ;;  %908 = vmatpush.bf16.msra.mxu3 %v902_v4  ;;  %31 = vst.msk [vmem:[#allocation2 + $0x58] sm:$0xff] %vm19_vm2, %v911_v21 }
   0xd   :  { %32 = vst.msk [vmem:[#allocation2 + $0x60] sm:$0xff] %vm19_vm2, %v911_v21 }
   0xe   :  { %854 = vmatmul.msk.bf16.vlgmr.msra.gmra.mxu0 %vm296_vm1, %v878_v5  ;;  %860 = vmatmul.msk.bf16.vlgmr.msra.gmra.mxu1 %vm296_vm1, %v884_v6  ;;  %33 = vst.msk [vmem:[#allocation2 + $0x68] sm:$0xff] %vm19_vm2, %v911_v21 }
   0xf   :  { %866 = vmatmul.msk.bf16.vlgmr.msra.gmra.mxu2 %vm296_vm1, %v890_v7  ;;  %872 = vmatmul.msk.bf16.vlgmr.msra.gmra.mxu3 %vm296_vm1, %v896_v8  ;;  %34 = vst.msk [vmem:[#allocation2 + $0x70] sm:$0xff] %vm19_vm2, %v911_v21 }
  0x10   :  { %35 = vst.msk [vmem:[#allocation2 + $0x78] sm:$0xff] %vm19_vm2, %v911_v21 }
  0x11   :  { %36 = vst.msk [vmem:[#allocation2 + $0x80] sm:$0xff] %vm19_vm2, %v911_v21 }
  0x12   :  { %37 = vst.msk [vmem:[#allocation2 + $0x88] sm:$0xff] %vm19_vm2, %v911_v21 }
  0x13   :  { %38 = vst.msk [vmem:[#allocation2 + $0x90] sm:$0xff] %vm19_vm2, %v911_v21 }
  0x14   :  { %39 = vst.msk [vmem:[#allocation2 + $0x98] sm:$0xff] %vm19_vm2, %v911_v21  ;;  %v80_v31 = vld [vmem:[#allocation2 + $0x60] sm:$0xff] }
  0x15   :  { %40 = vst.msk [vmem:[#allocation2 + $0xa0] sm:$0xff] %vm19_vm2, %v911_v21  ;;  %v81_v45 = vld [vmem:[#allocation2 + $0x68] sm:$0xff] }
  0x16   :  { %41 = vst.msk [vmem:[#allocation2 + $0xa8] sm:$0xff] %vm19_vm2, %v911_v21  ;;  %v82_v63 = vld [vmem:[#allocation2 + $0x70] sm:$0xff] }
  0x17   :  { %42 = vst.msk [vmem:[#allocation2 + $0xb0] sm:$0xff] %vm19_vm2, %v911_v21 }
  0x18   :  { %43 = vst.msk [vmem:[#allocation2 + $0xb8] sm:$0xff] %vm19_vm2, %v911_v21 }
  0x19   :  { %44 = vst.msk [vmem:[#allocation2 + $0xc0] sm:$0xff] %vm19_vm2, %v911_v21 }
  0x1a   :  { %45 = vst.msk [vmem:[#allocation2 + $0xc8] sm:$0xff] %vm19_vm2, %v911_v21 }
  0x1b   :  { %46 = vst.msk [vmem:[#allocation2 + $0xd0] sm:$0xff] %vm19_vm2, %v911_v21 }
  0x1c   :  { %47 = vst.msk [vmem:[#allocation2 + $0xd8] sm:$0xff] %vm19_vm2, %v911_v21 }
  0x1d   :  { %48 = vst.msk [vmem:[#allocation2 + $0xe0] sm:$0xff] %vm19_vm2, %v911_v21 }
  0x1e   :  { %855 = vmatmul.msk.bf16.gmra.mxu0 %vm296_vm1, %v879_v9  ;;  %861 = vmatmul.msk.bf16.gmra.mxu1 %vm296_vm1, %v885_v10  ;;  %49 = vst.msk [vmem:[#allocation2 + $0xe8] sm:$0xff] %vm19_vm2, %v911_v21 }
  0x1f   :  { %867 = vmatmul.msk.bf16.gmra.mxu2 %vm296_vm1, %v891_v11  ;;  %873 = vmatmul.msk.bf16.gmra.mxu3 %vm296_vm1, %v897_v12  ;;  %50 = vst.msk [vmem:[#allocation2 + $0xf0] sm:$0xff] %vm19_vm2, %v911_v21 }
  0x20   :  { %51 = vst.msk [vmem:[#allocation2 + $0xf8] sm:$0xff] %vm19_vm2, %v911_v21  ;;  %v92_v36 = vld [vmem:[#allocation2 + $0xc0] sm:$0xff] }
  0x21   :  { %52 = vst.msk [vmem:[#allocation2 + $0x100] sm:$0xff] %vm19_vm2, %v911_v21  ;;  %v93_v53 = vld [vmem:[#allocation2 + $0xc8] sm:$0xff] }
  0x22   :  { %53 = vst.msk [vmem:[#allocation2 + $0x108] sm:$0xff] %vm19_vm2, %v911_v21  ;;  %v94_v7 = vld [vmem:[#allocation2 + $0xd0] sm:$0xff] }
  0x23   :  { %54 = vst.msk [vmem:[#allocation2 + $0x110] sm:$0xff] %vm19_vm2, %v911_v21 }
  0x24   :  { %55 = vst.msk [vmem:[#allocation2 + $0x118] sm:$0xff] %vm19_vm2, %v911_v21 }
  0x25   :  { %56 = vst.msk [vmem:[#allocation2 + $0x120] sm:$0xff] %vm19_vm2, %v911_v21 }
  0x26   :  { %57 = vst.msk [vmem:[#allocation2 + $0x128] sm:$0xff] %vm19_vm2, %v911_v21 }
  0x27   :  { %58 = vst.msk [vmem:[#allocation2 + $0x130] sm:$0xff] %vm19_vm2, %v911_v21 }
  0x28   :  { %59 = vst.msk [vmem:[#allocation2 + $0x138] sm:$0xff] %vm19_vm2, %v911_v21 }
  0x29   :  { %60 = vst.msk [vmem:[#allocation2 + $0x140] sm:$0xff] %vm19_vm2, %v911_v21 }
  0x2a   :  { %61 = vst.msk [vmem:[#allocation2 + $0x148] sm:$0xff] %vm19_vm2, %v911_v21 }
  0x2b   :  { %62 = vst.msk [vmem:[#allocation2 + $0x150] sm:$0xff] %vm19_vm2, %v911_v21 }
  0x2c   :  { %63 = vst.msk [vmem:[#allocation2 + $0x158] sm:$0xff] %vm19_vm2, %v911_v21  ;;  %v104_v37 = vld [vmem:[#allocation2 + $0x120] sm:$0xff] }
  0x2d   :  { %64 = vst.msk [vmem:[#allocation2 + $0x160] sm:$0xff] %vm19_vm2, %v911_v21  ;;  %v105_v54 = vld [vmem:[#allocation2 + $0x128] sm:$0xff] }
  0x2e   :  { %856 = vmatmul.msk.bf16.gmra.mxu0 %vm296_vm1, %v880_v13  ;;  %862 = vmatmul.msk.bf16.gmra.mxu1 %vm296_vm1, %v886_v14  ;;  %65 = vst.msk [vmem:[#allocation2 + $0x168] sm:$0xff] %vm19_vm2, %v911_v21  ;;  %v106_v8 = vld [vmem:[#allocation2 + $0x130] sm:$0xff]  ;;  %v71_v13 = vld [vmem:[#allocation2 + $0x18] sm:$0xff] }
  0x2f   :  { %868 = vmatmul.msk.bf16.gmra.mxu2 %vm296_vm1, %v892_v15  ;;  %874 = vmatmul.msk.bf16.gmra.mxu3 %vm296_vm1, %v898_v16  ;;  %66 = vst.msk [vmem:[#allocation2 + $0x170] sm:$0xff] %vm19_vm2, %v911_v21 }
  0x30   :  { %67 = vst.msk [vmem:[#allocation2 + $0x178] sm:$0xff] %vm19_vm2, %v911_v21 }
  0x3e   :  { %857 = vmatmul.msk.bf16.gmra.mxu0 %vm296_vm1, %v881_v17  ;;  %863 = vmatmul.msk.bf16.gmra.mxu1 %vm296_vm1, %v887_v18  ;;  %v83_v17 = vld [vmem:[#allocation2 + $0x78] sm:$0xff] }
  0x3f   :  { %869 = vmatmul.msk.bf16.gmra.mxu2 %vm296_vm1, %v893_v19  ;;  %875 = vmatmul.msk.bf16.gmra.mxu3 %vm296_vm1, %v899_v20 }
  0x4e   :  { %858 = vmatmul.msk.bf16.gmra.mxu0 %vm296_vm1, %v882_v22  ;;  %864 = vmatmul.msk.bf16.gmra.mxu1 %vm296_vm1, %v888_v23 }
  0x4f   :  { %870 = vmatmul.msk.bf16.gmra.mxu2 %vm296_vm1, %v894_v24  ;;  %876 = vmatmul.msk.bf16.gmra.mxu3 %vm296_vm1, %v900_v25  ;;  %v95_v25 = vld [vmem:[#allocation2 + $0xd8] sm:$0xff] }
  0x5e   :  { %859 = vmatmul.msk.bf16.gmra.mxu0 %vm296_vm1, %v883_v26  ;;  %865 = vmatmul.msk.bf16.gmra.mxu1 %vm296_vm1, %v889_v27 }
  0x5f   :  { %871 = vmatmul.msk.bf16.gmra.mxu2 %vm296_vm1, %v895_v28  ;;  %877 = vmatmul.msk.bf16.gmra.mxu3 %vm296_vm1, %v901_v29 }
  0x8b   :  { %v382_v32 = vpop.f32.mrf.mxu0  ;;  %v412_v33 = vpop.f32.mrf.mxu1 }
  0x8c   :  { %v502_v34 = vadd.f32 %v382_v32, %v68_v30  ;;  %v514_v35 = vadd.f32 %v412_v33, %v80_v31  ;;  %v107_v30 = vld [vmem:[#allocation2 + $0x138] sm:$0xff] }
  0x8e   :  { %551 = vst.msk [vmem:[#allocation2] sm:$0xff] %vm19_vm2, %v502_v34  ;;  %v72_v34 = vld [vmem:[#allocation2 + $0x20] sm:$0xff] }
  0x8f   :  { %563 = vst.msk [vmem:[#allocation2 + $0x60] sm:$0xff] %vm19_vm2, %v514_v35 }
  0x92   :  { %v442_v40 = vpop.f32.mrf.mxu2  ;;  %v472_v41 = vpop.f32.mrf.mxu3 }
  0x93   :  { %v526_v42 = vadd.f32 %v442_v40, %v92_v36  ;;  %v538_v43 = vadd.f32 %v472_v41, %v104_v37  ;;  %v384_v44 = vpop.f32.mrf.mxu0  ;;  %v414_v46 = vpop.f32.mrf.mxu1 }
  0x94   :  { %v503_v47 = vadd.f32 %v384_v44, %v69_v38  ;;  %v515_v51 = vadd.f32 %v414_v46, %v81_v45  ;;  %v84_v44 = vld [vmem:[#allocation2 + $0x80] sm:$0xff] }
  0x95   :  { %v602_v48 = vld [vmem:[#allocation2] sm:$0xff]  ;;  %575 = vst.msk [vmem:[#allocation2 + $0xc0] sm:$0xff] %vm19_vm2, %v526_v42 }
  0x96   :  { %v654_v49 = vadd.f32 %v1135_v39, %v602_v48  ;;  %v614_v50 = vld [vmem:[#allocation2 + $0x60] sm:$0xff]  ;;  %587 = vst.msk [vmem:[#allocation2 + $0x120] sm:$0xff] %vm19_vm2, %v538_v43 }
  0x97   :  { %v666_v52 = vadd.f32 %v1135_v39, %v614_v50  ;;  %552 = vst.msk [vmem:[#allocation2 + $0x8] sm:$0xff] %vm19_vm2, %v503_v47  ;;  %v96_v46 = vld [vmem:[#allocation2 + $0xe0] sm:$0xff] }
  0x98   :  { %702 = vst.msk [vmem:[%s1426_s3] sm:$0xff] %vm19_vm2, %v654_v49  ;;  %v108_v47 = vld [vmem:[#allocation2 + $0x140] sm:$0xff] }
  0x99   :  { %714 = vst.msk [vmem:[%s1426_s3 + $0x60] sm:$0xff] %vm19_vm2, %v666_v52 }
  0x9a   :  { %564 = vst.msk [vmem:[#allocation2 + $0x68] sm:$0xff] %vm19_vm2, %v515_v51  ;;  %v444_v55 = vpop.f32.mrf.mxu2  ;;  %v474_v56 = vpop.f32.mrf.mxu3 }
  0x9b   :  { %v527_v57 = vadd.f32 %v444_v55, %v93_v53  ;;  %v539_v58 = vadd.f32 %v474_v56, %v105_v54  ;;  %v387_v60 = vpop.f32.mrf.mxu0  ;;  %v417_v61 = vpop.f32.mrf.mxu1  ;;  %v73_v54 = vld [vmem:[#allocation2 + $0x28] sm:$0xff] }
  0x9c   :  { %v626_v62 = vld [vmem:[#allocation2 + $0xc0] sm:$0xff]  ;;  %v504_v4 = vadd.f32 %v387_v60, %v70_v59  ;;  %v516_v6 = vadd.f32 %v417_v61, %v82_v63 }
  0x9d   :  { %v678_v0 = vadd.f32 %v1135_v39, %v626_v62  ;;  %v638_v1 = vld [vmem:[#allocation2 + $0x120] sm:$0xff]  ;;  %576 = vst.msk [vmem:[#allocation2 + $0xc8] sm:$0xff] %vm19_vm2, %v527_v57 }
  0x9e   :  { %v690_v2 = vadd.f32 %v1135_v39, %v638_v1  ;;  %v603_v3 = vld [vmem:[#allocation2 + $0x8] sm:$0xff]  ;;  %588 = vst.msk [vmem:[#allocation2 + $0x128] sm:$0xff] %vm19_vm2, %v539_v58 }
  0x9f   :  { %726 = vst.msk [vmem:[%s1426_s3 + $0xc0] sm:$0xff] %vm19_vm2, %v678_v0  ;;  %v655_v5 = vadd.f32 %v1135_v39, %v603_v3  ;;  %v85_v58 = vld [vmem:[#allocation2 + $0x88] sm:$0xff] }
  0xa0   :  { %738 = vst.msk [vmem:[%s1426_s3 + $0x120] sm:$0xff] %vm19_vm2, %v690_v2  ;;  %v97_v1 = vld [vmem:[#allocation2 + $0xe8] sm:$0xff] }
  0xa1   :  { %703 = vst.msk [vmem:[%s1426_s3 + $0x8] sm:$0xff] %vm19_vm2, %v655_v5  ;;  %v615_v9 = vld [vmem:[#allocation2 + $0x68] sm:$0xff] }
  0xa2   :  { %v667_v10 = vadd.f32 %v1135_v39, %v615_v9  ;;  %553 = vst.msk [vmem:[#allocation2 + $0x10] sm:$0xff] %vm19_vm2, %v504_v4  ;;  %v447_v11 = vpop.f32.mrf.mxu2  ;;  %v477_v12 = vpop.f32.mrf.mxu3  ;;  %v109_v2 = vld [vmem:[#allocation2 + $0x148] sm:$0xff] }
  0xa3   :  { %565 = vst.msk [vmem:[#allocation2 + $0x70] sm:$0xff] %vm19_vm2, %v516_v6  ;;  %v528_v14 = vadd.f32 %v447_v11, %v94_v7  ;;  %v540_v15 = vadd.f32 %v477_v12, %v106_v8  ;;  %v389_v16 = vpop.f32.mrf.mxu0  ;;  %v419_v18 = vpop.f32.mrf.mxu1 }
  0xa4   :  { %715 = vst.msk [vmem:[%s1426_s3 + $0x68] sm:$0xff] %vm19_vm2, %v667_v10  ;;  %v627_v19 = vld [vmem:[#allocation2 + $0xc8] sm:$0xff]  ;;  %v505_v22 = vadd.f32 %v389_v16, %v71_v13  ;;  %v517_v24 = vadd.f32 %v419_v18, %v83_v17  ;;  %v74_v10 = vld [vmem:[#allocation2 + $0x30] sm:$0xff] }
  0xa5   :  { %v679_v20 = vadd.f32 %v1135_v39, %v627_v19  ;;  %v639_v21 = vld [vmem:[#allocation2 + $0x128] sm:$0xff]  ;;  %577 = vst.msk [vmem:[#allocation2 + $0xd0] sm:$0xff] %vm19_vm2, %v528_v14  ;;  %v86_v19 = vld [vmem:[#allocation2 + $0x90] sm:$0xff] }
  0xa6   :  { %v691_v23 = vadd.f32 %v1135_v39, %v639_v21  ;;  %589 = vst.msk [vmem:[#allocation2 + $0x130] sm:$0xff] %vm19_vm2, %v540_v15 }
  0xa7   :  { %727 = vst.msk [vmem:[%s1426_s3 + $0xc8] sm:$0xff] %vm19_vm2, %v679_v20 }
  0xa8   :  { %739 = vst.msk [vmem:[%s1426_s3 + $0x128] sm:$0xff] %vm19_vm2, %v691_v23 }
  0xa9   :  { %v604_v26 = vld [vmem:[#allocation2 + $0x10] sm:$0xff]  ;;  %554 = vst.msk [vmem:[#allocation2 + $0x18] sm:$0xff] %vm19_vm2, %v505_v22 }
  0xaa   :  { %v656_v27 = vadd.f32 %v1135_v39, %v604_v26  ;;  %v616_v28 = vld [vmem:[#allocation2 + $0x70] sm:$0xff]  ;;  %566 = vst.msk [vmem:[#allocation2 + $0x78] sm:$0xff] %vm19_vm2, %v517_v24  ;;  %v449_v29 = vpop.f32.mrf.mxu2  ;;  %v479_v31 = vpop.f32.mrf.mxu3 }
  0xab   :  { %v668_v32 = vadd.f32 %v1135_v39, %v616_v28  ;;  %v529_v33 = vadd.f32 %v449_v29, %v95_v25  ;;  %v392_v35 = vpop.f32.mrf.mxu0  ;;  %v422_v36 = vpop.f32.mrf.mxu1  ;;  %v541_v41 = vadd.f32 %v479_v31, %v107_v30  ;;  %v98_v22 = vld [vmem:[#allocation2 + $0xf0] sm:$0xff]  ;;  %v75_v31 = vld [vmem:[#allocation2 + $0x38] sm:$0xff] }
  0xac   :  { %704 = vst.msk [vmem:[%s1426_s3 + $0x10] sm:$0xff] %vm19_vm2, %v656_v27  ;;  %v628_v37 = vld [vmem:[#allocation2 + $0xd0] sm:$0xff]  ;;  %v506_v43 = vadd.f32 %v392_v35, %v72_v34  ;;  %v518_v50 = vadd.f32 %v422_v36, %v84_v44  ;;  %v87_v35 = vld [vmem:[#allocation2 + $0x98] sm:$0xff] }
  0xad   :  { %716 = vst.msk [vmem:[%s1426_s3 + $0x70] sm:$0xff] %vm19_vm2, %v668_v32  ;;  %v680_v38 = vadd.f32 %v1135_v39, %v628_v37  ;;  %v640_v40 = vld [vmem:[#allocation2 + $0x130] sm:$0xff]  ;;  %v111_v44 = vld [vmem:[#allocation2 + $0x158] sm:$0xff] }
  0xae   :  { %v692_v42 = vadd.f32 %v1135_v39, %v640_v40  ;;  %578 = vst.msk [vmem:[#allocation2 + $0xd8] sm:$0xff] %vm19_vm2, %v529_v33  ;;  %v110_v28 = vld [vmem:[#allocation2 + $0x150] sm:$0xff] }
  0xaf   :  { %728 = vst.msk [vmem:[%s1426_s3 + $0xd0] sm:$0xff] %vm19_vm2, %v680_v38 }
  0xb0   :  { %740 = vst.msk [vmem:[%s1426_s3 + $0x130] sm:$0xff] %vm19_vm2, %v692_v42  ;;  %v605_v45 = vld [vmem:[#allocation2 + $0x18] sm:$0xff] }
  0xb1   :  { %v657_v48 = vadd.f32 %v1135_v39, %v605_v45  ;;  %v617_v49 = vld [vmem:[#allocation2 + $0x78] sm:$0xff]  ;;  %590 = vst.msk [vmem:[#allocation2 + $0x138] sm:$0xff] %vm19_vm2, %v541_v41 }
  0xb2   :  { %v669_v51 = vadd.f32 %v1135_v39, %v617_v49  ;;  %555 = vst.msk [vmem:[#allocation2 + $0x20] sm:$0xff] %vm19_vm2, %v506_v43  ;;  %v452_v52 = vpop.f32.mrf.mxu2  ;;  %v482_v53 = vpop.f32.mrf.mxu3  ;;  %v99_v43 = vld [vmem:[#allocation2 + $0xf8] sm:$0xff]  ;;  %v76_v49 = vld [vmem:[#allocation2 + $0x40] sm:$0xff] }
  0xb3   :  { %705 = vst.msk [vmem:[%s1426_s3 + $0x18] sm:$0xff] %vm19_vm2, %v657_v48  ;;  %v530_v55 = vadd.f32 %v452_v52, %v96_v46  ;;  %v542_v56 = vadd.f32 %v482_v53, %v108_v47  ;;  %v394_v57 = vpop.f32.mrf.mxu0  ;;  %v424_v59 = vpop.f32.mrf.mxu1  ;;  %v88_v53 = vld [vmem:[#allocation2 + $0xa0] sm:$0xff] }
  0xb4   :  { %717 = vst.msk [vmem:[%s1426_s3 + $0x78] sm:$0xff] %vm19_vm2, %v669_v51  ;;  %v507_v61 = vadd.f32 %v394_v57, %v73_v54  ;;  %v519_v63 = vadd.f32 %v424_v59, %v85_v58 }
  0xb5   :  { %v629_v60 = vld [vmem:[#allocation2 + $0xd8] sm:$0xff]  ;;  %567 = vst.msk [vmem:[#allocation2 + $0x80] sm:$0xff] %vm19_vm2, %v518_v50 }
  0xb6   :  { %v681_v62 = vadd.f32 %v1135_v39, %v629_v60  ;;  %579 = vst.msk [vmem:[#allocation2 + $0xe0] sm:$0xff] %vm19_vm2, %v530_v55 }
  0xb7   :  { %591 = vst.msk [vmem:[#allocation2 + $0x140] sm:$0xff] %vm19_vm2, %v542_v56 }
  0xb8   :  { %729 = vst.msk [vmem:[%s1426_s3 + $0xd8] sm:$0xff] %vm19_vm2, %v681_v62  ;;  %v641_v0 = vld [vmem:[#allocation2 + $0x138] sm:$0xff]  ;;  %v100_v62 = vld [vmem:[#allocation2 + $0x100] sm:$0xff] }
  0xb9   :  { %v693_v3 = vadd.f32 %v1135_v39, %v641_v0  ;;  %v606_v4 = vld [vmem:[#allocation2 + $0x20] sm:$0xff]  ;;  %556 = vst.msk [vmem:[#allocation2 + $0x28] sm:$0xff] %vm19_vm2, %v507_v61 }
  0xba   :  { %v658_v5 = vadd.f32 %v1135_v39, %v606_v4  ;;  %568 = vst.msk [vmem:[#allocation2 + $0x88] sm:$0xff] %vm19_vm2, %v519_v63  ;;  %v454_v6 = vpop.f32.mrf.mxu2  ;;  %v484_v7 = vpop.f32.mrf.mxu3  ;;  %v112_v4 = vld [vmem:[#allocation2 + $0x160] sm:$0xff] }
  0xbb   :  { %741 = vst.msk [vmem:[%s1426_s3 + $0x138] sm:$0xff] %vm19_vm2, %v693_v3  ;;  %v531_v8 = vadd.f32 %v454_v6, %v97_v1  ;;  %v543_v9 = vadd.f32 %v484_v7, %v109_v2  ;;  %v397_v11 = vpop.f32.mrf.mxu0  ;;  %v427_v12 = vpop.f32.mrf.mxu1 }
  0xbc   :  { %706 = vst.msk [vmem:[%s1426_s3 + $0x20] sm:$0xff] %vm19_vm2, %v658_v5  ;;  %v618_v13 = vld [vmem:[#allocation2 + $0x80] sm:$0xff]  ;;  %v508_v18 = vadd.f32 %v397_v11, %v74_v10  ;;  %v520_v25 = vadd.f32 %v427_v12, %v86_v19  ;;  %v101_v19 = vld [vmem:[#allocation2 + $0x108] sm:$0xff] }
  0xbd   :  { %v670_v14 = vadd.f32 %v1135_v39, %v618_v13  ;;  %v630_v15 = vld [vmem:[#allocation2 + $0xe0] sm:$0xff]  ;;  %580 = vst.msk [vmem:[#allocation2 + $0xe8] sm:$0xff] %vm19_vm2, %v531_v8  ;;  %v77_v8 = vld [vmem:[#allocation2 + $0x48] sm:$0xff] }
  0xbe   :  { %v682_v16 = vadd.f32 %v1135_v39, %v630_v15  ;;  %v642_v17 = vld [vmem:[#allocation2 + $0x140] sm:$0xff]  ;;  %592 = vst.msk [vmem:[#allocation2 + $0x148] sm:$0xff] %vm19_vm2, %v543_v9 }
  0xbf   :  { %718 = vst.msk [vmem:[%s1426_s3 + $0x80] sm:$0xff] %vm19_vm2, %v670_v14  ;;  %v694_v20 = vadd.f32 %v1135_v39, %v642_v17  ;;  %v89_v17 = vld [vmem:[#allocation2 + $0xa8] sm:$0xff] }
  0xc0   :  { %730 = vst.msk [vmem:[%s1426_s3 + $0xe0] sm:$0xff] %vm19_vm2, %v682_v16  ;;  %v607_v21 = vld [vmem:[#allocation2 + $0x28] sm:$0xff] }
  0xc1   :  { %742 = vst.msk [vmem:[%s1426_s3 + $0x140] sm:$0xff] %vm19_vm2, %v694_v20  ;;  %v659_v23 = vadd.f32 %v1135_v39, %v607_v21  ;;  %v619_v24 = vld [vmem:[#allocation2 + $0x88] sm:$0xff] }
  0xc2   :  { %v671_v26 = vadd.f32 %v1135_v39, %v619_v24  ;;  %557 = vst.msk [vmem:[#allocation2 + $0x30] sm:$0xff] %vm19_vm2, %v508_v18  ;;  %v457_v27 = vpop.f32.mrf.mxu2  ;;  %v487_v29 = vpop.f32.mrf.mxu3  ;;  %v113_v20 = vld [vmem:[#allocation2 + $0x168] sm:$0xff] }
  0xc3   :  { %707 = vst.msk [vmem:[%s1426_s3 + $0x28] sm:$0xff] %vm19_vm2, %v659_v23  ;;  %v532_v30 = vadd.f32 %v457_v27, %v98_v22  ;;  %v399_v32 = vpop.f32.mrf.mxu0  ;;  %v429_v33 = vpop.f32.mrf.mxu1  ;;  %v544_v38 = vadd.f32 %v487_v29, %v110_v28  ;;  %v78_v27 = vld [vmem:[#allocation2 + $0x50] sm:$0xff] }
  0xc4   :  { %719 = vst.msk [vmem:[%s1426_s3 + $0x88] sm:$0xff] %vm19_vm2, %v671_v26  ;;  %v631_v34 = vld [vmem:[#allocation2 + $0xe8] sm:$0xff]  ;;  %v509_v41 = vadd.f32 %v399_v32, %v75_v31  ;;  %v521_v42 = vadd.f32 %v429_v33, %v87_v35  ;;  %v90_v31 = vld [vmem:[#allocation2 + $0xb0] sm:$0xff] }
  0xc5   :  { %v683_v36 = vadd.f32 %v1135_v39, %v631_v34  ;;  %v643_v37 = vld [vmem:[#allocation2 + $0x148] sm:$0xff]  ;;  %569 = vst.msk [vmem:[#allocation2 + $0x90] sm:$0xff] %vm19_vm2, %v520_v25 }
  0xc6   :  { %v695_v40 = vadd.f32 %v1135_v39, %v643_v37  ;;  %581 = vst.msk [vmem:[#allocation2 + $0xf0] sm:$0xff] %vm19_vm2, %v532_v30 }
  0xc7   :  { %731 = vst.msk [vmem:[%s1426_s3 + $0xe8] sm:$0xff] %vm19_vm2, %v683_v36 }
  0xc8   :  { %743 = vst.msk [vmem:[%s1426_s3 + $0x148] sm:$0xff] %vm19_vm2, %v695_v40  ;;  %v114_v40 = vld [vmem:[#allocation2 + $0x170] sm:$0xff] }
  0xc9   :  { %v608_v45 = vld [vmem:[#allocation2 + $0x30] sm:$0xff]  ;;  %593 = vst.msk [vmem:[#allocation2 + $0x150] sm:$0xff] %vm19_vm2, %v544_v38 }
  0xca   :  { %v660_v46 = vadd.f32 %v1135_v39, %v608_v45  ;;  %558 = vst.msk [vmem:[#allocation2 + $0x38] sm:$0xff] %vm19_vm2, %v509_v41  ;;  %v459_v47 = vpop.f32.mrf.mxu2  ;;  %v489_v48 = vpop.f32.mrf.mxu3  ;;  %v102_v38 = vld [vmem:[#allocation2 + $0x110] sm:$0xff] }
  0xcb   :  { %570 = vst.msk [vmem:[#allocation2 + $0x98] sm:$0xff] %vm19_vm2, %v521_v42  ;;  %v533_v50 = vadd.f32 %v459_v47, %v99_v43  ;;  %v545_v51 = vadd.f32 %v489_v48, %v111_v44  ;;  %v402_v52 = vpop.f32.mrf.mxu0  ;;  %v432_v54 = vpop.f32.mrf.mxu1  ;;  %v79_v48 = vld [vmem:[#allocation2 + $0x58] sm:$0xff] }
  0xcc   :  { %708 = vst.msk [vmem:[%s1426_s3 + $0x30] sm:$0xff] %vm19_vm2, %v660_v46  ;;  %v620_v55 = vld [vmem:[#allocation2 + $0x90] sm:$0xff]  ;;  %v510_v58 = vadd.f32 %v402_v52, %v76_v49  ;;  %v522_v60 = vadd.f32 %v432_v54, %v88_v53 }
  0xcd   :  { %v672_v56 = vadd.f32 %v1135_v39, %v620_v55  ;;  %v632_v57 = vld [vmem:[#allocation2 + $0xf0] sm:$0xff]  ;;  %582 = vst.msk [vmem:[#allocation2 + $0xf8] sm:$0xff] %vm19_vm2, %v533_v50 }
  0xce   :  { %v684_v59 = vadd.f32 %v1135_v39, %v632_v57  ;;  %594 = vst.msk [vmem:[#allocation2 + $0x158] sm:$0xff] %vm19_vm2, %v545_v51 }
  0xcf   :  { %720 = vst.msk [vmem:[%s1426_s3 + $0x90] sm:$0xff] %vm19_vm2, %v672_v56  ;;  %v91_v56 = vld [vmem:[#allocation2 + $0xb8] sm:$0xff] }
  0xd0   :  { %732 = vst.msk [vmem:[%s1426_s3 + $0xf0] sm:$0xff] %vm19_vm2, %v684_v59  ;;  %v644_v61 = vld [vmem:[#allocation2 + $0x150] sm:$0xff] }
  0xd1   :  { %v696_v63 = vadd.f32 %v1135_v39, %v644_v61  ;;  %v609_v0 = vld [vmem:[#allocation2 + $0x38] sm:$0xff]  ;;  %559 = vst.msk [vmem:[#allocation2 + $0x40] sm:$0xff] %vm19_vm2, %v510_v58 }
  0xd2   :  { %v661_v1 = vadd.f32 %v1135_v39, %v609_v0  ;;  %v621_v2 = vld [vmem:[#allocation2 + $0x98] sm:$0xff]  ;;  %571 = vst.msk [vmem:[#allocation2 + $0xa0] sm:$0xff] %vm19_vm2, %v522_v60  ;;  %v462_v3 = vpop.f32.mrf.mxu2  ;;  %v492_v5 = vpop.f32.mrf.mxu3 }
  0xd3   :  { %744 = vst.msk [vmem:[%s1426_s3 + $0x150] sm:$0xff] %vm19_vm2, %v696_v63  ;;  %v673_v6 = vadd.f32 %v1135_v39, %v621_v2  ;;  %v534_v7 = vadd.f32 %v462_v3, %v100_v62  ;;  %v404_v9 = vpop.f32.mrf.mxu0  ;;  %v434_v10 = vpop.f32.mrf.mxu1  ;;  %v546_v14 = vadd.f32 %v492_v5, %v112_v4  ;;  %v103_v60 = vld [vmem:[#allocation2 + $0x118] sm:$0xff] }
  0xd4   :  { %709 = vst.msk [vmem:[%s1426_s3 + $0x38] sm:$0xff] %vm19_vm2, %v661_v1  ;;  %v633_v11 = vld [vmem:[#allocation2 + $0xf8] sm:$0xff]  ;;  %v511_v16 = vadd.f32 %v404_v9, %v77_v8  ;;  %v523_v23 = vadd.f32 %v434_v10, %v89_v17 }
  0xd5   :  { %721 = vst.msk [vmem:[%s1426_s3 + $0x98] sm:$0xff] %vm19_vm2, %v673_v6  ;;  %v685_v12 = vadd.f32 %v1135_v39, %v633_v11  ;;  %v645_v13 = vld [vmem:[#allocation2 + $0x158] sm:$0xff] }
  0xd6   :  { %v697_v15 = vadd.f32 %v1135_v39, %v645_v13  ;;  %583 = vst.msk [vmem:[#allocation2 + $0x100] sm:$0xff] %vm19_vm2, %v534_v7  ;;  %v115_v2 = vld [vmem:[#allocation2 + $0x178] sm:$0xff] }
  0xd7   :  { %733 = vst.msk [vmem:[%s1426_s3 + $0xf8] sm:$0xff] %vm19_vm2, %v685_v12 }
  0xd8   :  { %745 = vst.msk [vmem:[%s1426_s3 + $0x158] sm:$0xff] %vm19_vm2, %v697_v15  ;;  %v610_v18 = vld [vmem:[#allocation2 + $0x40] sm:$0xff] }
  0xd9   :  { %v662_v21 = vadd.f32 %v1135_v39, %v610_v18  ;;  %v622_v22 = vld [vmem:[#allocation2 + $0xa0] sm:$0xff]  ;;  %595 = vst.msk [vmem:[#allocation2 + $0x160] sm:$0xff] %vm19_vm2, %v546_v14 }
  0xda   :  { %v674_v24 = vadd.f32 %v1135_v39, %v622_v22  ;;  %560 = vst.msk [vmem:[#allocation2 + $0x48] sm:$0xff] %vm19_vm2, %v511_v16  ;;  %v464_v25 = vpop.f32.mrf.mxu2  ;;  %v494_v26 = vpop.f32.mrf.mxu3 }
  0xdb   :  { %710 = vst.msk [vmem:[%s1426_s3 + $0x40] sm:$0xff] %vm19_vm2, %v662_v21  ;;  %v535_v28 = vadd.f32 %v464_v25, %v101_v19  ;;  %v547_v29 = vadd.f32 %v494_v26, %v113_v20  ;;  %v407_v30 = vpop.f32.mrf.mxu0  ;;  %v437_v32 = vpop.f32.mrf.mxu1 }
  0xdc   :  { %722 = vst.msk [vmem:[%s1426_s3 + $0xa0] sm:$0xff] %vm19_vm2, %v674_v24  ;;  %v512_v34 = vadd.f32 %v407_v30, %v78_v27  ;;  %v524_v36 = vadd.f32 %v437_v32, %v90_v31 }
  0xdd   :  { %v634_v33 = vld [vmem:[#allocation2 + $0x100] sm:$0xff]  ;;  %572 = vst.msk [vmem:[#allocation2 + $0xa8] sm:$0xff] %vm19_vm2, %v523_v23 }
  0xde   :  { %v686_v35 = vadd.f32 %v1135_v39, %v634_v33  ;;  %584 = vst.msk [vmem:[#allocation2 + $0x108] sm:$0xff] %vm19_vm2, %v535_v28 }
  0xdf   :  { %596 = vst.msk [vmem:[#allocation2 + $0x168] sm:$0xff] %vm19_vm2, %v547_v29 }
  0xe0   :  { %734 = vst.msk [vmem:[%s1426_s3 + $0x100] sm:$0xff] %vm19_vm2, %v686_v35  ;;  %v646_v37 = vld [vmem:[#allocation2 + $0x160] sm:$0xff] }
  0xe1   :  { %v698_v41 = vadd.f32 %v1135_v39, %v646_v37  ;;  %v611_v42 = vld [vmem:[#allocation2 + $0x48] sm:$0xff]  ;;  %561 = vst.msk [vmem:[#allocation2 + $0x50] sm:$0xff] %vm19_vm2, %v512_v34 }
  0xe2   :  { %v663_v43 = vadd.f32 %v1135_v39, %v611_v42  ;;  %573 = vst.msk [vmem:[#allocation2 + $0xb0] sm:$0xff] %vm19_vm2, %v524_v36  ;;  %v467_v44 = vpop.f32.mrf.mxu2  ;;  %v497_v45 = vpop.f32.mrf.mxu3 }
  0xe3   :  { %746 = vst.msk [vmem:[%s1426_s3 + $0x160] sm:$0xff] %vm19_vm2, %v698_v41  ;;  %v536_v46 = vadd.f32 %v467_v44, %v102_v38  ;;  %v548_v47 = vadd.f32 %v497_v45, %v114_v40  ;;  %v409_v49 = vpop.f32.mrf.mxu0  ;;  %v439_v57 = vpop.f32.mrf.mxu1 }
  0xe4   :  { %711 = vst.msk [vmem:[%s1426_s3 + $0x48] sm:$0xff] %vm19_vm2, %v663_v43  ;;  %v623_v50 = vld [vmem:[#allocation2 + $0xa8] sm:$0xff]  ;;  %v513_v55 = vadd.f32 %v409_v49, %v79_v48  ;;  %v525_v63 = vadd.f32 %v439_v57, %v91_v56 }
  0xe5   :  { %v675_v51 = vadd.f32 %v1135_v39, %v623_v50  ;;  %v635_v52 = vld [vmem:[#allocation2 + $0x108] sm:$0xff]  ;;  %585 = vst.msk [vmem:[#allocation2 + $0x110] sm:$0xff] %vm19_vm2, %v536_v46 }
  0xe6   :  { %v687_v53 = vadd.f32 %v1135_v39, %v635_v52  ;;  %v647_v54 = vld [vmem:[#allocation2 + $0x168] sm:$0xff]  ;;  %597 = vst.msk [vmem:[#allocation2 + $0x170] sm:$0xff] %vm19_vm2, %v548_v47 }
  0xe7   :  { %723 = vst.msk [vmem:[%s1426_s3 + $0xa8] sm:$0xff] %vm19_vm2, %v675_v51  ;;  %v699_v58 = vadd.f32 %v1135_v39, %v647_v54 }
  0xe8   :  { %735 = vst.msk [vmem:[%s1426_s3 + $0x108] sm:$0xff] %vm19_vm2, %v687_v53  ;;  %v612_v59 = vld [vmem:[#allocation2 + $0x50] sm:$0xff] }
  0xe9   :  { %747 = vst.msk [vmem:[%s1426_s3 + $0x168] sm:$0xff] %vm19_vm2, %v699_v58  ;;  %v664_v61 = vadd.f32 %v1135_v39, %v612_v59  ;;  %v624_v62 = vld [vmem:[#allocation2 + $0xb0] sm:$0xff] }
  0xea   :  { %v676_v0 = vadd.f32 %v1135_v39, %v624_v62  ;;  %562 = vst.msk [vmem:[#allocation2 + $0x58] sm:$0xff] %vm19_vm2, %v513_v55  ;;  %v469_v1 = vpop.f32.mrf.mxu2  ;;  %v499_v3 = vpop.f32.mrf.mxu3 }
  0xeb   :  { %712 = vst.msk [vmem:[%s1426_s3 + $0x50] sm:$0xff] %vm19_vm2, %v664_v61  ;;  %v537_v4 = vadd.f32 %v469_v1, %v103_v60  ;;  %v549_v8 = vadd.f32 %v499_v3, %v115_v2 }
  0xec   :  { %724 = vst.msk [vmem:[%s1426_s3 + $0xb0] sm:$0xff] %vm19_vm2, %v676_v0  ;;  %v636_v5 = vld [vmem:[#allocation2 + $0x110] sm:$0xff] }
  0xed   :  { %v688_v6 = vadd.f32 %v1135_v39, %v636_v5  ;;  %v648_v7 = vld [vmem:[#allocation2 + $0x170] sm:$0xff]  ;;  %574 = vst.msk [vmem:[#allocation2 + $0xb8] sm:$0xff] %vm19_vm2, %v525_v63 }
  0xee   :  { %v700_v9 = vadd.f32 %v1135_v39, %v648_v7  ;;  %586 = vst.msk [vmem:[#allocation2 + $0x118] sm:$0xff] %vm19_vm2, %v537_v4 }
  0xef   :  { %736 = vst.msk [vmem:[%s1426_s3 + $0x110] sm:$0xff] %vm19_vm2, %v688_v6 }
  0xf0   :  { %748 = vst.msk [vmem:[%s1426_s3 + $0x170] sm:$0xff] %vm19_vm2, %v700_v9 }
  0xf1   :  { %v613_v10 = vld [vmem:[#allocation2 + $0x58] sm:$0xff]  ;;  %598 = vst.msk [vmem:[#allocation2 + $0x178] sm:$0xff] %vm19_vm2, %v549_v8 }
  0xf2   :  { %v665_v11 = vadd.f32 %v1135_v39, %v613_v10 }
  0xf4   :  { %713 = vst.msk [vmem:[%s1426_s3 + $0x58] sm:$0xff] %vm19_vm2, %v665_v11  ;;  %v625_v12 = vld [vmem:[#allocation2 + $0xb8] sm:$0xff] }
  0xf5   :  { %v677_v13 = vadd.f32 %v1135_v39, %v625_v12  ;;  %v637_v14 = vld [vmem:[#allocation2 + $0x118] sm:$0xff] }
  0xf6   :  { %v689_v15 = vadd.f32 %v1135_v39, %v637_v14 }
  0xf7   :  { %725 = vst.msk [vmem:[%s1426_s3 + $0xb8] sm:$0xff] %vm19_vm2, %v677_v13 }
  0xf8   :  { %737 = vst.msk [vmem:[%s1426_s3 + $0x118] sm:$0xff] %vm19_vm2, %v689_v15  ;;  %v649_v16 = vld [vmem:[#allocation2 + $0x178] sm:$0xff] }
  0xf9   :  { %v701_v17 = vadd.f32 %v1135_v39, %v649_v16 }
  0xfb   :  { %749 = vst.msk [vmem:[%s1426_s3 + $0x178] sm:$0xff] %vm19_vm2, %v701_v17 }

// kernel: forward.22
= control target key start
LH: loop header
LB: loop body
LE: loop exit
PB: predicated region body
PF: predicated region fallthrough
CT: control target
= control target key end

     0   :  { %vm19_vm0 = vcmask 261120   ;;  %v198_v1 = vmov 0.0   ;;  %vm90_vm1 = vcmask 785408   ;;  %s270_s1 = inlined_call_operand.vmem [shape: bf16[96,32], index: 1, kind: input, shape index: {}]   ;;  %s271_s2 = inlined_call_operand.vmem [shape: f32[1,32], index: 2, kind: input, shape index: {}]   ;;  %s272_s0 = inlined_call_operand.vmem [shape: bf16[32,96], index: 0, kind: input, shape index: {}]   ;;  %s273_s3 = inlined_call_operand.vmem [shape: f32[32,32], index: 3, kind: output, shape index: {}]  }
   0x1   :  { %v189_v0 = vld [vmem:[%s270_s1 + $0x28] sm:$0xff]  ;;  %20 = vst.msk [vmem:[#allocation2] sm:$0xff] %vm19_vm0, %v198_v1  ;;  %v188_v2 = vld [vmem:[%s270_s1 + $0x20] sm:$0xff]  ;;  %v187_v3 = vld [vmem:[%s270_s1 + $0x18] sm:$0xff] }
   0x2   :  { %21 = vst.msk [vmem:[#allocation2 + $0x8] sm:$0xff] %vm19_vm0, %v198_v1  ;;  %99 = vmatpush.bf16.msra.mxu0 %v189_v0  ;;  %190 = vmatpush.bf16.msra.mxu1 %v189_v0  ;;  %v186_v4 = vld [vmem:[%s270_s1 + $0x10] sm:$0xff]  ;;  %v185_v5 = vld [vmem:[%s270_s1 + $0x8] sm:$0xff]  ;;  %v184_v6 = vld [vmem:[%s270_s1] sm:$0xff] }
   0x3   :  { %22 = vst.msk [vmem:[#allocation2 + $0x10] sm:$0xff] %vm19_vm0, %v198_v1  ;;  %v182_v7 = vld [vmem:[%s272_s0] sm:$0xff]  ;;  %v183_v8 = vld [vmem:[%s272_s0 + $0x8] sm:$0xff] }
   0x4   :  { %23 = vst.msk [vmem:[#allocation2 + $0x18] sm:$0xff] %vm19_vm0, %v198_v1  ;;  %v197_v17 = vld [vmem:[%s271_s2] ss:$0 sm:$0xff] }
   0x6   :  { %100 = vmatpush.bf16.msra.mxu0 %v188_v2  ;;  %191 = vmatpush.bf16.msra.mxu1 %v188_v2 }
   0x8   :  { %v24_v9 = vld [vmem:[#allocation2] sm:$0xff] }
   0x9   :  { %v25_v15 = vld [vmem:[#allocation2 + $0x8] sm:$0xff] }
   0xa   :  { %101 = vmatpush.bf16.msra.mxu0 %v187_v3  ;;  %192 = vmatpush.bf16.msra.mxu1 %v187_v3  ;;  %v26_v10 = vld [vmem:[#allocation2 + $0x10] sm:$0xff] }
   0xb   :  { %v27_v16 = vld [vmem:[#allocation2 + $0x18] sm:$0xff] }
   0xe   :  { %102 = vmatpush.bf16.msra.mxu0 %v186_v4  ;;  %193 = vmatpush.bf16.msra.mxu1 %v186_v4 }
  0x12   :  { %103 = vmatpush.bf16.msra.mxu0 %v185_v5  ;;  %194 = vmatpush.bf16.msra.mxu1 %v185_v5 }
  0x16   :  { %104 = vmatpush.bf16.msra.mxu0 %v184_v6  ;;  %195 = vmatpush.bf16.msra.mxu1 %v184_v6 }
  0x19   :  { %180 = vmatmul.msk.bf16.vlgmr.msra.gmra.mxu0 %vm90_vm1, %v182_v7  ;;  %181 = vmatmul.msk.bf16.vlgmr.msra.gmra.mxu1 %vm90_vm1, %v183_v8 }
  0x96   :  { %v106_v11 = vpop.f32.mrf.mxu0  ;;  %v111_v12 = vpop.f32.mrf.mxu1 }
  0x97   :  { %v116_v13 = vadd.f32 %v106_v11, %v24_v9  ;;  %v118_v14 = vadd.f32 %v111_v12, %v26_v10 }
  0x99   :  { %121 = vst.msk [vmem:[#allocation2] sm:$0xff] %vm19_vm0, %v116_v13 }
  0x9a   :  { %123 = vst.msk [vmem:[#allocation2 + $0x10] sm:$0xff] %vm19_vm0, %v118_v14 }
  0x9e   :  { %v108_v18 = vpop.f32.mrf.mxu0  ;;  %v113_v19 = vpop.f32.mrf.mxu1 }
  0x9f   :  { %v117_v20 = vadd.f32 %v108_v18, %v25_v15  ;;  %v119_v21 = vadd.f32 %v113_v19, %v27_v16 }
  0xa0   :  { %v128_v22 = vld [vmem:[#allocation2] sm:$0xff] }
  0xa1   :  { %v136_v23 = vadd.f32 %v197_v17, %v128_v22  ;;  %v130_v24 = vld [vmem:[#allocation2 + $0x10] sm:$0xff]  ;;  %122 = vst.msk [vmem:[#allocation2 + $0x8] sm:$0xff] %vm19_vm0, %v117_v20 }
  0xa2   :  { %v138_v25 = vadd.f32 %v197_v17, %v130_v24  ;;  %124 = vst.msk [vmem:[#allocation2 + $0x18] sm:$0xff] %vm19_vm0, %v119_v21 }
  0xa3   :  { %140 = vst.msk [vmem:[%s273_s3] sm:$0xff] %vm19_vm0, %v136_v23 }
  0xa4   :  { %142 = vst.msk [vmem:[%s273_s3 + $0x10] sm:$0xff] %vm19_vm0, %v138_v25 }
  0xa8   :  { %v129_v26 = vld [vmem:[#allocation2 + $0x8] sm:$0xff] }
  0xa9   :  { %v137_v27 = vadd.f32 %v197_v17, %v129_v26  ;;  %v131_v28 = vld [vmem:[#allocation2 + $0x18] sm:$0xff] }
  0xaa   :  { %v139_v29 = vadd.f32 %v197_v17, %v131_v28 }
  0xab   :  { %141 = vst.msk [vmem:[%s273_s3 + $0x8] sm:$0xff] %vm19_vm0, %v137_v27 }
  0xac   :  { %143 = vst.msk [vmem:[%s273_s3 + $0x18] sm:$0xff] %vm19_vm0, %v139_v29 }

// kernel: forward.23
= control target key start
LH: loop header
LB: loop body
LE: loop exit
PB: predicated region body
PF: predicated region fallthrough
CT: control target
= control target key end

     0   :  { %vm71_vm0 = vcmask 261120   ;;  %vm17_vm1 = vcmask 523264   ;;  %v195_v14 = vmov 0.0   ;;  %s277_s1 = inlined_call_operand.vmem [shape: bf16[32,192], index: 1, kind: input, shape index: {}]   ;;  %s278_s0 = inlined_call_operand.vmem [shape: bf16[32,32], index: 0, kind: input, shape index: {}]   ;;  %s279_s2 = inlined_call_operand.vmem [shape: f32[32,192], index: 2, kind: output, shape index: {}]  }
   0x1   :  { %v174_v0 = vld [vmem:[%s277_s1 + $0x10] sm:$0xf]  ;;  %v189_v1 = vld [vmem:[%s277_s1 + $0x14] sm:$0xf0]  ;;  %v188_v2 = vld [vmem:[%s277_s1 + $0x14] sm:$0xf] }
   0x2   :  { %v175_v3 = vor.u32 %v189_v1, %v174_v0  ;;  %v176_v4 = vld [vmem:[%s277_s1 + $0x18] sm:$0xf0]  ;;  %v166_v5 = vld [vmem:[%s277_s1] sm:$0xf]  ;;  %v187_v6 = vld [vmem:[%s277_s1 + $0x4] sm:$0xf0] }
   0x3   :  { %v179_v7 = vor.u32 %v188_v2, %v176_v4  ;;  %v186_v8 = vld [vmem:[%s277_s1 + $0x4] sm:$0xf]  ;;  %v168_v9 = vld [vmem:[%s277_s1 + $0x8] sm:$0xf0]  ;;  %v167_v10 = vor.u32 %v187_v6, %v166_v5  ;;  %18 = vst.msk [vmem:[#allocation2 + $0x8] sm:$0xff] %vm17_vm1, %v195_v14 }
   0x4   :  { %84 = vmatpush.bf16.msra.mxu0 %v175_v3  ;;  %190 = vmatpush.bf16.msra.mxu2 %v175_v3  ;;  %v171_v11 = vor.u32 %v186_v8, %v168_v9  ;;  %v185_v12 = vld [vmem:[%s278_s0 + $0x8] sm:$0xff]  ;;  %v184_v13 = vld [vmem:[%s278_s0] sm:$0xff]  ;;  %20 = vst.msk [vmem:[#allocation2 + $0x18] sm:$0xff] %vm17_vm1, %v195_v14 }
   0x5   :  { %103 = vmatpush.bf16.msra.mxu1 %v179_v7  ;;  %192 = vmatpush.bf16.msra.mxu3 %v179_v7  ;;  %22 = vst.msk [vmem:[#allocation2 + $0x28] sm:$0xff] %vm17_vm1, %v195_v14 }
   0x6   :  { %24 = vst.msk [vmem:[#allocation2 + $0x38] sm:$0xff] %vm17_vm1, %v195_v14 }
   0x8   :  { %85 = vmatpush.bf16.msra.mxu0 %v167_v10  ;;  %191 = vmatpush.bf16.msra.mxu2 %v167_v10 }
   0x9   :  { %104 = vmatpush.bf16.msra.mxu1 %v171_v11  ;;  %193 = vmatpush.bf16.msra.mxu3 %v171_v11 }
   0xa   :  { %v26_v15 = vld [vmem:[#allocation2 + $0x8] sm:$0xff] }
   0xb   :  { %180 = vmatmul.msk.bf16.vlgmr.msra.gmra.mxu0 %vm71_vm0, %v184_v13  ;;  %181 = vmatmul.msk.bf16.vlgmr.msra.gmra.mxu2 %vm71_vm0, %v185_v12  ;;  %v28_v24 = vld [vmem:[#allocation2 + $0x18] sm:$0xff] }
   0xc   :  { %182 = vmatmul.msk.bf16.vlgmr.msra.gmra.mxu1 %vm71_vm0, %v184_v13  ;;  %183 = vmatmul.msk.bf16.vlgmr.msra.gmra.mxu3 %vm71_vm0, %v185_v12  ;;  %v30_v19 = vld [vmem:[#allocation2 + $0x28] sm:$0xff] }
   0xd   :  { %v32_v28 = vld [vmem:[#allocation2 + $0x38] sm:$0xff] }
  0x88   :  { %v87_v16 = vpop.f32.mrf.mxu0 }
  0x89   :  { %v106_v17 = vpop.f32.mrf.mxu1  ;;  %144 = vst [vmem:[%s279_s2] sm:$0xff] %v87_v16 }
  0x8a   :  { %v117_v18 = vadd.f32 %v106_v17, %v26_v15 }
  0x8c   :  { %126 = vst.msk [vmem:[#allocation2 + $0x8] sm:$0xff] %vm17_vm1, %v117_v18 }
  0x8e   :  { %v92_v20 = vpop.f32.mrf.mxu2 }
  0x8f   :  { %v111_v21 = vpop.f32.mrf.mxu3  ;;  %148 = vst [vmem:[%s279_s2 + $0x20] sm:$0xff] %v92_v20 }
  0x90   :  { %v121_v22 = vadd.f32 %v111_v21, %v30_v19  ;;  %v89_v23 = vpop.f32.mrf.mxu0 }
  0x91   :  { %v108_v25 = vpop.f32.mrf.mxu1  ;;  %146 = vst [vmem:[%s279_s2 + $0x10] sm:$0xff] %v89_v23 }
  0x92   :  { %130 = vst.msk [vmem:[#allocation2 + $0x28] sm:$0xff] %vm17_vm1, %v121_v22  ;;  %v119_v26 = vadd.f32 %v108_v25, %v28_v24 }
  0x93   :  { %v137_v27 = vld [vmem:[#allocation2 + $0x8] sm:$0xff] }
  0x94   :  { %145 = vst.msk [vmem:[%s279_s2 + $0x8] sm:$0xff] %vm17_vm1, %v137_v27 }
  0x95   :  { %128 = vst.msk [vmem:[#allocation2 + $0x18] sm:$0xff] %vm17_vm1, %v119_v26 }
  0x96   :  { %v94_v29 = vpop.f32.mrf.mxu2 }
  0x97   :  { %v113_v30 = vpop.f32.mrf.mxu3  ;;  %150 = vst [vmem:[%s279_s2 + $0x30] sm:$0xff] %v94_v29 }
  0x98   :  { %v123_v31 = vadd.f32 %v113_v30, %v32_v28 }
  0x99   :  { %v141_v32 = vld [vmem:[#allocation2 + $0x28] sm:$0xff] }
  0x9a   :  { %149 = vst.msk [vmem:[%s279_s2 + $0x28] sm:$0xff] %vm17_vm1, %v141_v32 }
  0x9b   :  { %132 = vst.msk [vmem:[#allocation2 + $0x38] sm:$0xff] %vm17_vm1, %v123_v31 }
  0x9c   :  { %v139_v33 = vld [vmem:[#allocation2 + $0x18] sm:$0xff] }
  0x9d   :  { %147 = vst.msk [vmem:[%s279_s2 + $0x18] sm:$0xff] %vm17_vm1, %v139_v33 }
  0xa2   :  { %v143_v34 = vld [vmem:[#allocation2 + $0x38] sm:$0xff] }
  0xa3   :  { %151 = vst.msk [vmem:[%s279_s2 + $0x38] sm:$0xff] %vm17_vm1, %v143_v34 }

// kernel: forward.24
= control target key start
LH: loop header
LB: loop body
LE: loop exit
PB: predicated region body
PF: predicated region fallthrough
CT: control target
= control target key end

     0   :  { %s459_s12 = smov 0   ;;  %s500_s0 = inlined_call_operand.vmem [shape: bf16[4,16,32], index: 0, kind: input, shape index: {}]   ;;  %s501_s1 = inlined_call_operand.vmem [shape: bf16[4,16,32], index: 1, kind: input, shape index: {}]   ;;  %s502_s2 = inlined_call_operand.vmem [shape: bf16[4,16,32], index: 2, kind: input, shape index: {}]   ;;  %s503_s3 = inlined_call_operand.vmem [shape: f32[4,16,32], index: 3, kind: output, shape index: {}]  }
   0x1 LB: > { %s379_s13 = sadd.s32 4294967295, %s437_s12   ;;  %p383_p0 = scmp.ge.s32.totalorder %s437_s12, 1  ;;  %s437_s12 = sphi %s459_s12, %s13_s12  }
   0x2   : > { %p157_p1 = scmp.lt.s32.totalorder %s437_s12, 5 }
   0x4   : > { %p158_p2 = pnand %p383_p0, %p157_p1 }
   0x5   : > { %p191_p3 = scmp.lt.s32.totalorder (!%p158_p2), %s379_s13, 3 }
   0x6   : > { %161 = sbr.rel (%p158_p2) target bundleno = 550 (0x226), region = 32 }
   0xb   : > { %s505_s13 = smov (!%p191_p3, %s379_s13), 3  ;;  %vm228_vm0 = vcmask 261120   ;;  %vm251_vm1 = vcmask 130048  }
   0xc   : > { %s470_s14 = sshll.u32 %s505_s13, 3  ;;  %s411_s24 = sshll.u32 %s505_s13, 4 }
   0xd   : > { %s200_s17 = scalar_lea.vmem %s501_s1, %s470_s14  ;;  %s195_s20 = scalar_lea.vmem %s500_s0, %s470_s14 }
   0xe   : > { %v413_v0 = vld [vmem:[%s200_s17] sm:$0xff]  ;;  %s205_s23 = scalar_lea.vmem %s502_s2, %s470_s14  ;;  %s210_s27 = scalar_lea.vmem %s503_s3, %s411_s24 }
   0xf   : > { %v233_v1 = vsel %vm228_vm0, %v413_v0, 0  ;;  %v412_v2 = vld [vmem:[%s195_s20] sm:$0xff] }
  0x10   : > { %242 = vmatpush.bf16.xpose.msra.mxu0 %v233_v1  ;;  %v414_v19 = vld [vmem:[%s205_s23] sm:$0xff] }
  0x11   : > { %291 = vmatpush.bf16.msra.mxu1 %v414_v19 }
  0x17   : > { %400 = vmatmul.msk.bf16.vlgmr.msra.gmra.mxu0 %vm228_vm0, %v412_v2 }
  0x94   : > { %v244_v3 = vpop.f32.mrf.mxu0 }
  0x95   : > { %v249_v4 = vmul.f32 0.17677669, %v244_v3 }
  0x97   : > { %v252_v5 = vsel %vm251_vm1, %v249_v4, -inf }
  0x98   : > { %253 = vmax.xlane.f32.xlu0 %v252_v5 }
  0x9c   : > { %v246_v6 = vpop.f32.mrf.mxu0 }
  0x9d   : > { %v250_v7 = vmul.f32 0.17677669, %v246_v6 }
  0x9f   : > { %v255_v8 = vsel %vm251_vm1, %v250_v7, -inf }
  0xa0   : > { %256 = vmax.xlane.f32.xlu0 %v255_v8 }
 0x10b   : > { %v254_v9 = vpop.xlane.xlu0 %253 }
 0x10c   : > { %v258_v10 = vsub.f32 %v249_v4, %v254_v9 }
 0x10e   : > { %v260_v11 = vmul.f32 1.442695, %v258_v10 }
 0x110   : > { %423 = vpow2.f32 %v260_v11 }
 0x113   : > { %v257_v12 = vpop.xlane.xlu0 %256 }
 0x114   : > { %v259_v13 = vsub.f32 %v250_v7, %v257_v12 }
 0x116   : > { %v424_v14 = vpop.eup %423  ;;  %v262_v15 = vmul.f32 1.442695, %v259_v13 }
 0x117   : > { %v264_v16 = vsel %vm251_vm1, %v424_v14, 0.0 }
 0x118   : > { %425 = vpow2.f32 %v262_v15  ;;  %265 = vadd.xlane.f32.xlu1 %v264_v16 }
 0x11e   : > { %v426_v17 = vpop.eup %425 }
 0x11f   : > { %v267_v18 = vsel %vm251_vm1, %v426_v17, 0.0 }
 0x120   : > { %268 = vadd.xlane.f32.xlu1 %v267_v18 }
 0x18b   : > { %v266_v20 = vpop.xlane.xlu1 %265 }
 0x18c   : > { %427 = vrcp.f32 %v266_v20 }
 0x192   : > { %v428_v22 = vpop.eup %427 }
 0x193   : > { %v269_v21 = vpop.xlane.xlu1 %268  ;;  %v272_v24 = vmul.f32 %v428_v22, %v424_v14 }
 0x194   : > { %429 = vrcp.f32 %v269_v21 }
 0x19a   : > { %v430_v23 = vpop.eup %429 }
 0x19b   : > { %v273_v25 = vmul.f32 %v430_v23, %v426_v17 }
 0x19d   : > { %v274_v26 = vpack.c.bf16 %v273_v25, %v272_v24 }
 0x19f   : > { %405 = vmatmul.msk.bf16.vlgmr.msra.gmra.mxu1 %vm251_vm1, %v274_v26 }
 0x21c   : > { %v293_v27 = vpop.f32.mrf.mxu1 }
 0x21d   : > { %298 = vst.msk [vmem:[%s210_s27] sm:$0xff] %vm228_vm0, %v293_v27 }
 0x224   : > { %v295_v28 = vpop.f32.mrf.mxu1 }
 0x225   : > { %299 = vst.msk [vmem:[%s210_s27 + $0x8] sm:$0xff] %vm228_vm0, %v295_v28 }
 0x226 PF: > { %s13_s12 = sadd.s32 1, %s437_s12  }
 0x227   : > { %p10_p4 = scmp.ge.s32.totalorder %s13_s12, 6  }
 0x229   :  { %12 = sbr.rel (!%p10_p4) target bundleno = 1 (0x1), region = 68 }

// kernel: forward.26
= control target key start
LH: loop header
LB: loop body
LE: loop exit
PB: predicated region body
PF: predicated region fallthrough
CT: control target
= control target key end

     0   :  { %vm57_vm0 = vcmask 261120   ;;  %s199_s1 = inlined_call_operand.vmem [shape: bf16[32,128], index: 1, kind: input, shape index: {}]   ;;  %s200_s2 = inlined_call_operand.vmem [shape: f32[1,128], index: 2, kind: input, shape index: {}]   ;;  %s201_s0 = inlined_call_operand.vmem [shape: bf16[32,32], index: 0, kind: input, shape index: {}]   ;;  %s202_s3 = inlined_call_operand.vmem [shape: bf16[32,128], index: 3, kind: output, shape index: {}]  }
   0x1   :  { %v143_v0 = vld [vmem:[%s199_s1 + $0x8] sm:$0xff]  ;;  %v142_v1 = vld [vmem:[%s199_s1] sm:$0xff] }
   0x2   :  { %70 = vmatpush.bf16.msra.mxu0 %v143_v0  ;;  %155 = vmatpush.bf16.msra.mxu1 %v143_v0  ;;  %v140_v2 = vld [vmem:[%s201_s0] sm:$0xff]  ;;  %v141_v3 = vld [vmem:[%s201_s0 + $0x8] sm:$0xff] }
   0x3   :  { %v157_v6 = vld [vmem:[%s200_s2] ss:$0 sm:$0xff] }
   0x6   :  { %71 = vmatpush.bf16.msra.mxu0 %v142_v1  ;;  %156 = vmatpush.bf16.msra.mxu1 %v142_v1 }
   0x9   :  { %138 = vmatmul.msk.bf16.vlgmr.msra.gmra.mxu0 %vm57_vm0, %v140_v2  ;;  %139 = vmatmul.msk.bf16.vlgmr.msra.gmra.mxu1 %vm57_vm0, %v141_v3 }
  0x86   :  { %v73_v4 = vpop.f32.mrf.mxu0  ;;  %v78_v5 = vpop.f32.mrf.mxu1 }
  0x87   :  { %v102_v7 = vadd.f32 %v157_v6, %v73_v4  ;;  %v104_v8 = vadd.f32 %v157_v6, %v78_v5 }
  0x89   :  { %v106_v13 = vmax.f32 %v102_v7, 0.0  ;;  %v108_v14 = vmax.f32 %v104_v8, 0.0 }
  0x8e   :  { %v75_v9 = vpop.f32.mrf.mxu0  ;;  %v80_v10 = vpop.f32.mrf.mxu1 }
  0x8f   :  { %v103_v11 = vadd.f32 %v157_v6, %v75_v9  ;;  %v105_v12 = vadd.f32 %v157_v6, %v80_v10 }
  0x91   :  { %v107_v15 = vmax.f32 %v103_v11, 0.0  ;;  %v109_v16 = vmax.f32 %v105_v12, 0.0 }
  0x93   :  { %v147_v17 = vpack.c.bf16 %v107_v15, %v106_v13  ;;  %v152_v18 = vpack.c.bf16 %v109_v16, %v108_v14 }
  0x95   :  { %148 = vst [vmem:[%s202_s3] sm:$0xff] %v147_v17  }
  0x96   :  { %154 = vst [vmem:[%s202_s3 + $0x8] sm:$0xff] %v152_v18  }

// kernel: forward.25
= control target key start
LH: loop header
LB: loop body
LE: loop exit
PB: predicated region body
PF: predicated region fallthrough
CT: control target
= control target key end

     0   :  { %vm19_vm0 = vcmask 261120   ;;  %v170_v1 = vmov 0.0   ;;  %vm74_vm1 = vcmask 523264   ;;  %s236_s1 = inlined_call_operand.vmem [shape: bf16[64,32], index: 1, kind: input, shape index: {}]   ;;  %s237_s2 = inlined_call_operand.vmem [shape: f32[1,32], index: 2, kind: input, shape index: {}]   ;;  %s238_s0 = inlined_call_operand.vmem [shape: bf16[32,64], index: 0, kind: input, shape index: {}]   ;;  %s239_s3 = inlined_call_operand.vmem [shape: f32[32,32], index: 3, kind: output, shape index: {}]  }
   0x1   :  { %v163_v0 = vld [vmem:[%s236_s1 + $0x18] sm:$0xff]  ;;  %20 = vst.msk [vmem:[#allocation2] sm:$0xff] %vm19_vm0, %v170_v1  ;;  %v162_v2 = vld [vmem:[%s236_s1 + $0x10] sm:$0xff]  ;;  %v161_v3 = vld [vmem:[%s236_s1 + $0x8] sm:$0xff] }
   0x2   :  { %21 = vst.msk [vmem:[#allocation2 + $0x8] sm:$0xff] %vm19_vm0, %v170_v1  ;;  %85 = vmatpush.bf16.msra.mxu0 %v163_v0  ;;  %164 = vmatpush.bf16.msra.mxu1 %v163_v0  ;;  %v160_v4 = vld [vmem:[%s236_s1] sm:$0xff]  ;;  %v159_v6 = vld [vmem:[%s238_s0 + $0x8] sm:$0xff] }
   0x3   :  { %22 = vst.msk [vmem:[#allocation2 + $0x10] sm:$0xff] %vm19_vm0, %v170_v1  ;;  %v158_v5 = vld [vmem:[%s238_s0] sm:$0xff] }
   0x4   :  { %23 = vst.msk [vmem:[#allocation2 + $0x18] sm:$0xff] %vm19_vm0, %v170_v1  ;;  %v169_v15 = vld [vmem:[%s237_s2] ss:$0 sm:$0xff] }
   0x6   :  { %86 = vmatpush.bf16.msra.mxu0 %v162_v2  ;;  %165 = vmatpush.bf16.msra.mxu1 %v162_v2 }
   0x8   :  { %v24_v7 = vld [vmem:[#allocation2] sm:$0xff] }
   0x9   :  { %v25_v13 = vld [vmem:[#allocation2 + $0x8] sm:$0xff] }
   0xa   :  { %87 = vmatpush.bf16.msra.mxu0 %v161_v3  ;;  %166 = vmatpush.bf16.msra.mxu1 %v161_v3  ;;  %v26_v8 = vld [vmem:[#allocation2 + $0x10] sm:$0xff] }
   0xb   :  { %v27_v14 = vld [vmem:[#allocation2 + $0x18] sm:$0xff] }
   0xe   :  { %88 = vmatpush.bf16.msra.mxu0 %v160_v4  ;;  %167 = vmatpush.bf16.msra.mxu1 %v160_v4 }
  0x11   :  { %156 = vmatmul.msk.bf16.vlgmr.msra.gmra.mxu0 %vm74_vm1, %v158_v5  ;;  %157 = vmatmul.msk.bf16.vlgmr.msra.gmra.mxu1 %vm74_vm1, %v159_v6 }
  0x8e   :  { %v90_v9 = vpop.f32.mrf.mxu0  ;;  %v95_v10 = vpop.f32.mrf.mxu1 }
  0x8f   :  { %v100_v11 = vadd.f32 %v90_v9, %v24_v7  ;;  %v102_v12 = vadd.f32 %v95_v10, %v26_v8 }
  0x91   :  { %105 = vst.msk [vmem:[#allocation2] sm:$0xff] %vm19_vm0, %v100_v11 }
  0x92   :  { %107 = vst.msk [vmem:[#allocation2 + $0x10] sm:$0xff] %vm19_vm0, %v102_v12 }
  0x96   :  { %v92_v16 = vpop.f32.mrf.mxu0  ;;  %v97_v17 = vpop.f32.mrf.mxu1 }
  0x97   :  { %v101_v18 = vadd.f32 %v92_v16, %v25_v13  ;;  %v103_v19 = vadd.f32 %v97_v17, %v27_v14 }
  0x98   :  { %v112_v20 = vld [vmem:[#allocation2] sm:$0xff] }
  0x99   :  { %v120_v21 = vadd.f32 %v169_v15, %v112_v20  ;;  %v114_v22 = vld [vmem:[#allocation2 + $0x10] sm:$0xff]  ;;  %106 = vst.msk [vmem:[#allocation2 + $0x8] sm:$0xff] %vm19_vm0, %v101_v18 }
  0x9a   :  { %v122_v23 = vadd.f32 %v169_v15, %v114_v22  ;;  %108 = vst.msk [vmem:[#allocation2 + $0x18] sm:$0xff] %vm19_vm0, %v103_v19 }
  0x9b   :  { %124 = vst.msk [vmem:[%s239_s3] sm:$0xff] %vm19_vm0, %v120_v21 }
  0x9c   :  { %126 = vst.msk [vmem:[%s239_s3 + $0x10] sm:$0xff] %vm19_vm0, %v122_v23 }
  0xa0   :  { %v113_v24 = vld [vmem:[#allocation2 + $0x8] sm:$0xff] }
  0xa1   :  { %v121_v25 = vadd.f32 %v169_v15, %v113_v24  ;;  %v115_v26 = vld [vmem:[#allocation2 + $0x18] sm:$0xff] }
  0xa2   :  { %v123_v27 = vadd.f32 %v169_v15, %v115_v26 }
  0xa3   :  { %125 = vst.msk [vmem:[%s239_s3 + $0x8] sm:$0xff] %vm19_vm0, %v121_v25 }
  0xa4   :  { %127 = vst.msk [vmem:[%s239_s3 + $0x18] sm:$0xff] %vm19_vm0, %v123_v27 }

// kernel: forward.27
= control target key start
LH: loop header
LB: loop body
LE: loop exit
PB: predicated region body
PF: predicated region fallthrough
CT: control target
= control target key end

     0   :  { %vm18_vm0 = vcmask 261120   ;;  %v218_v2 = vmov 0.0   ;;  %s296_s1 = inlined_call_operand.vmem [shape: bf16[128,32], index: 1, kind: input, shape index: {}]   ;;  %s297_s2 = inlined_call_operand.vmem [shape: f32[1,32], index: 2, kind: input, shape index: {}]   ;;  %s298_s0 = inlined_call_operand.vmem [shape: bf16[32,128], index: 0, kind: input, shape index: {}]   ;;  %s299_s3 = inlined_call_operand.vmem [shape: f32[32,32], index: 3, kind: output, shape index: {}]  }
   0x1   :  { %v207_v0 = vld [vmem:[%s296_s1 + $0x38] sm:$0xff]  ;;  %v206_v1 = vld [vmem:[%s296_s1 + $0x30] sm:$0xff]  ;;  %19 = vst.msk [vmem:[#allocation2] sm:$0xff] %vm18_vm0, %v218_v2  ;;  %v205_v3 = vld [vmem:[%s296_s1 + $0x28] sm:$0xff] }
   0x2   :  { %107 = vmatpush.bf16.msra.mxu0 %v207_v0  ;;  %208 = vmatpush.bf16.msra.mxu1 %v207_v0  ;;  %20 = vst.msk [vmem:[#allocation2 + $0x8] sm:$0xff] %vm18_vm0, %v218_v2  ;;  %v204_v4 = vld [vmem:[%s296_s1 + $0x20] sm:$0xff]  ;;  %v203_v5 = vld [vmem:[%s296_s1 + $0x18] sm:$0xff]  ;;  %v202_v6 = vld [vmem:[%s296_s1 + $0x10] sm:$0xff] }
   0x3   :  { %21 = vst.msk [vmem:[#allocation2 + $0x10] sm:$0xff] %vm18_vm0, %v218_v2  ;;  %v201_v7 = vld [vmem:[%s296_s1 + $0x8] sm:$0xff]  ;;  %v200_v8 = vld [vmem:[%s296_s1] sm:$0xff] }
   0x4   :  { %22 = vst.msk [vmem:[#allocation2 + $0x18] sm:$0xff] %vm18_vm0, %v218_v2  ;;  %v198_v9 = vld [vmem:[%s298_s0] sm:$0xff]  ;;  %v199_v10 = vld [vmem:[%s298_s0 + $0x8] sm:$0xff] }
   0x5   :  { %v217_v19 = vld [vmem:[%s297_s2] ss:$0 sm:$0xff] }
   0x6   :  { %108 = vmatpush.bf16.msra.mxu0 %v206_v1  ;;  %209 = vmatpush.bf16.msra.mxu1 %v206_v1 }
   0x8   :  { %v23_v11 = vld [vmem:[#allocation2] sm:$0xff] }
   0x9   :  { %v24_v17 = vld [vmem:[#allocation2 + $0x8] sm:$0xff] }
   0xa   :  { %109 = vmatpush.bf16.msra.mxu0 %v205_v3  ;;  %210 = vmatpush.bf16.msra.mxu1 %v205_v3  ;;  %v25_v12 = vld [vmem:[#allocation2 + $0x10] sm:$0xff] }
   0xb   :  { %v26_v18 = vld [vmem:[#allocation2 + $0x18] sm:$0xff] }
   0xe   :  { %110 = vmatpush.bf16.msra.mxu0 %v204_v4  ;;  %211 = vmatpush.bf16.msra.mxu1 %v204_v4 }
  0x12   :  { %111 = vmatpush.bf16.msra.mxu0 %v203_v5  ;;  %212 = vmatpush.bf16.msra.mxu1 %v203_v5 }
  0x16   :  { %112 = vmatpush.bf16.msra.mxu0 %v202_v6  ;;  %213 = vmatpush.bf16.msra.mxu1 %v202_v6 }
  0x1a   :  { %113 = vmatpush.bf16.msra.mxu0 %v201_v7  ;;  %214 = vmatpush.bf16.msra.mxu1 %v201_v7 }
  0x1e   :  { %114 = vmatpush.bf16.msra.mxu0 %v200_v8  ;;  %215 = vmatpush.bf16.msra.mxu1 %v200_v8 }
  0x21   :  { %115 = vmatmul.bf16.vlgmr.msra.gmra.mxu0 %v198_v9  ;;  %120 = vmatmul.bf16.vlgmr.msra.gmra.mxu1 %v199_v10 }
  0x9e   :  { %v116_v13 = vpop.f32.mrf.mxu0  ;;  %v121_v14 = vpop.f32.mrf.mxu1 }
  0x9f   :  { %v126_v15 = vadd.f32 %v116_v13, %v23_v11  ;;  %v128_v16 = vadd.f32 %v121_v14, %v25_v12 }
  0xa1   :  { %131 = vst.msk [vmem:[#allocation2] sm:$0xff] %vm18_vm0, %v126_v15 }
  0xa2   :  { %133 = vst.msk [vmem:[#allocation2 + $0x10] sm:$0xff] %vm18_vm0, %v128_v16 }
  0xa6   :  { %v118_v20 = vpop.f32.mrf.mxu0  ;;  %v123_v21 = vpop.f32.mrf.mxu1 }
  0xa7   :  { %v127_v22 = vadd.f32 %v118_v20, %v24_v17  ;;  %v129_v23 = vadd.f32 %v123_v21, %v26_v18 }
  0xa8   :  { %v138_v24 = vld [vmem:[#allocation2] sm:$0xff] }
  0xa9   :  { %v146_v25 = vadd.f32 %v217_v19, %v138_v24  ;;  %v140_v26 = vld [vmem:[#allocation2 + $0x10] sm:$0xff]  ;;  %132 = vst.msk [vmem:[#allocation2 + $0x8] sm:$0xff] %vm18_vm0, %v127_v22 }
  0xaa   :  { %v148_v27 = vadd.f32 %v217_v19, %v140_v26  ;;  %134 = vst.msk [vmem:[#allocation2 + $0x18] sm:$0xff] %vm18_vm0, %v129_v23 }
  0xab   :  { %150 = vst.msk [vmem:[%s299_s3] sm:$0xff] %vm18_vm0, %v146_v25 }
  0xac   :  { %152 = vst.msk [vmem:[%s299_s3 + $0x10] sm:$0xff] %vm18_vm0, %v148_v27 }
  0xb0   :  { %v139_v28 = vld [vmem:[#allocation2 + $0x8] sm:$0xff] }
  0xb1   :  { %v147_v29 = vadd.f32 %v217_v19, %v139_v28  ;;  %v141_v30 = vld [vmem:[#allocation2 + $0x18] sm:$0xff] }
  0xb2   :  { %v149_v31 = vadd.f32 %v217_v19, %v141_v30 }
  0xb3   :  { %151 = vst.msk [vmem:[%s299_s3 + $0x8] sm:$0xff] %vm18_vm0, %v147_v29 }
  0xb4   :  { %153 = vst.msk [vmem:[%s299_s3 + $0x18] sm:$0xff] %vm18_vm0, %v149_v31 }

// kernel: forward.33
= control target key start
LH: loop header
LB: loop body
LE: loop exit
PB: predicated region body
PF: predicated region fallthrough
CT: control target
= control target key end

     0   :  { %vm20_vm0 = vcmask 33792   ;;  %s166_s0 = inlined_call_operand.vmem [shape: bf16[2,32], index: 0, kind: input, shape index: {}]   ;;  %s167_s1 = inlined_call_operand.vmem [shape: bf16[32,5], index: 1, kind: input, shape index: {}]   ;;  %s168_s2 = inlined_call_operand.vmem [shape: f32[1,5], index: 2, kind: input, shape index: {}]   ;;  %s169_s3 = inlined_call_operand.hbm [shape: f32[2,5], index: 3, kind: output, shape index: {}]  }
   0x1   :  { %v96_v0 = vld [vmem:[%s167_s1 + $0x8] sm:$0xff] }
   0x2   :  { %8 = vsyncpa [#allocation4], 0  ;;  %50 = vmatpush.bf16.msra.mxu0 %v96_v0  ;;  %v95_v1 = vld [vmem:[%s167_s1] sm:$0xff]  ;;  %v126_v2 = vmov 0.0   ;;  %vm40_vm1 = vcmask 261120   ;;  %s127_s1 = smov [#allocation3]  }
   0x3   :  { %21 = vst.msk [vmem:[#allocation2] sm:$0x3] %vm20_vm0, %v126_v2  ;;  %v23_v3 = vld [vmem:[%s166_s0] sm:$0x1]  ;;  %s75_s20 = sshll.u32 %s127_s1, 4  ;;  %s77_s23 = sshll.u32 %s169_s3, 4  ;;  %s76_s20 = int_to_ptr.vmem [resolvable:$true] %s75_s20  ;;  %s78_s23 = int_to_ptr.hbm [resolvable:$true] %s77_s23 }
   0x4   :  { %v99_v7 = vld [vmem:[%s168_s2] ss:$0 sm:$0xff] }
   0x6   :  { %51 = vmatpush.bf16.msra.mxu0 %v95_v1 }
   0x9   :  { %94 = vmatmul.msk.bf16.vlgmr.msra.gmra.mxu0 %vm40_vm1, %v23_v3 }
   0xa   :  { %v22_v4 = vld [vmem:[#allocation2] sm:$0x3] }
  0x86   :  { %v53_v5 = vpop.f32.mrf.mxu0 }
  0x87   :  { %v57_v6 = vadd.f32 %v53_v5, %v22_v4 }
  0x89   :  { %59 = vst.msk [vmem:[#allocation2] sm:$0x3] %vm20_vm0, %v57_v6 }
  0x8e   :  { %v55_v8 = vpop.f32.mrf.mxu0 }
  0x90   :  { %v63_v9 = vld [vmem:[#allocation2] sm:$0x3] }
  0x91   :  { %v68_v10 = vadd.f32 %v99_v7, %v63_v9 }
  0x93   :  { %69 = vst.msk [vmem:[#allocation3] sm:$0x3] %vm20_vm0, %v68_v10 }
  0x94   :  { %80 = dma.vmem_to_hbm [thread:$0]  %s76_s20, 32, %s78_s23, [#allocation4]  }
  0x95   :  { %124 = dma.done.wait [#allocation4], 32  }
  0x96   :  { %125 = vsyncadd [#allocation4], 4294967264 }
  0x97   :  { %85 = vsyncpa [#allocation4], 1 }

</bundles_post_ra>
